<compile_context>
chip_gen: v6e
topology: v6e:2x2x1
jax: 0.10.0
libtpu: 0.0.40
codegen_flags: <defaults>
</compile_context>

<pallas_src>
import functools

import numpy as np
import jax
import jax.numpy as jnp
from jax.experimental import pallas as pl
from jax.experimental.pallas import tpu as pltpu


# Well above the <1 MiB actually used; safe on every generation (v7x physical VMEM is 64 MiB).
_VMEM_LIMIT = 32 * 1024 * 1024


# ------------------------- 3x3 conv taps (channels-first, lane-shifted reads) -------------------------

def _conv3x3_taps(xpad_ref, w_ref, *, W, TN):
    """9-tap 3x3 conv on a channels-first, flat zero-padded image slab.

    xpad_ref block: (1, Cin, NpadL) bf16 -- spatial on lanes, >= W+1 zeros on each side.
    w_ref:          (9, Cout, Cin) bf16  -- tap-major weights, tap = dy*3 + dx.
    Returns a lane-dense (Cout, TN) f32 accumulator.
    """
    cout = w_ref.shape[1]
    # Column index of each output position (lane-oriented); TN is a multiple of W.
    col = jax.lax.broadcasted_iota(jnp.int32, (1, TN), 1) % W
    mask_l = (col != 0).astype(jnp.float32)        # dx == 0 taps invalid at w == 0
    mask_r = (col != (W - 1)).astype(jnp.float32)  # dx == 2 taps invalid at w == W-1

    acc = jnp.zeros((cout, TN), jnp.float32)
    for dx in range(3):
        part = jnp.zeros((cout, TN), jnp.float32)
        for dy in range(3):
            off = dy * W + dx                        # static offset into the padded slab
            a = xpad_ref[0, :, off:off + TN]         # (Cin, TN) bf16, lane-shifted read
            # natural MXU form: (Cout, Cin) @ (Cin, TN) -> (Cout, TN), lanes fully occupied
            part = part + jnp.dot(w_ref[dy * 3 + dx], a,
                                  preferred_element_type=jnp.float32)
        if dx == 0:
            part = part * mask_l                     # mask once per dx (2 masked mults total)
        elif dx == 2:
            part = part * mask_r
        acc = acc + part
    return acc


def _conv3x3_bn_relu_kernel(xpad_ref, w_ref, scale_ref, bias_ref, o_ref, *, W, TN):
    # conv5a: 3x3 conv (no bias) + folded BatchNorm(eval) + ReLU, channels-first output.
    acc = _conv3x3_taps(xpad_ref, w_ref, W=W, TN=TN)            # (Cout, TN) f32
    y = jnp.maximum(acc * scale_ref[...] + bias_ref[...], 0.0)  # BN + ReLU in f32
    o_ref[0] = y.astype(o_ref.dtype)


def _conv3x3_bn_relu_conv1x1_kernel(xpad_ref, w_ref, scale_ref, bias_ref,
                                    w8_ref, b8_ref, o_ref, *, W, TN):
    # conv51 (3x3 + BN + ReLU) fused with conv8 (Dropout2d = identity, 1x1 conv + bias).
    acc = _conv3x3_taps(xpad_ref, w_ref, W=W, TN=TN)            # (C, TN) f32
    y = jnp.maximum(acc * scale_ref[...] + bias_ref[...], 0.0)  # (C, TN) f32
    out = jnp.dot(w8_ref[...], y, preferred_element_type=jnp.float32) + b8_ref[...]
    o_ref[0] = out.astype(o_ref.dtype)                          # (cout, TN) lane-dense


# ------------------------- PAM: flash-style streamed position attention -------------------------

def _pam_flash_kernel(xq_ref, xk_ref, wq_ref, bq_ref, wkv_ref, bkv_ref, gamma_ref,
                      o_ref, q_s, m_s, l_s, acc_s, *, C):
    # Streams over key/value tiles (grid axis 2, "arbitrary"); never materializes (N, N) in HBM.
    ki = pl.program_id(2)

    @pl.when(ki == 0)
    def _init():
        # q projection computed once per (b, q-tile) and cached in VMEM scratch: (c8, TQ).
        q_s[...] = (jnp.dot(wq_ref[...], xq_ref[0],
                            preferred_element_type=jnp.float32) + bq_ref[...])
        m_s[...] = jnp.full_like(m_s, -jnp.inf)
        l_s[...] = jnp.zeros_like(l_s)
        acc_s[...] = jnp.zeros_like(acc_s)

    # Fused k|v 1x1 projection: one matmul, rows [0:C) = v, rows [C:C+c8) = k.
    xk = xk_ref[0]                                                        # (C, TK) bf16
    kv = jnp.dot(wkv_ref[...], xk, preferred_element_type=jnp.float32) + bkv_ref[...]
    v = kv[:C, :]                                                         # (C, TK) f32
    k = kv[C:, :]                                                         # (c8, TK) f32

    # s[j, i] = k_j . q_i  -- keys on sublanes, queries on lanes, so running stats / acc
    # stay lane-dense and no transposes are needed anywhere in the loop.
    s = jax.lax.dot_general(k, q_s[...], (((0,), (0,)), ((), ())),
                            preferred_element_type=jnp.float32)           # (TK, TQ)
    m_prev = m_s[...]
    m_new = jnp.maximum(m_prev, jnp.max(s, axis=0, keepdims=True))        # (1, TQ)
    alpha = jnp.exp(m_prev - m_new)
    p = jnp.exp(s - m_new)                                                # (TK, TQ)
    l_s[...] = alpha * l_s[...] + jnp.sum(p, axis=0, keepdims=True)
    acc_s[...] = alpha * acc_s[...] + jnp.dot(v, p,                       # (C, TQ) f32
                                              preferred_element_type=jnp.float32)
    m_s[...] = m_new

    @pl.when(ki == pl.num_programs(2) - 1)
    def _finalize():
        inv_l = pl.reciprocal(l_s[...], approx=True)      # EUP slot; covered by tolerance
        out = acc_s[...] * inv_l                          # (C, TQ)
        o_ref[0] = (gamma_ref[...] * out
                    + xq_ref[0].astype(jnp.float32)).astype(o_ref.dtype)


# ------------------------- pallas_call wrappers -------------------------

def _conv3x3_bn_relu(xpad, w9, scale, bias, *, N, W):
    B, Cin, NpadL = xpad.shape
    Cout = w9.shape[1]
    kernel = functools.partial(_conv3x3_bn_relu_kernel, W=W, TN=N)
    return pl.pallas_call(
        kernel,
        out_shape=jax.ShapeDtypeStruct((B, Cout, N), jnp.bfloat16),
        grid=(B,),
        in_specs=[
            pl.BlockSpec((1, Cin, NpadL), lambda b: (b, 0, 0)),   # padded slab (auto-pipelined)
            pl.BlockSpec((9, Cout, Cin), lambda b: (0, 0, 0)),
            pl.BlockSpec((Cout, 1), lambda b: (0, 0)),
            pl.BlockSpec((Cout, 1), lambda b: (0, 0)),
        ],
        out_specs=pl.BlockSpec((1, Cout, N), lambda b: (b, 0, 0)),
        compiler_params=pltpu.CompilerParams(
            dimension_semantics=("parallel",),
            vmem_limit_bytes=_VMEM_LIMIT),
    )(xpad, w9, scale, bias)


def _conv3x3_bn_relu_conv1x1(xpad, w9, scale, bias, w8, b8, *, N, W):
    B, Cin, NpadL = xpad.shape
    C = w9.shape[1]
    cout = w8.shape[0]
    kernel = functools.partial(_conv3x3_bn_relu_conv1x1_kernel, W=W, TN=N)
    return pl.pallas_call(
        kernel,
        out_shape=jax.ShapeDtypeStruct((B, cout, N), jnp.float32),   # channels-first, lane-dense
        grid=(B,),
        in_specs=[
            pl.BlockSpec((1, Cin, NpadL), lambda b: (b, 0, 0)),
            pl.BlockSpec((9, C, Cin), lambda b: (0, 0, 0)),
            pl.BlockSpec((C, 1), lambda b: (0, 0)),
            pl.BlockSpec((C, 1), lambda b: (0, 0)),
            pl.BlockSpec((cout, C), lambda b: (0, 0)),
            pl.BlockSpec((cout, 1), lambda b: (0, 0)),
        ],
        out_specs=pl.BlockSpec((1, cout, N), lambda b: (b, 0, 0)),
        compiler_params=pltpu.CompilerParams(
            dimension_semantics=("parallel",),
            vmem_limit_bytes=_VMEM_LIMIT),
    )(xpad, w9, scale, bias, w8, b8)


def _pam_flash(x, wq, bq, wkv, bkv, gamma, *, tq, tk):
    B, C, N = x.shape
    c8 = wq.shape[0]
    kernel = functools.partial(_pam_flash_kernel, C=C)
    return pl.pallas_call(
        kernel,
        out_shape=jax.ShapeDtypeStruct((B, C, N), jnp.bfloat16),
        grid=(B, N // tq, N // tk),
        in_specs=[
            pl.BlockSpec((1, C, tq), lambda b, qi, ki: (b, 0, qi)),   # query tile (channels-first)
            pl.BlockSpec((1, C, tk), lambda b, qi, ki: (b, 0, ki)),   # key/value tile
            pl.BlockSpec((c8, C), lambda b, qi, ki: (0, 0)),
            pl.BlockSpec((c8, 1), lambda b, qi, ki: (0, 0)),
            pl.BlockSpec((C + c8, C), lambda b, qi, ki: (0, 0)),      # fused [wv; wk]
            pl.BlockSpec((C + c8, 1), lambda b, qi, ki: (0, 0)),      # fused [bv; bk]
            pl.BlockSpec((1, 1), lambda b, qi, ki: (0, 0)),           # gamma
        ],
        out_specs=pl.BlockSpec((1, C, tq), lambda b, qi, ki: (b, 0, qi)),
        scratch_shapes=[
            pltpu.VMEM((c8, tq), jnp.float32),   # cached q projection
            pltpu.VMEM((1, tq), jnp.float32),    # running max m (lane-dense)
            pltpu.VMEM((1, tq), jnp.float32),    # running denom l (lane-dense)
            pltpu.VMEM((C, tq), jnp.float32),    # output accumulator (lane-dense)
        ],
        compiler_params=pltpu.CompilerParams(
            dimension_semantics=("parallel", "parallel", "arbitrary"),
            vmem_limit_bytes=_VMEM_LIMIT),
    )(x, x, wq, bq, wkv, bkv, gamma)


# ------------------------- JAX glue -------------------------

def _bn_fold(w, b, m, v, eps=1e-5):
    scale = w / jnp.sqrt(v + eps)
    bias = b - m * scale
    return scale.reshape(-1, 1), bias.reshape(-1, 1)


def danet_head_forward(x_nchw, p):
    B, Cin, H, W = x_nchw.shape
    inter = p["w5a"].shape[0]
    c8 = p["wq"].shape[0]
    cout = p["w8"].shape[0]
    N = H * W

    assert N % 128 == 0   # TODO(synk): pad spatial to a multiple of 128 + validity mask otherwise
    # Collapse to one grid step per image / one key step at small N (overhead-dominated otherwise).
    tq = tk = min(N, 512)
    assert N % tq == 0

    # Channels-first flat layout with >= W+1 zeros on each side of the lane axis (makes all 9
    # shifted reads in-bounds; vertical edges fall in the zero pad, horizontal edges are masked).
    npadl = pl.cdiv(N + 2 * (W + 1), 128) * 128

    def pad_lanes(x_cf):
        return jnp.pad(x_cf, ((0, 0), (0, 0), (W + 1, npadl - N - (W + 1))))

    def conv_w(w_oihw):
        co, ci = w_oihw.shape[0], w_oihw.shape[1]
        # (Cout, Cin, 3, 3) -> (9, Cout, Cin), tap index = dy*3 + dx
        return jnp.transpose(w_oihw, (2, 3, 0, 1)).reshape(9, co, ci).astype(jnp.bfloat16)

    # NCHW input is already channels-first: just flatten spatial and pad the lane axis.
    x_cf = x_nchw.reshape(B, Cin, N).astype(jnp.bfloat16)

    # --- conv5a: 3x3 conv (no bias) + BN + ReLU ---
    s5a, b5a = _bn_fold(p["bn5a_w"], p["bn5a_b"], p["bn5a_m"], p["bn5a_v"])
    feat1 = _conv3x3_bn_relu(pad_lanes(x_cf), conv_w(p["w5a"]), s5a, b5a,
                             N=N, W=W)                                  # (B, inter, N) bf16

    # --- sa: PAM_Module (streamed softmax attention, fused k|v projection) ---
    wq = p["wq"].reshape(c8, inter).astype(jnp.bfloat16)
    wkv = jnp.concatenate([p["wv"].reshape(inter, inter),
                           p["wk"].reshape(c8, inter)], axis=0).astype(jnp.bfloat16)
    bkv = jnp.concatenate([p["bv"], p["bk"]]).reshape(inter + c8, 1)
    sa_feat = _pam_flash(feat1, wq, p["bq"].reshape(c8, 1), wkv, bkv,
                         p["gamma"].reshape(1, 1), tq=tq, tk=tk)        # (B, inter, N) bf16

    # --- conv51 (3x3 + BN + ReLU) fused with conv8 (dropout = identity, 1x1 + bias) ---
    s51, b51 = _bn_fold(p["bn51_w"], p["bn51_b"], p["bn51_m"], p["bn51_v"])
    out = _conv3x3_bn_relu_conv1x1(pad_lanes(sa_feat), conv_w(p["w51"]), s51, b51,
                                   p["w8"].reshape(cout, inter),
                                   p["b8"].reshape(cout, 1), N=N, W=W)  # (B, cout, N) f32

    return out.reshape(B, cout, H, W)                                   # NCHW


# ------------------------- parameters -------------------------

def init_params(key, in_channels, out_channels):
    inter = in_channels // 4
    c8 = inter // 8
    ks = jax.random.split(key, 18)

    def normal(k, shape, scale=0.1):
        return scale * jax.random.normal(k, shape, jnp.float32)

    p = {
        "w5a":   normal(ks[0], (inter, in_channels, 3, 3)),
        "bn5a_w": 1.0 + 0.1 * jax.random.normal(ks[1], (inter,), jnp.float32),
        "bn5a_b": normal(ks[2], (inter,)),
        "bn5a_m": normal(ks[3], (inter,)),
        "bn5a_v": 1.0 + 0.1 * jnp.abs(jax.random.normal(ks[4], (inter,), jnp.float32)),
        "wq": normal(ks[5], (c8, inter, 1, 1)),
        "bq": normal(ks[6], (c8,)),
        "wk": normal(ks[7], (c8, inter, 1, 1)),
        "bk": normal(ks[8], (c8,)),
        "wv": normal(ks[9], (inter, inter, 1, 1)),
        "bv": normal(ks[10], (inter,)),
        "gamma": jnp.array([0.5], jnp.float32),  # PyTorch init is 0; nonzero to exercise the path
        "w51":   normal(ks[11], (inter, inter, 3, 3)),
        "bn51_w": 1.0 + 0.1 * jax.random.normal(ks[12], (inter,), jnp.float32),
        "bn51_b": normal(ks[13], (inter,)),
        "bn51_m": normal(ks[14], (inter,)),
        "bn51_v": 1.0 + 0.1 * jnp.abs(jax.random.normal(ks[15], (inter,), jnp.float32)),
        "w8": normal(ks[16], (out_channels, inter, 1, 1)),
        "b8": normal(ks[17], (out_channels,)),
    }
    return p


# ------------------------- pure-JAX reference (PyTorch semantics, NCHW, f32) -------------------------

def ref_forward(x, p, eps=1e-5):
    def conv3(x, w):
        return jax.lax.conv_general_dilated(
            x, w, (1, 1), ((1, 1), (1, 1)), dimension_numbers=("NCHW", "OIHW", "NCHW"))

    def conv1(x, w, b):
        y = jax.lax.conv_general_dilated(
            x, w, (1, 1), ((0, 0), (0, 0)), dimension_numbers=("NCHW", "OIHW", "NCHW"))
        return y + b[None, :, None, None]

    def bn_relu(y, w, b, m, v):
        y = (y - m[None, :, None, None]) / jnp.sqrt(v[None, :, None, None] + eps)
        y = y * w[None, :, None, None] + b[None, :, None, None]
        return jnp.maximum(y, 0.0)

    feat1 = bn_relu(conv3(x, p["w5a"]), p["bn5a_w"], p["bn5a_b"], p["bn5a_m"], p["bn5a_v"])

    B, C, H, W = feat1.shape
    N = H * W
    pq = conv1(feat1, p["wq"], p["bq"]).reshape(B, -1, N).transpose(0, 2, 1)
    pk = conv1(feat1, p["wk"], p["bk"]).reshape(B, -1, N)
    energy = pq @ pk
    attn = jax.nn.softmax(energy, axis=-1)
    pv = conv1(feat1, p["wv"], p["bv"]).reshape(B, -1, N)
    out = pv @ jnp.transpose(attn, (0, 2, 1))
    sa_feat = p["gamma"][0] * out.reshape(B, C, H, W) + feat1

    sa_conv = bn_relu(conv3(sa_feat, p["w51"]), p["bn51_w"], p["bn51_b"], p["bn51_m"], p["bn51_v"])
    return conv1(sa_conv, p["w8"], p["b8"])


# ------------------------- main -------------------------

if __name__ == "__main__":
    B, in_channels, out_channels, H, W = 2, 64, 8, 16, 16
    key = jax.random.PRNGKey(0)
    kx, kp = jax.random.split(key)
    x = jax.random.normal(kx, (B, in_channels, H, W), jnp.float32)
    params = init_params(kp, in_channels, out_channels)

    fwd = jax.jit(danet_head_forward)
    out = jax.block_until_ready(fwd(x, params))
    ref = jax.block_until_ready(ref_forward(x, params))

    assert out.shape == (B, out_channels, H, W), out.shape
    # Tolerance reflects bf16 MXU inputs + bf16 storage of the two intermediate activation
    # tensors across a multi-matmul chain (all accumulation in f32).
    np.testing.assert_allclose(np.asarray(out), np.asarray(ref), rtol=5e-2, atol=8e-2)
    print("KERNEL_OK")
</pallas_src>

<mosaic_0001>
module attributes {stable_mosaic.version = 11 : i64} {
  func.func @_conv3x3_bn_relu_kernel(%arg0: i32, %arg1: memref<1x64x384xbf16, #tpu.memory_space<vmem>>, %arg2: memref<9x16x64xbf16, #tpu.memory_space<vmem>>, %arg3: memref<16x1xf32, #tpu.memory_space<vmem>>, %arg4: memref<16x1xf32, #tpu.memory_space<vmem>>, %arg5: memref<1x16x256xbf16, #tpu.memory_space<vmem>>) attributes {dimension_semantics = [#tpu.dimension_semantics<parallel>], iteration_bounds = array<i64: 2>, scalar_prefetch = 0 : i64, scratch_operands = 0 : i64, tpu.core_type = #tpu.core_type<tc>, window_params = [{transform_indices = @transform_0, window_bounds = array<i64: 1, 64, 384>}, {pipeline_mode = #tpu.pipeline_mode<synchronous>, transform_indices = @transform_1, window_bounds = array<i64: 9, 16, 64>}, {pipeline_mode = #tpu.pipeline_mode<synchronous>, transform_indices = @transform_2, window_bounds = array<i64: 16, 1>}, {pipeline_mode = #tpu.pipeline_mode<synchronous>, transform_indices = @transform_3, window_bounds = array<i64: 16, 1>}, {transform_indices = @transform_4, window_bounds = array<i64: 1, 16, 256>}]} {
    %0 = tpu.iota {dimensions = array<i32: 1>} : vector<1x256xi32>
    %c16_i32 = arith.constant 16 : i32
    %c0_i32 = arith.constant 0 : i32
    %1 = arith.cmpi eq, %c16_i32, %c0_i32 : i32
    %c1_i32 = arith.constant 1 : i32
    %2 = arith.select %1, %c1_i32, %c16_i32 : i32
    %3 = vector.broadcast %2 : i32 to vector<1x256xi32>
    %4 = arith.remsi %0, %3 : vector<1x256xi32>
    %c0_i32_0 = arith.constant 0 : i32
    %5 = vector.broadcast %c0_i32_0 : i32 to vector<1x256xi32>
    %6 = arith.cmpi ne, %4, %5 : vector<1x256xi32>
    %c0_i32_1 = arith.constant 0 : i32
    %7 = vector.broadcast %c0_i32_1 : i32 to vector<1x256xi32>
    %8 = arith.cmpi slt, %4, %7 : vector<1x256xi32>
    %c0_i32_2 = arith.constant 0 : i32
    %9 = arith.cmpi slt, %2, %c0_i32_2 : i32
    %10 = vector.broadcast %9 : i1 to vector<1x256xi1>
    %11 = vector.broadcast %10 : vector<1x256xi1> to vector<1x256xi1>
    %12 = arith.xori %8, %11 : vector<1x256xi1>
    %13 = arith.andi %12, %6 : vector<1x256xi1>
    %14 = vector.broadcast %2 : i32 to vector<1x256xi32>
    %15 = arith.addi %4, %14 : vector<1x256xi32>
    %16 = arith.select %13, %15, %4 : vector<1x256xi1>, vector<1x256xi32>
    %c0_i32_3 = arith.constant 0 : i32
    %17 = vector.broadcast %c0_i32_3 : i32 to vector<1x256xi32>
    %18 = arith.cmpi ne, %16, %17 : vector<1x256xi32>
    %19 = arith.extui %18 : vector<1x256xi1> to vector<1x256xi32>
    %20 = arith.sitofp %19 : vector<1x256xi32> to vector<1x256xf32>
    %c15_i32 = arith.constant 15 : i32
    %21 = vector.broadcast %c15_i32 : i32 to vector<1x256xi32>
    %22 = arith.cmpi ne, %16, %21 : vector<1x256xi32>
    %23 = arith.extui %22 : vector<1x256xi1> to vector<1x256xi32>
    %24 = arith.sitofp %23 : vector<1x256xi32> to vector<1x256xf32>
    %cst = arith.constant 0.000000e+00 : f32
    %25 = vector.broadcast %cst : f32 to vector<16x256xf32>
    %cst_4 = arith.constant 0.000000e+00 : f32
    %26 = vector.broadcast %cst_4 : f32 to vector<16x256xf32>
    %c0 = arith.constant 0 : index
    %c0_5 = arith.constant 0 : index
    %c0_6 = arith.constant 0 : index
    %27 = vector.load %arg1[%c0, %c0_5, %c0_6] : memref<1x64x384xbf16, #tpu.memory_space<vmem>>, vector<1x64x256xbf16>
    %28 = vector.shape_cast %27 : vector<1x64x256xbf16> to vector<64x256xbf16>
    %c0_7 = arith.constant 0 : index
    %c0_8 = arith.constant 0 : index
    %c0_9 = arith.constant 0 : index
    %29 = vector.load %arg2[%c0_7, %c0_8, %c0_9] : memref<9x16x64xbf16, #tpu.memory_space<vmem>>, vector<1x16x64xbf16>
    %30 = vector.shape_cast %29 : vector<1x16x64xbf16> to vector<16x64xbf16>
    %cst_10 = arith.constant dense<0.000000e+00> : vector<16x256xf32>
    %31 = tpu.matmul %30, %28, %cst_10 {dimension_numbers = #tpu.dot_dimension_numbers<[1], [0], [0], [1], [0, 0, 1, 1], [], []>} : vector<16x64xbf16>, vector<64x256xbf16>, vector<16x256xf32> -> vector<16x256xf32>
    %32 = arith.addf %26, %31 : vector<16x256xf32>
    %c0_11 = arith.constant 0 : index
    %c0_12 = arith.constant 0 : index
    %c16 = arith.constant 16 : index
    %33 = vector.load %arg1[%c0_11, %c0_12, %c16] : memref<1x64x384xbf16, #tpu.memory_space<vmem>>, vector<1x64x256xbf16>
    %34 = vector.shape_cast %33 : vector<1x64x256xbf16> to vector<64x256xbf16>
    %c3 = arith.constant 3 : index
    %c0_13 = arith.constant 0 : index
    %c0_14 = arith.constant 0 : index
    %35 = vector.load %arg2[%c3, %c0_13, %c0_14] : memref<9x16x64xbf16, #tpu.memory_space<vmem>>, vector<1x16x64xbf16>
    %36 = vector.shape_cast %35 : vector<1x16x64xbf16> to vector<16x64xbf16>
    %cst_15 = arith.constant dense<0.000000e+00> : vector<16x256xf32>
    %37 = tpu.matmul %36, %34, %cst_15 {dimension_numbers = #tpu.dot_dimension_numbers<[1], [0], [0], [1], [0, 0, 1, 1], [], []>} : vector<16x64xbf16>, vector<64x256xbf16>, vector<16x256xf32> -> vector<16x256xf32>
    %38 = arith.addf %32, %37 : vector<16x256xf32>
    %c0_16 = arith.constant 0 : index
    %c0_17 = arith.constant 0 : index
    %c32 = arith.constant 32 : index
    %39 = vector.load %arg1[%c0_16, %c0_17, %c32] : memref<1x64x384xbf16, #tpu.memory_space<vmem>>, vector<1x64x256xbf16>
    %40 = vector.shape_cast %39 : vector<1x64x256xbf16> to vector<64x256xbf16>
    %c6 = arith.constant 6 : index
    %c0_18 = arith.constant 0 : index
    %c0_19 = arith.constant 0 : index
    %41 = vector.load %arg2[%c6, %c0_18, %c0_19] : memref<9x16x64xbf16, #tpu.memory_space<vmem>>, vector<1x16x64xbf16>
    %42 = vector.shape_cast %41 : vector<1x16x64xbf16> to vector<16x64xbf16>
    %cst_20 = arith.constant dense<0.000000e+00> : vector<16x256xf32>
    %43 = tpu.matmul %42, %40, %cst_20 {dimension_numbers = #tpu.dot_dimension_numbers<[1], [0], [0], [1], [0, 0, 1, 1], [], []>} : vector<16x64xbf16>, vector<64x256xbf16>, vector<16x256xf32> -> vector<16x256xf32>
    %44 = arith.addf %38, %43 : vector<16x256xf32>
    %45 = vector.broadcast %20 : vector<1x256xf32> to vector<16x256xf32>
    %46 = arith.mulf %44, %45 : vector<16x256xf32>
    %47 = arith.addf %25, %46 : vector<16x256xf32>
    %cst_21 = arith.constant 0.000000e+00 : f32
    %48 = vector.broadcast %cst_21 : f32 to vector<16x256xf32>
    %c0_22 = arith.constant 0 : index
    %c0_23 = arith.constant 0 : index
    %c1 = arith.constant 1 : index
    %49 = vector.load %arg1[%c0_22, %c0_23, %c1] : memref<1x64x384xbf16, #tpu.memory_space<vmem>>, vector<1x64x256xbf16>
    %50 = vector.shape_cast %49 : vector<1x64x256xbf16> to vector<64x256xbf16>
    %c1_24 = arith.constant 1 : index
    %c0_25 = arith.constant 0 : index
    %c0_26 = arith.constant 0 : index
    %51 = vector.load %arg2[%c1_24, %c0_25, %c0_26] : memref<9x16x64xbf16, #tpu.memory_space<vmem>>, vector<1x16x64xbf16>
    %52 = vector.shape_cast %51 : vector<1x16x64xbf16> to vector<16x64xbf16>
    %cst_27 = arith.constant dense<0.000000e+00> : vector<16x256xf32>
    %53 = tpu.matmul %52, %50, %cst_27 {dimension_numbers = #tpu.dot_dimension_numbers<[1], [0], [0], [1], [0, 0, 1, 1], [], []>} : vector<16x64xbf16>, vector<64x256xbf16>, vector<16x256xf32> -> vector<16x256xf32>
    %54 = arith.addf %48, %53 : vector<16x256xf32>
    %c0_28 = arith.constant 0 : index
    %c0_29 = arith.constant 0 : index
    %c17 = arith.constant 17 : index
    %55 = vector.load %arg1[%c0_28, %c0_29, %c17] : memref<1x64x384xbf16, #tpu.memory_space<vmem>>, vector<1x64x256xbf16>
    %56 = vector.shape_cast %55 : vector<1x64x256xbf16> to vector<64x256xbf16>
    %c4 = arith.constant 4 : index
    %c0_30 = arith.constant 0 : index
    %c0_31 = arith.constant 0 : index
    %57 = vector.load %arg2[%c4, %c0_30, %c0_31] : memref<9x16x64xbf16, #tpu.memory_space<vmem>>, vector<1x16x64xbf16>
    %58 = vector.shape_cast %57 : vector<1x16x64xbf16> to vector<16x64xbf16>
    %cst_32 = arith.constant dense<0.000000e+00> : vector<16x256xf32>
    %59 = tpu.matmul %58, %56, %cst_32 {dimension_numbers = #tpu.dot_dimension_numbers<[1], [0], [0], [1], [0, 0, 1, 1], [], []>} : vector<16x64xbf16>, vector<64x256xbf16>, vector<16x256xf32> -> vector<16x256xf32>
    %60 = arith.addf %54, %59 : vector<16x256xf32>
    %c0_33 = arith.constant 0 : index
    %c0_34 = arith.constant 0 : index
    %c33 = arith.constant 33 : index
    %61 = vector.load %arg1[%c0_33, %c0_34, %c33] : memref<1x64x384xbf16, #tpu.memory_space<vmem>>, vector<1x64x256xbf16>
    %62 = vector.shape_cast %61 : vector<1x64x256xbf16> to vector<64x256xbf16>
    %c7 = arith.constant 7 : index
    %c0_35 = arith.constant 0 : index
    %c0_36 = arith.constant 0 : index
    %63 = vector.load %arg2[%c7, %c0_35, %c0_36] : memref<9x16x64xbf16, #tpu.memory_space<vmem>>, vector<1x16x64xbf16>
    %64 = vector.shape_cast %63 : vector<1x16x64xbf16> to vector<16x64xbf16>
    %cst_37 = arith.constant dense<0.000000e+00> : vector<16x256xf32>
    %65 = tpu.matmul %64, %62, %cst_37 {dimension_numbers = #tpu.dot_dimension_numbers<[1], [0], [0], [1], [0, 0, 1, 1], [], []>} : vector<16x64xbf16>, vector<64x256xbf16>, vector<16x256xf32> -> vector<16x256xf32>
    %66 = arith.addf %60, %65 : vector<16x256xf32>
    %67 = arith.addf %47, %66 : vector<16x256xf32>
    %cst_38 = arith.constant 0.000000e+00 : f32
    %68 = vector.broadcast %cst_38 : f32 to vector<16x256xf32>
    %c0_39 = arith.constant 0 : index
    %c0_40 = arith.constant 0 : index
    %c2 = arith.constant 2 : index
    %69 = vector.load %arg1[%c0_39, %c0_40, %c2] : memref<1x64x384xbf16, #tpu.memory_space<vmem>>, vector<1x64x256xbf16>
    %70 = vector.shape_cast %69 : vector<1x64x256xbf16> to vector<64x256xbf16>
    %c2_41 = arith.constant 2 : index
    %c0_42 = arith.constant 0 : index
    %c0_43 = arith.constant 0 : index
    %71 = vector.load %arg2[%c2_41, %c0_42, %c0_43] : memref<9x16x64xbf16, #tpu.memory_space<vmem>>, vector<1x16x64xbf16>
    %72 = vector.shape_cast %71 : vector<1x16x64xbf16> to vector<16x64xbf16>
    %cst_44 = arith.constant dense<0.000000e+00> : vector<16x256xf32>
    %73 = tpu.matmul %72, %70, %cst_44 {dimension_numbers = #tpu.dot_dimension_numbers<[1], [0], [0], [1], [0, 0, 1, 1], [], []>} : vector<16x64xbf16>, vector<64x256xbf16>, vector<16x256xf32> -> vector<16x256xf32>
    %74 = arith.addf %68, %73 : vector<16x256xf32>
    %c0_45 = arith.constant 0 : index
    %c0_46 = arith.constant 0 : index
    %c18 = arith.constant 18 : index
    %75 = vector.load %arg1[%c0_45, %c0_46, %c18] : memref<1x64x384xbf16, #tpu.memory_space<vmem>>, vector<1x64x256xbf16>
    %76 = vector.shape_cast %75 : vector<1x64x256xbf16> to vector<64x256xbf16>
    %c5 = arith.constant 5 : index
    %c0_47 = arith.constant 0 : index
    %c0_48 = arith.constant 0 : index
    %77 = vector.load %arg2[%c5, %c0_47, %c0_48] : memref<9x16x64xbf16, #tpu.memory_space<vmem>>, vector<1x16x64xbf16>
    %78 = vector.shape_cast %77 : vector<1x16x64xbf16> to vector<16x64xbf16>
    %cst_49 = arith.constant dense<0.000000e+00> : vector<16x256xf32>
    %79 = tpu.matmul %78, %76, %cst_49 {dimension_numbers = #tpu.dot_dimension_numbers<[1], [0], [0], [1], [0, 0, 1, 1], [], []>} : vector<16x64xbf16>, vector<64x256xbf16>, vector<16x256xf32> -> vector<16x256xf32>
    %80 = arith.addf %74, %79 : vector<16x256xf32>
    %c0_50 = arith.constant 0 : index
    %c0_51 = arith.constant 0 : index
    %c34 = arith.constant 34 : index
    %81 = vector.load %arg1[%c0_50, %c0_51, %c34] : memref<1x64x384xbf16, #tpu.memory_space<vmem>>, vector<1x64x256xbf16>
    %82 = vector.shape_cast %81 : vector<1x64x256xbf16> to vector<64x256xbf16>
    %c8 = arith.constant 8 : index
    %c0_52 = arith.constant 0 : index
    %c0_53 = arith.constant 0 : index
    %83 = vector.load %arg2[%c8, %c0_52, %c0_53] : memref<9x16x64xbf16, #tpu.memory_space<vmem>>, vector<1x16x64xbf16>
    %84 = vector.shape_cast %83 : vector<1x16x64xbf16> to vector<16x64xbf16>
    %cst_54 = arith.constant dense<0.000000e+00> : vector<16x256xf32>
    %85 = tpu.matmul %84, %82, %cst_54 {dimension_numbers = #tpu.dot_dimension_numbers<[1], [0], [0], [1], [0, 0, 1, 1], [], []>} : vector<16x64xbf16>, vector<64x256xbf16>, vector<16x256xf32> -> vector<16x256xf32>
    %86 = arith.addf %80, %85 : vector<16x256xf32>
    %87 = vector.broadcast %24 : vector<1x256xf32> to vector<16x256xf32>
    %88 = arith.mulf %86, %87 : vector<16x256xf32>
    %89 = arith.addf %67, %88 : vector<16x256xf32>
    %c0_55 = arith.constant 0 : index
    %c0_56 = arith.constant 0 : index
    %90 = vector.load %arg3[%c0_55, %c0_56] : memref<16x1xf32, #tpu.memory_space<vmem>>, vector<16x1xf32>
    %91 = vector.broadcast %90 : vector<16x1xf32> to vector<16x256xf32>
    %92 = arith.mulf %89, %91 : vector<16x256xf32>
    %c0_57 = arith.constant 0 : index
    %c0_58 = arith.constant 0 : index
    %93 = vector.load %arg4[%c0_57, %c0_58] : memref<16x1xf32, #tpu.memory_space<vmem>>, vector<16x1xf32>
    %94 = vector.broadcast %93 : vector<16x1xf32> to vector<16x256xf32>
    %95 = arith.addf %92, %94 : vector<16x256xf32>
    %cst_59 = arith.constant 0.000000e+00 : f32
    %96 = vector.broadcast %cst_59 : f32 to vector<16x256xf32>
    %97 = arith.maximumf %95, %96 : vector<16x256xf32>
    %98 = arith.truncf %97 : vector<16x256xf32> to vector<16x256xbf16>
    %c0_60 = arith.constant 0 : index
    %c0_61 = arith.constant 0 : index
    %c0_62 = arith.constant 0 : index
    %99 = vector.load %arg5[%c0_60, %c0_61, %c0_62] : memref<1x16x256xbf16, #tpu.memory_space<vmem>>, vector<1x16x256xbf16>
    %100 = vector.shape_cast %99 : vector<1x16x256xbf16> to vector<16x256xbf16>
    %101 = vector.shape_cast %98 : vector<16x256xbf16> to vector<1x16x256xbf16>
    tpu.vector_store %arg5[%c0_60, %c0_61, %c0_62], %101 {strides = array<i32>} : memref<1x16x256xbf16, #tpu.memory_space<vmem>>, vector<1x16x256xbf16>,
    return
  }
  func.func @transform_0(%arg0: i32) -> (i32, i32, i32) {
    %c0_i32 = arith.constant 0 : i32
    %c0_i32_0 = arith.constant 0 : i32
    %c0_i32_1 = arith.constant 0 : i32
    return %arg0, %c0_i32, %c0_i32_0 : i32, i32, i32
  }
  func.func @transform_1(%arg0: i32) -> (i32, i32, i32) {
    %c0_i32 = arith.constant 0 : i32
    %c0_i32_0 = arith.constant 0 : i32
    %c0_i32_1 = arith.constant 0 : i32
    %c0_i32_2 = arith.constant 0 : i32
    return %c0_i32, %c0_i32_0, %c0_i32_1 : i32, i32, i32
  }
  func.func @transform_2(%arg0: i32) -> (i32, i32) {
    %c0_i32 = arith.constant 0 : i32
    %c0_i32_0 = arith.constant 0 : i32
    %c0_i32_1 = arith.constant 0 : i32
    return %c0_i32, %c0_i32_0 : i32, i32
  }
  func.func @transform_3(%arg0: i32) -> (i32, i32) {
    %c0_i32 = arith.constant 0 : i32
    %c0_i32_0 = arith.constant 0 : i32
    %c0_i32_1 = arith.constant 0 : i32
    return %c0_i32, %c0_i32_0 : i32, i32
  }
  func.func @transform_4(%arg0: i32) -> (i32, i32, i32) {
    %c0_i32 = arith.constant 0 : i32
    %c0_i32_0 = arith.constant 0 : i32
    %c0_i32_1 = arith.constant 0 : i32
    return %arg0, %c0_i32, %c0_i32_0 : i32, i32, i32
  }
}

module attributes {stable_mosaic.version = 11 : i64} {
  func.func @_pam_flash_kernel(%arg0: i32, %arg1: i32, %arg2: i32, %arg3: memref<1x16x256xbf16, #tpu.memory_space<vmem>>, %arg4: memref<1x16x256xbf16, #tpu.memory_space<vmem>>, %arg5: memref<2x16xbf16, #tpu.memory_space<vmem>>, %arg6: memref<2x1xf32, #tpu.memory_space<vmem>>, %arg7: memref<18x16xbf16, #tpu.memory_space<vmem>>, %arg8: memref<18x1xf32, #tpu.memory_space<vmem>>, %arg9: memref<1x1xf32, #tpu.memory_space<vmem>>, %arg10: memref<1x16x256xbf16, #tpu.memory_space<vmem>>, %arg11: memref<2x256xf32, #tpu.memory_space<vmem>>, %arg12: memref<1x256xf32, #tpu.memory_space<vmem>>, %arg13: memref<1x256xf32, #tpu.memory_space<vmem>>, %arg14: memref<16x256xf32, #tpu.memory_space<vmem>>) attributes {dimension_semantics = [#tpu.dimension_semantics<parallel>, #tpu.dimension_semantics<parallel>, #tpu.dimension_semantics<arbitrary>], iteration_bounds = array<i64: 2, 1, 1>, scalar_prefetch = 0 : i64, scratch_operands = 4 : i64, tpu.core_type = #tpu.core_type<tc>, window_params = [{transform_indices = @transform_0, window_bounds = array<i64: 1, 16, 256>}, {transform_indices = @transform_1, window_bounds = array<i64: 1, 16, 256>}, {pipeline_mode = #tpu.pipeline_mode<synchronous>, transform_indices = @transform_2, window_bounds = array<i64: 2, 16>}, {pipeline_mode = #tpu.pipeline_mode<synchronous>, transform_indices = @transform_3, window_bounds = array<i64: 2, 1>}, {pipeline_mode = #tpu.pipeline_mode<synchronous>, transform_indices = @transform_4, window_bounds = array<i64: 18, 16>}, {pipeline_mode = #tpu.pipeline_mode<synchronous>, transform_indices = @transform_5, window_bounds = array<i64: 18, 1>}, {pipeline_mode = #tpu.pipeline_mode<synchronous>, transform_indices = @transform_6, window_bounds = array<i64: 1, 1>}, {transform_indices = @transform_7, window_bounds = array<i64: 1, 16, 256>}]} {
    %c0_i32 = arith.constant 0 : i32
    %0 = arith.cmpi eq, %arg2, %c0_i32 : i32
    %1 = arith.extui %0 : i1 to i32
    %c0_i32_0 = arith.constant 0 : i32
    %2 = arith.cmpi ne, %1, %c0_i32_0 : i32
    scf.if %2 {
      %c0_27 = arith.constant 0 : index
      %c0_28 = arith.constant 0 : index
      %39 = vector.load %arg5[%c0_27, %c0_28] : memref<2x16xbf16, #tpu.memory_space<vmem>>, vector<2x16xbf16>
      %c0_29 = arith.constant 0 : index
      %c0_30 = arith.constant 0 : index
      %c0_31 = arith.constant 0 : index
      %40 = vector.load %arg3[%c0_29, %c0_30, %c0_31] : memref<1x16x256xbf16, #tpu.memory_space<vmem>>, vector<1x16x256xbf16>
      %41 = vector.shape_cast %40 : vector<1x16x256xbf16> to vector<16x256xbf16>
      %cst_32 = arith.constant dense<0.000000e+00> : vector<2x256xf32>
      %42 = tpu.matmul %39, %41, %cst_32 {dimension_numbers = #tpu.dot_dimension_numbers<[1], [0], [0], [1], [0, 0, 1, 1], [], []>} : vector<2x16xbf16>, vector<16x256xbf16>, vector<2x256xf32> -> vector<2x256xf32>
      %c0_33 = arith.constant 0 : index
      %c0_34 = arith.constant 0 : index
      %43 = vector.load %arg6[%c0_33, %c0_34] : memref<2x1xf32, #tpu.memory_space<vmem>>, vector<2x1xf32>
      %44 = vector.broadcast %43 : vector<2x1xf32> to vector<2x256xf32>
      %45 = arith.addf %42, %44 : vector<2x256xf32>
      %c0_35 = arith.constant 0 : index
      %c0_36 = arith.constant 0 : index
      %46 = vector.load %arg11[%c0_35, %c0_36] : memref<2x256xf32, #tpu.memory_space<vmem>>, vector<2x256xf32>
      tpu.vector_store %arg11[%c0_35, %c0_36], %45 {strides = array<i32>} : memref<2x256xf32, #tpu.memory_space<vmem>>, vector<2x256xf32>,
      %cst_37 = arith.constant 0xFF800000 : f32
      %47 = vector.broadcast %cst_37 : f32 to vector<1x256xf32>
      %c0_38 = arith.constant 0 : index
      %c0_39 = arith.constant 0 : index
      %48 = vector.load %arg12[%c0_38, %c0_39] : memref<1x256xf32, #tpu.memory_space<vmem>>, vector<1x256xf32>
      tpu.vector_store %arg12[%c0_38, %c0_39], %47 {strides = array<i32>} : memref<1x256xf32, #tpu.memory_space<vmem>>, vector<1x256xf32>,
      %cst_40 = arith.constant 0.000000e+00 : f32
      %49 = vector.broadcast %cst_40 : f32 to vector<1x256xf32>
      %c0_41 = arith.constant 0 : index
      %c0_42 = arith.constant 0 : index
      %50 = vector.load %arg13[%c0_41, %c0_42] : memref<1x256xf32, #tpu.memory_space<vmem>>, vector<1x256xf32>
      tpu.vector_store %arg13[%c0_41, %c0_42], %49 {strides = array<i32>} : memref<1x256xf32, #tpu.memory_space<vmem>>, vector<1x256xf32>,
      %cst_43 = arith.constant 0.000000e+00 : f32
      %51 = vector.broadcast %cst_43 : f32 to vector<16x256xf32>
      %c0_44 = arith.constant 0 : index
      %c0_45 = arith.constant 0 : index
      %52 = vector.load %arg14[%c0_44, %c0_45] : memref<16x256xf32, #tpu.memory_space<vmem>>, vector<16x256xf32>
      tpu.vector_store %arg14[%c0_44, %c0_45], %51 {strides = array<i32>} : memref<16x256xf32, #tpu.memory_space<vmem>>, vector<16x256xf32>,
    } else {
    }
    %c0 = arith.constant 0 : index
    %c0_1 = arith.constant 0 : index
    %c0_2 = arith.constant 0 : index
    %3 = vector.load %arg4[%c0, %c0_1, %c0_2] : memref<1x16x256xbf16, #tpu.memory_space<vmem>>, vector<1x16x256xbf16>
    %4 = vector.shape_cast %3 : vector<1x16x256xbf16> to vector<16x256xbf16>
    %c0_3 = arith.constant 0 : index
    %c0_4 = arith.constant 0 : index
    %5 = vector.load %arg7[%c0_3, %c0_4] : memref<18x16xbf16, #tpu.memory_space<vmem>>, vector<18x16xbf16>
    %cst = arith.constant dense<0.000000e+00> : vector<18x256xf32>
    %6 = tpu.matmul %5, %4, %cst {dimension_numbers = #tpu.dot_dimension_numbers<[1], [0], [0], [1], [0, 0, 1, 1], [], []>} : vector<18x16xbf16>, vector<16x256xbf16>, vector<18x256xf32> -> vector<18x256xf32>
    %c0_5 = arith.constant 0 : index
    %c0_6 = arith.constant 0 : index
    %7 = vector.load %arg8[%c0_5, %c0_6] : memref<18x1xf32, #tpu.memory_space<vmem>>, vector<18x1xf32>
    %8 = vector.broadcast %7 : vector<18x1xf32> to vector<18x256xf32>
    %9 = arith.addf %6, %8 : vector<18x256xf32>
    %10 = vector.extract_strided_slice %9 {offsets = [0, 0], sizes = [16, 256], strides = [1, 1]} : vector<18x256xf32> to vector<16x256xf32>
    %11 = vector.extract_strided_slice %9 {offsets = [16, 0], sizes = [2, 256], strides = [1, 1]} : vector<18x256xf32> to vector<2x256xf32>
    %c0_7 = arith.constant 0 : index
    %c0_8 = arith.constant 0 : index
    %12 = vector.load %arg11[%c0_7, %c0_8] : memref<2x256xf32, #tpu.memory_space<vmem>>, vector<2x256xf32>
    %cst_9 = arith.constant dense<0.000000e+00> : vector<256x256xf32>
    %13 = tpu.matmul %11, %12, %cst_9 {dimension_numbers = #tpu.dot_dimension_numbers<[0], [0], [1], [1], [0, 1, 1, 1], [], []>} : vector<2x256xf32>, vector<2x256xf32>, vector<256x256xf32> -> vector<256x256xf32>
    %c0_10 = arith.constant 0 : index
    %c0_11 = arith.constant 0 : index
    %14 = vector.load %arg12[%c0_10, %c0_11] : memref<1x256xf32, #tpu.memory_space<vmem>>, vector<1x256xf32>
    %cst_12 = arith.constant dense<0xFF800000> : vector<256xf32>
    %15 = vector.multi_reduction <maximumf>, %13, %cst_12 [0] : vector<256x256xf32> to vector<256xf32>
    %16 = vector.shape_cast %15 : vector<256xf32> to vector<1x256xf32>
    %17 = arith.maximumf %14, %16 : vector<1x256xf32>
    %18 = arith.subf %14, %17 : vector<1x256xf32>
    %19 = math.exp %18 : vector<1x256xf32>
    %20 = vector.broadcast %17 : vector<1x256xf32> to vector<256x256xf32>
    %21 = arith.subf %13, %20 : vector<256x256xf32>
    %22 = math.exp %21 : vector<256x256xf32>
    %c0_13 = arith.constant 0 : index
    %c0_14 = arith.constant 0 : index
    %23 = vector.load %arg13[%c0_13, %c0_14] : memref<1x256xf32, #tpu.memory_space<vmem>>, vector<1x256xf32>
    %24 = arith.mulf %19, %23 : vector<1x256xf32>
    %cst_15 = arith.constant dense<0.000000e+00> : vector<256xf32>
    %25 = vector.multi_reduction <add>, %22, %cst_15 [0] : vector<256x256xf32> to vector<256xf32>
    %26 = vector.shape_cast %25 : vector<256xf32> to vector<1x256xf32>
    %27 = arith.addf %24, %26 : vector<1x256xf32>
    %c0_16 = arith.constant 0 : index
    %c0_17 = arith.constant 0 : index
    %28 = vector.load %arg13[%c0_16, %c0_17] : memref<1x256xf32, #tpu.memory_space<vmem>>, vector<1x256xf32>
    tpu.vector_store %arg13[%c0_16, %c0_17], %27 {strides = array<i32>} : memref<1x256xf32, #tpu.memory_space<vmem>>, vector<1x256xf32>,
    %c0_18 = arith.constant 0 : index
    %c0_19 = arith.constant 0 : index
    %29 = vector.load %arg14[%c0_18, %c0_19] : memref<16x256xf32, #tpu.memory_space<vmem>>, vector<16x256xf32>
    %30 = vector.broadcast %19 : vector<1x256xf32> to vector<16x256xf32>
    %31 = arith.mulf %30, %29 : vector<16x256xf32>
    %cst_20 = arith.constant dense<0.000000e+00> : vector<16x256xf32>
    %32 = tpu.matmul %10, %22, %cst_20 {dimension_numbers = #tpu.dot_dimension_numbers<[1], [0], [0], [1], [0, 0, 1, 1], [], []>} : vector<16x256xf32>, vector<256x256xf32>, vector<16x256xf32> -> vector<16x256xf32>
    %33 = arith.addf %31, %32 : vector<16x256xf32>
    %c0_21 = arith.constant 0 : index
    %c0_22 = arith.constant 0 : index
    %34 = vector.load %arg14[%c0_21, %c0_22] : memref<16x256xf32, #tpu.memory_space<vmem>>, vector<16x256xf32>
    tpu.vector_store %arg14[%c0_21, %c0_22], %33 {strides = array<i32>} : memref<16x256xf32, #tpu.memory_space<vmem>>, vector<16x256xf32>,
    %c0_23 = arith.constant 0 : index
    %c0_24 = arith.constant 0 : index
    %35 = vector.load %arg12[%c0_23, %c0_24] : memref<1x256xf32, #tpu.memory_space<vmem>>, vector<1x256xf32>
    tpu.vector_store %arg12[%c0_23, %c0_24], %17 {strides = array<i32>} : memref<1x256xf32, #tpu.memory_space<vmem>>, vector<1x256xf32>,
    %c0_i32_25 = arith.constant 0 : i32
    %36 = arith.cmpi eq, %arg2, %c0_i32_25 : i32
    %37 = arith.extui %36 : i1 to i32
    %c0_i32_26 = arith.constant 0 : i32
    %38 = arith.cmpi ne, %37, %c0_i32_26 : i32
    scf.if %38 {
      %c0_27 = arith.constant 0 : index
      %c0_28 = arith.constant 0 : index
      %39 = vector.load %arg13[%c0_27, %c0_28] : memref<1x256xf32, #tpu.memory_space<vmem>>, vector<1x256xf32>
      %40 = tpu.reciprocal %39 {approx = true} : vector<1x256xf32> -> vector<1x256xf32>
      %c0_29 = arith.constant 0 : index
      %c0_30 = arith.constant 0 : index
      %41 = vector.load %arg14[%c0_29, %c0_30] : memref<16x256xf32, #tpu.memory_space<vmem>>, vector<16x256xf32>
      %42 = vector.broadcast %40 : vector<1x256xf32> to vector<16x256xf32>
      %43 = arith.mulf %41, %42 : vector<16x256xf32>
      %c0_31 = arith.constant 0 : index
      %c0_32 = arith.constant 0 : index
      %44 = vector.load %arg9[%c0_31, %c0_32] : memref<1x1xf32, #tpu.memory_space<vmem>>, vector<1x1xf32>
      %45 = vector.broadcast %44 : vector<1x1xf32> to vector<16x256xf32>
      %46 = arith.mulf %45, %43 : vector<16x256xf32>
      %c0_33 = arith.constant 0 : index
      %c0_34 = arith.constant 0 : index
      %c0_35 = arith.constant 0 : index
      %47 = vector.load %arg3[%c0_33, %c0_34, %c0_35] : memref<1x16x256xbf16, #tpu.memory_space<vmem>>, vector<1x16x256xbf16>
      %48 = vector.shape_cast %47 : vector<1x16x256xbf16> to vector<16x256xbf16>
      %49 = arith.extf %48 : vector<16x256xbf16> to vector<16x256xf32>
      %50 = arith.addf %46, %49 : vector<16x256xf32>
      %51 = arith.truncf %50 : vector<16x256xf32> to vector<16x256xbf16>
      %c0_36 = arith.constant 0 : index
      %c0_37 = arith.constant 0 : index
      %c0_38 = arith.constant 0 : index
      %52 = vector.load %arg10[%c0_36, %c0_37, %c0_38] : memref<1x16x256xbf16, #tpu.memory_space<vmem>>, vector<1x16x256xbf16>
      %53 = vector.shape_cast %52 : vector<1x16x256xbf16> to vector<16x256xbf16>
      %54 = vector.shape_cast %51 : vector<16x256xbf16> to vector<1x16x256xbf16>
      tpu.vector_store %arg10[%c0_36, %c0_37, %c0_38], %54 {strides = array<i32>} : memref<1x16x256xbf16, #tpu.memory_space<vmem>>, vector<1x16x256xbf16>,
    } else {
    }
    return
  }
  func.func @transform_0(%arg0: i32, %arg1: i32, %arg2: i32) -> (i32, i32, i32) {
    %c0_i32 = arith.constant 0 : i32
    %c0_i32_0 = arith.constant 0 : i32
    return %arg0, %c0_i32, %arg1 : i32, i32, i32
  }
  func.func @transform_1(%arg0: i32, %arg1: i32, %arg2: i32) -> (i32, i32, i32) {
    %c0_i32 = arith.constant 0 : i32
    %c0_i32_0 = arith.constant 0 : i32
    return %arg0, %c0_i32, %arg2 : i32, i32, i32
  }
  func.func @transform_2(%arg0: i32, %arg1: i32, %arg2: i32) -> (i32, i32) {
    %c0_i32 = arith.constant 0 : i32
    %c0_i32_0 = arith.constant 0 : i32
    %c0_i32_1 = arith.constant 0 : i32
    return %c0_i32, %c0_i32_0 : i32, i32
  }
  func.func @transform_3(%arg0: i32, %arg1: i32, %arg2: i32) -> (i32, i32) {
    %c0_i32 = arith.constant 0 : i32
    %c0_i32_0 = arith.constant 0 : i32
    %c0_i32_1 = arith.constant 0 : i32
    return %c0_i32, %c0_i32_0 : i32, i32
  }
  func.func @transform_4(%arg0: i32, %arg1: i32, %arg2: i32) -> (i32, i32) {
    %c0_i32 = arith.constant 0 : i32
    %c0_i32_0 = arith.constant 0 : i32
    %c0_i32_1 = arith.constant 0 : i32
    return %c0_i32, %c0_i32_0 : i32, i32
  }
  func.func @transform_5(%arg0: i32, %arg1: i32, %arg2: i32) -> (i32, i32) {
    %c0_i32 = arith.constant 0 : i32
    %c0_i32_0 = arith.constant 0 : i32
    %c0_i32_1 = arith.constant 0 : i32
    return %c0_i32, %c0_i32_0 : i32, i32
  }
  func.func @transform_6(%arg0: i32, %arg1: i32, %arg2: i32) -> (i32, i32) {
    %c0_i32 = arith.constant 0 : i32
    %c0_i32_0 = arith.constant 0 : i32
    %c0_i32_1 = arith.constant 0 : i32
    return %c0_i32, %c0_i32_0 : i32, i32
  }
  func.func @transform_7(%arg0: i32, %arg1: i32, %arg2: i32) -> (i32, i32, i32) {
    %c0_i32 = arith.constant 0 : i32
    %c0_i32_0 = arith.constant 0 : i32
    return %arg0, %c0_i32, %arg1 : i32, i32, i32
  }
}

module attributes {stable_mosaic.version = 11 : i64} {
  func.func @_conv3x3_bn_relu_conv1x1_kernel(%arg0: i32, %arg1: memref<1x16x384xbf16, #tpu.memory_space<vmem>>, %arg2: memref<9x16x16xbf16, #tpu.memory_space<vmem>>, %arg3: memref<16x1xf32, #tpu.memory_space<vmem>>, %arg4: memref<16x1xf32, #tpu.memory_space<vmem>>, %arg5: memref<8x16xf32, #tpu.memory_space<vmem>>, %arg6: memref<8x1xf32, #tpu.memory_space<vmem>>, %arg7: memref<1x8x256xf32, #tpu.memory_space<vmem>>) attributes {dimension_semantics = [#tpu.dimension_semantics<parallel>], iteration_bounds = array<i64: 2>, scalar_prefetch = 0 : i64, scratch_operands = 0 : i64, tpu.core_type = #tpu.core_type<tc>, window_params = [{transform_indices = @transform_0, window_bounds = array<i64: 1, 16, 384>}, {pipeline_mode = #tpu.pipeline_mode<synchronous>, transform_indices = @transform_1, window_bounds = array<i64: 9, 16, 16>}, {pipeline_mode = #tpu.pipeline_mode<synchronous>, transform_indices = @transform_2, window_bounds = array<i64: 16, 1>}, {pipeline_mode = #tpu.pipeline_mode<synchronous>, transform_indices = @transform_3, window_bounds = array<i64: 16, 1>}, {pipeline_mode = #tpu.pipeline_mode<synchronous>, transform_indices = @transform_4, window_bounds = array<i64: 8, 16>}, {pipeline_mode = #tpu.pipeline_mode<synchronous>, transform_indices = @transform_5, window_bounds = array<i64: 8, 1>}, {transform_indices = @transform_6, window_bounds = array<i64: 1, 8, 256>}]} {
    %0 = tpu.iota {dimensions = array<i32: 1>} : vector<1x256xi32>
    %c16_i32 = arith.constant 16 : i32
    %c0_i32 = arith.constant 0 : i32
    %1 = arith.cmpi eq, %c16_i32, %c0_i32 : i32
    %c1_i32 = arith.constant 1 : i32
    %2 = arith.select %1, %c1_i32, %c16_i32 : i32
    %3 = vector.broadcast %2 : i32 to vector<1x256xi32>
    %4 = arith.remsi %0, %3 : vector<1x256xi32>
    %c0_i32_0 = arith.constant 0 : i32
    %5 = vector.broadcast %c0_i32_0 : i32 to vector<1x256xi32>
    %6 = arith.cmpi ne, %4, %5 : vector<1x256xi32>
    %c0_i32_1 = arith.constant 0 : i32
    %7 = vector.broadcast %c0_i32_1 : i32 to vector<1x256xi32>
    %8 = arith.cmpi slt, %4, %7 : vector<1x256xi32>
    %c0_i32_2 = arith.constant 0 : i32
    %9 = arith.cmpi slt, %2, %c0_i32_2 : i32
    %10 = vector.broadcast %9 : i1 to vector<1x256xi1>
    %11 = vector.broadcast %10 : vector<1x256xi1> to vector<1x256xi1>
    %12 = arith.xori %8, %11 : vector<1x256xi1>
    %13 = arith.andi %12, %6 : vector<1x256xi1>
    %14 = vector.broadcast %2 : i32 to vector<1x256xi32>
    %15 = arith.addi %4, %14 : vector<1x256xi32>
    %16 = arith.select %13, %15, %4 : vector<1x256xi1>, vector<1x256xi32>
    %c0_i32_3 = arith.constant 0 : i32
    %17 = vector.broadcast %c0_i32_3 : i32 to vector<1x256xi32>
    %18 = arith.cmpi ne, %16, %17 : vector<1x256xi32>
    %19 = arith.extui %18 : vector<1x256xi1> to vector<1x256xi32>
    %20 = arith.sitofp %19 : vector<1x256xi32> to vector<1x256xf32>
    %c15_i32 = arith.constant 15 : i32
    %21 = vector.broadcast %c15_i32 : i32 to vector<1x256xi32>
    %22 = arith.cmpi ne, %16, %21 : vector<1x256xi32>
    %23 = arith.extui %22 : vector<1x256xi1> to vector<1x256xi32>
    %24 = arith.sitofp %23 : vector<1x256xi32> to vector<1x256xf32>
    %cst = arith.constant 0.000000e+00 : f32
    %25 = vector.broadcast %cst : f32 to vector<16x256xf32>
    %cst_4 = arith.constant 0.000000e+00 : f32
    %26 = vector.broadcast %cst_4 : f32 to vector<16x256xf32>
    %c0 = arith.constant 0 : index
    %c0_5 = arith.constant 0 : index
    %c0_6 = arith.constant 0 : index
    %27 = vector.load %arg1[%c0, %c0_5, %c0_6] : memref<1x16x384xbf16, #tpu.memory_space<vmem>>, vector<1x16x256xbf16>
    %28 = vector.shape_cast %27 : vector<1x16x256xbf16> to vector<16x256xbf16>
    %c0_7 = arith.constant 0 : index
    %c0_8 = arith.constant 0 : index
    %c0_9 = arith.constant 0 : index
    %29 = vector.load %arg2[%c0_7, %c0_8, %c0_9] : memref<9x16x16xbf16, #tpu.memory_space<vmem>>, vector<1x16x16xbf16>
    %30 = vector.shape_cast %29 : vector<1x16x16xbf16> to vector<16x16xbf16>
    %cst_10 = arith.constant dense<0.000000e+00> : vector<16x256xf32>
    %31 = tpu.matmul %30, %28, %cst_10 {dimension_numbers = #tpu.dot_dimension_numbers<[1], [0], [0], [1], [0, 0, 1, 1], [], []>} : vector<16x16xbf16>, vector<16x256xbf16>, vector<16x256xf32> -> vector<16x256xf32>
    %32 = arith.addf %26, %31 : vector<16x256xf32>
    %c0_11 = arith.constant 0 : index
    %c0_12 = arith.constant 0 : index
    %c16 = arith.constant 16 : index
    %33 = vector.load %arg1[%c0_11, %c0_12, %c16] : memref<1x16x384xbf16, #tpu.memory_space<vmem>>, vector<1x16x256xbf16>
    %34 = vector.shape_cast %33 : vector<1x16x256xbf16> to vector<16x256xbf16>
    %c3 = arith.constant 3 : index
    %c0_13 = arith.constant 0 : index
    %c0_14 = arith.constant 0 : index
    %35 = vector.load %arg2[%c3, %c0_13, %c0_14] : memref<9x16x16xbf16, #tpu.memory_space<vmem>>, vector<1x16x16xbf16>
    %36 = vector.shape_cast %35 : vector<1x16x16xbf16> to vector<16x16xbf16>
    %cst_15 = arith.constant dense<0.000000e+00> : vector<16x256xf32>
    %37 = tpu.matmul %36, %34, %cst_15 {dimension_numbers = #tpu.dot_dimension_numbers<[1], [0], [0], [1], [0, 0, 1, 1], [], []>} : vector<16x16xbf16>, vector<16x256xbf16>, vector<16x256xf32> -> vector<16x256xf32>
    %38 = arith.addf %32, %37 : vector<16x256xf32>
    %c0_16 = arith.constant 0 : index
    %c0_17 = arith.constant 0 : index
    %c32 = arith.constant 32 : index
    %39 = vector.load %arg1[%c0_16, %c0_17, %c32] : memref<1x16x384xbf16, #tpu.memory_space<vmem>>, vector<1x16x256xbf16>
    %40 = vector.shape_cast %39 : vector<1x16x256xbf16> to vector<16x256xbf16>
    %c6 = arith.constant 6 : index
    %c0_18 = arith.constant 0 : index
    %c0_19 = arith.constant 0 : index
    %41 = vector.load %arg2[%c6, %c0_18, %c0_19] : memref<9x16x16xbf16, #tpu.memory_space<vmem>>, vector<1x16x16xbf16>
    %42 = vector.shape_cast %41 : vector<1x16x16xbf16> to vector<16x16xbf16>
    %cst_20 = arith.constant dense<0.000000e+00> : vector<16x256xf32>
    %43 = tpu.matmul %42, %40, %cst_20 {dimension_numbers = #tpu.dot_dimension_numbers<[1], [0], [0], [1], [0, 0, 1, 1], [], []>} : vector<16x16xbf16>, vector<16x256xbf16>, vector<16x256xf32> -> vector<16x256xf32>
    %44 = arith.addf %38, %43 : vector<16x256xf32>
    %45 = vector.broadcast %20 : vector<1x256xf32> to vector<16x256xf32>
    %46 = arith.mulf %44, %45 : vector<16x256xf32>
    %47 = arith.addf %25, %46 : vector<16x256xf32>
    %cst_21 = arith.constant 0.000000e+00 : f32
    %48 = vector.broadcast %cst_21 : f32 to vector<16x256xf32>
    %c0_22 = arith.constant 0 : index
    %c0_23 = arith.constant 0 : index
    %c1 = arith.constant 1 : index
    %49 = vector.load %arg1[%c0_22, %c0_23, %c1] : memref<1x16x384xbf16, #tpu.memory_space<vmem>>, vector<1x16x256xbf16>
    %50 = vector.shape_cast %49 : vector<1x16x256xbf16> to vector<16x256xbf16>
    %c1_24 = arith.constant 1 : index
    %c0_25 = arith.constant 0 : index
    %c0_26 = arith.constant 0 : index
    %51 = vector.load %arg2[%c1_24, %c0_25, %c0_26] : memref<9x16x16xbf16, #tpu.memory_space<vmem>>, vector<1x16x16xbf16>
    %52 = vector.shape_cast %51 : vector<1x16x16xbf16> to vector<16x16xbf16>
    %cst_27 = arith.constant dense<0.000000e+00> : vector<16x256xf32>
    %53 = tpu.matmul %52, %50, %cst_27 {dimension_numbers = #tpu.dot_dimension_numbers<[1], [0], [0], [1], [0, 0, 1, 1], [], []>} : vector<16x16xbf16>, vector<16x256xbf16>, vector<16x256xf32> -> vector<16x256xf32>
    %54 = arith.addf %48, %53 : vector<16x256xf32>
    %c0_28 = arith.constant 0 : index
    %c0_29 = arith.constant 0 : index
    %c17 = arith.constant 17 : index
    %55 = vector.load %arg1[%c0_28, %c0_29, %c17] : memref<1x16x384xbf16, #tpu.memory_space<vmem>>, vector<1x16x256xbf16>
    %56 = vector.shape_cast %55 : vector<1x16x256xbf16> to vector<16x256xbf16>
    %c4 = arith.constant 4 : index
    %c0_30 = arith.constant 0 : index
    %c0_31 = arith.constant 0 : index
    %57 = vector.load %arg2[%c4, %c0_30, %c0_31] : memref<9x16x16xbf16, #tpu.memory_space<vmem>>, vector<1x16x16xbf16>
    %58 = vector.shape_cast %57 : vector<1x16x16xbf16> to vector<16x16xbf16>
    %cst_32 = arith.constant dense<0.000000e+00> : vector<16x256xf32>
    %59 = tpu.matmul %58, %56, %cst_32 {dimension_numbers = #tpu.dot_dimension_numbers<[1], [0], [0], [1], [0, 0, 1, 1], [], []>} : vector<16x16xbf16>, vector<16x256xbf16>, vector<16x256xf32> -> vector<16x256xf32>
    %60 = arith.addf %54, %59 : vector<16x256xf32>
    %c0_33 = arith.constant 0 : index
    %c0_34 = arith.constant 0 : index
    %c33 = arith.constant 33 : index
    %61 = vector.load %arg1[%c0_33, %c0_34, %c33] : memref<1x16x384xbf16, #tpu.memory_space<vmem>>, vector<1x16x256xbf16>
    %62 = vector.shape_cast %61 : vector<1x16x256xbf16> to vector<16x256xbf16>
    %c7 = arith.constant 7 : index
    %c0_35 = arith.constant 0 : index
    %c0_36 = arith.constant 0 : index
    %63 = vector.load %arg2[%c7, %c0_35, %c0_36] : memref<9x16x16xbf16, #tpu.memory_space<vmem>>, vector<1x16x16xbf16>
    %64 = vector.shape_cast %63 : vector<1x16x16xbf16> to vector<16x16xbf16>
    %cst_37 = arith.constant dense<0.000000e+00> : vector<16x256xf32>
    %65 = tpu.matmul %64, %62, %cst_37 {dimension_numbers = #tpu.dot_dimension_numbers<[1], [0], [0], [1], [0, 0, 1, 1], [], []>} : vector<16x16xbf16>, vector<16x256xbf16>, vector<16x256xf32> -> vector<16x256xf32>
    %66 = arith.addf %60, %65 : vector<16x256xf32>
    %67 = arith.addf %47, %66 : vector<16x256xf32>
    %cst_38 = arith.constant 0.000000e+00 : f32
    %68 = vector.broadcast %cst_38 : f32 to vector<16x256xf32>
    %c0_39 = arith.constant 0 : index
    %c0_40 = arith.constant 0 : index
    %c2 = arith.constant 2 : index
    %69 = vector.load %arg1[%c0_39, %c0_40, %c2] : memref<1x16x384xbf16, #tpu.memory_space<vmem>>, vector<1x16x256xbf16>
    %70 = vector.shape_cast %69 : vector<1x16x256xbf16> to vector<16x256xbf16>
    %c2_41 = arith.constant 2 : index
    %c0_42 = arith.constant 0 : index
    %c0_43 = arith.constant 0 : index
    %71 = vector.load %arg2[%c2_41, %c0_42, %c0_43] : memref<9x16x16xbf16, #tpu.memory_space<vmem>>, vector<1x16x16xbf16>
    %72 = vector.shape_cast %71 : vector<1x16x16xbf16> to vector<16x16xbf16>
    %cst_44 = arith.constant dense<0.000000e+00> : vector<16x256xf32>
    %73 = tpu.matmul %72, %70, %cst_44 {dimension_numbers = #tpu.dot_dimension_numbers<[1], [0], [0], [1], [0, 0, 1, 1], [], []>} : vector<16x16xbf16>, vector<16x256xbf16>, vector<16x256xf32> -> vector<16x256xf32>
    %74 = arith.addf %68, %73 : vector<16x256xf32>
    %c0_45 = arith.constant 0 : index
    %c0_46 = arith.constant 0 : index
    %c18 = arith.constant 18 : index
    %75 = vector.load %arg1[%c0_45, %c0_46, %c18] : memref<1x16x384xbf16, #tpu.memory_space<vmem>>, vector<1x16x256xbf16>
    %76 = vector.shape_cast %75 : vector<1x16x256xbf16> to vector<16x256xbf16>
    %c5 = arith.constant 5 : index
    %c0_47 = arith.constant 0 : index
    %c0_48 = arith.constant 0 : index
    %77 = vector.load %arg2[%c5, %c0_47, %c0_48] : memref<9x16x16xbf16, #tpu.memory_space<vmem>>, vector<1x16x16xbf16>
    %78 = vector.shape_cast %77 : vector<1x16x16xbf16> to vector<16x16xbf16>
    %cst_49 = arith.constant dense<0.000000e+00> : vector<16x256xf32>
    %79 = tpu.matmul %78, %76, %cst_49 {dimension_numbers = #tpu.dot_dimension_numbers<[1], [0], [0], [1], [0, 0, 1, 1], [], []>} : vector<16x16xbf16>, vector<16x256xbf16>, vector<16x256xf32> -> vector<16x256xf32>
    %80 = arith.addf %74, %79 : vector<16x256xf32>
    %c0_50 = arith.constant 0 : index
    %c0_51 = arith.constant 0 : index
    %c34 = arith.constant 34 : index
    %81 = vector.load %arg1[%c0_50, %c0_51, %c34] : memref<1x16x384xbf16, #tpu.memory_space<vmem>>, vector<1x16x256xbf16>
    %82 = vector.shape_cast %81 : vector<1x16x256xbf16> to vector<16x256xbf16>
    %c8 = arith.constant 8 : index
    %c0_52 = arith.constant 0 : index
    %c0_53 = arith.constant 0 : index
    %83 = vector.load %arg2[%c8, %c0_52, %c0_53] : memref<9x16x16xbf16, #tpu.memory_space<vmem>>, vector<1x16x16xbf16>
    %84 = vector.shape_cast %83 : vector<1x16x16xbf16> to vector<16x16xbf16>
    %cst_54 = arith.constant dense<0.000000e+00> : vector<16x256xf32>
    %85 = tpu.matmul %84, %82, %cst_54 {dimension_numbers = #tpu.dot_dimension_numbers<[1], [0], [0], [1], [0, 0, 1, 1], [], []>} : vector<16x16xbf16>, vector<16x256xbf16>, vector<16x256xf32> -> vector<16x256xf32>
    %86 = arith.addf %80, %85 : vector<16x256xf32>
    %87 = vector.broadcast %24 : vector<1x256xf32> to vector<16x256xf32>
    %88 = arith.mulf %86, %87 : vector<16x256xf32>
    %89 = arith.addf %67, %88 : vector<16x256xf32>
    %c0_55 = arith.constant 0 : index
    %c0_56 = arith.constant 0 : index
    %90 = vector.load %arg3[%c0_55, %c0_56] : memref<16x1xf32, #tpu.memory_space<vmem>>, vector<16x1xf32>
    %91 = vector.broadcast %90 : vector<16x1xf32> to vector<16x256xf32>
    %92 = arith.mulf %89, %91 : vector<16x256xf32>
    %c0_57 = arith.constant 0 : index
    %c0_58 = arith.constant 0 : index
    %93 = vector.load %arg4[%c0_57, %c0_58] : memref<16x1xf32, #tpu.memory_space<vmem>>, vector<16x1xf32>
    %94 = vector.broadcast %93 : vector<16x1xf32> to vector<16x256xf32>
    %95 = arith.addf %92, %94 : vector<16x256xf32>
    %cst_59 = arith.constant 0.000000e+00 : f32
    %96 = vector.broadcast %cst_59 : f32 to vector<16x256xf32>
    %97 = arith.maximumf %95, %96 : vector<16x256xf32>
    %c0_60 = arith.constant 0 : index
    %c0_61 = arith.constant 0 : index
    %98 = vector.load %arg5[%c0_60, %c0_61] : memref<8x16xf32, #tpu.memory_space<vmem>>, vector<8x16xf32>
    %cst_62 = arith.constant dense<0.000000e+00> : vector<8x256xf32>
    %99 = tpu.matmul %98, %97, %cst_62 {dimension_numbers = #tpu.dot_dimension_numbers<[1], [0], [0], [1], [0, 0, 1, 1], [], []>} : vector<8x16xf32>, vector<16x256xf32>, vector<8x256xf32> -> vector<8x256xf32>
    %c0_63 = arith.constant 0 : index
    %c0_64 = arith.constant 0 : index
    %100 = vector.load %arg6[%c0_63, %c0_64] : memref<8x1xf32, #tpu.memory_space<vmem>>, vector<8x1xf32>
    %101 = vector.broadcast %100 : vector<8x1xf32> to vector<8x256xf32>
    %102 = arith.addf %99, %101 : vector<8x256xf32>
    %c0_65 = arith.constant 0 : index
    %c0_66 = arith.constant 0 : index
    %c0_67 = arith.constant 0 : index
    %103 = vector.load %arg7[%c0_65, %c0_66, %c0_67] : memref<1x8x256xf32, #tpu.memory_space<vmem>>, vector<1x8x256xf32>
    %104 = vector.shape_cast %103 : vector<1x8x256xf32> to vector<8x256xf32>
    %105 = vector.shape_cast %102 : vector<8x256xf32> to vector<1x8x256xf32>
    tpu.vector_store %arg7[%c0_65, %c0_66, %c0_67], %105 {strides = array<i32>} : memref<1x8x256xf32, #tpu.memory_space<vmem>>, vector<1x8x256xf32>,
    return
  }
  func.func @transform_0(%arg0: i32) -> (i32, i32, i32) {
    %c0_i32 = arith.constant 0 : i32
    %c0_i32_0 = arith.constant 0 : i32
    %c0_i32_1 = arith.constant 0 : i32
    return %arg0, %c0_i32, %c0_i32_0 : i32, i32, i32
  }
  func.func @transform_1(%arg0: i32) -> (i32, i32, i32) {
    %c0_i32 = arith.constant 0 : i32
    %c0_i32_0 = arith.constant 0 : i32
    %c0_i32_1 = arith.constant 0 : i32
    %c0_i32_2 = arith.constant 0 : i32
    return %c0_i32, %c0_i32_0, %c0_i32_1 : i32, i32, i32
  }
  func.func @transform_2(%arg0: i32) -> (i32, i32) {
    %c0_i32 = arith.constant 0 : i32
    %c0_i32_0 = arith.constant 0 : i32
    %c0_i32_1 = arith.constant 0 : i32
    return %c0_i32, %c0_i32_0 : i32, i32
  }
  func.func @transform_3(%arg0: i32) -> (i32, i32) {
    %c0_i32 = arith.constant 0 : i32
    %c0_i32_0 = arith.constant 0 : i32
    %c0_i32_1 = arith.constant 0 : i32
    return %c0_i32, %c0_i32_0 : i32, i32
  }
  func.func @transform_4(%arg0: i32) -> (i32, i32) {
    %c0_i32 = arith.constant 0 : i32
    %c0_i32_0 = arith.constant 0 : i32
    %c0_i32_1 = arith.constant 0 : i32
    return %c0_i32, %c0_i32_0 : i32, i32
  }
  func.func @transform_5(%arg0: i32) -> (i32, i32) {
    %c0_i32 = arith.constant 0 : i32
    %c0_i32_0 = arith.constant 0 : i32
    %c0_i32_1 = arith.constant 0 : i32
    return %c0_i32, %c0_i32_0 : i32, i32
  }
  func.func @transform_6(%arg0: i32) -> (i32, i32, i32) {
    %c0_i32 = arith.constant 0 : i32
    %c0_i32_0 = arith.constant 0 : i32
    %c0_i32_1 = arith.constant 0 : i32
    return %arg0, %c0_i32, %c0_i32_0 : i32, i32, i32
  }
}

</mosaic_0001>

<bundles_post_ra>
// kernel: danet_head_forward.3
= control target key start
LH: loop header
LB: loop body
LE: loop exit
PB: predicated region body
PF: predicated region fallthrough
CT: control target
= control target key end

     0   :  { %s1467_s15 = smov 0   ;;  %s1813_s0 = inlined_call_operand.vmem [shape: bf16[2,64,384], index: 0, kind: input, shape index: {}]   ;;  %s1814_s1 = inlined_call_operand.vmem [shape: bf16[9,16,64], index: 1, kind: input, shape index: {}]   ;;  %s1815_s2 = inlined_call_operand.vmem [shape: f32[16,1], index: 2, kind: input, shape index: {}]   ;;  %s1816_s3 = inlined_call_operand.vmem [shape: f32[16,1], index: 3, kind: input, shape index: {}]   ;;  %s1817_s4 = inlined_call_operand.vmem [shape: bf16[2,16,256], index: 4, kind: output, shape index: {}]  }
   0x1 LB: > { %s1305_s16 = sadd.s32 4294967295, %s1430_s15   ;;  %p1309_p0 = scmp.ge.s32.totalorder %s1430_s15, 1  ;;  %s1430_s15 = sphi %s1467_s15, %s14_s15  }
   0x2   : > { %p162_p1 = scmp.lt.s32.totalorder %s1430_s15, 3 }
   0x4   : > { %p163_p2 = pnand %p1309_p0, %p162_p1 }
   0x5   : > { %p188_p3 = scmp.lt.s32.totalorder (!%p163_p2), %s1305_s16, 1  ;;  %s1432_s21 = smov (!%p163_p2), 112  }
   0x6   : > { %166 = sbr.rel (%p163_p2) target bundleno = 538 (0x21a), region = 36  ;;  %s1434_s22 = smov (!%p163_p2), 96  }
   0x7   : > { %s1435_s25 = smov (!%p163_p2), 111   ;;  %s1436_s26 = smov (!%p163_p2), 127  }
   0x8   : > { %s1437_s27 = smov (!%p163_p2), 95   ;;  %s1438_s28 = smov (!%p163_p2), 110  }
   0x9   : > { %s1439_s5 = smov (!%p163_p2), 126   ;;  %s1440_s6 = smov (!%p163_p2), 94  }
   0xb   : > { %s1819_s16 = smov (!%p188_p3, %s1305_s16), 1  ;;  %v1433_v12 = vmov 0   ;;  %v1416_v13 = vld [vmem:[%s1814_s1] sm:$0xff]   ;;  %vm365_vm0 = vcmask 523264   ;;  %vm348_vm1 = vcmask 916480   ;;  %v1415_v34 = vld [vmem:[%s1814_s1 + $0x18] sm:$0xff]  }
   0xc   : > { %s1378_s17 = smul.u32 96, %s1819_s16  ;;  %401 = vmatprep.mubr.bf16.mxu0 %v1433_v12  ;;  %492 = vmatprep.mubr.bf16.mxu1 %v1433_v12  ;;  %vm535_vm2 = vcmask 785408   ;;  %v1417_v55 = vld [vmem:[%s1814_s1 + $0x30] sm:$0xff]   ;;  %vm645_vm3 = vcmask 908288   ;;  %vm737_vm4 = vcmask 1039360   ;;  %vm832_vm5 = vcmask 777216  }
   0xd   : > { %1398 = vset.pattern.permute.xlu1 %v1433_v12  ;;  %1397 = vset.pattern.permute.xlu0 %v1433_v12  ;;  %vm938_vm6 = vcmask 900096   ;;  %vm1030_vm7 = vcmask 1031168   ;;  %vm1125_vm8 = vcmask 769024  }
   0xe   : > { %s1481_s20 = scalar_lea.vmem %s1813_s0, %s1378_s17 }
   0xf   : > { %v1484_v0 = vld [vmem:[%s1481_s20 + $0x4c] ss:$12 sps:$4 sm:$0xff]   ;;  %v1487_v1 = vld [vmem:[%s1481_s20 + $0x48] ss:$12 sps:$4 sm:$0xff]   ;;  %v1492_v2 = vld [vmem:[%s1481_s20 + $0x50] ss:$12 sps:$4 sm:$0xff]  }
  0x10   : > { %344 = vrot.lane.b32.xlu0 %v1484_v0, %s1432_s21  ;;  %468 = vmatprep.subr.bf16.mxu1 %v1484_v0  ;;  %v1498_v3 = vld [vmem:[%s1481_s20 + $0x34] ss:$12 sps:$4 sm:$0xff]   ;;  %v1502_v4 = vld [vmem:[%s1481_s20 + $0x30] ss:$12 sps:$4 sm:$0xff]   ;;  %v1508_v5 = vld [vmem:[%s1481_s20 + $0x38] ss:$12 sps:$4 sm:$0xff]  }
  0x11   : > { %342 = vrot.lane.b32.xlu1 %v1487_v1, %s1432_s21  ;;  %469 = vmatpush1.bf16.msra.mxu1 %v1487_v1  ;;  %v1511_v6 = vld [vmem:[%s1481_s20 + $0x1c] ss:$12 sps:$4 sm:$0xff]   ;;  %v1518_v7 = vld [vmem:[%s1481_s20 + $0x18] ss:$12 sps:$4 sm:$0xff]   ;;  %v1528_v9 = vld [vmem:[%s1481_s20 + $0x20] ss:$12 sps:$4 sm:$0xff]  }
  0x12   : > { %470 = vmatprep.subr.bf16.mxu1 %v1498_v3  ;;  %v1523_v8 = vld [vmem:[%s1481_s20 + $0x4] ss:$12 sps:$4 sm:$0xff]   ;;  %v1533_v10 = vld [vmem:[%s1481_s20] ss:$12 sps:$4 sm:$0xff]   ;;  %v1543_v11 = vld [vmem:[%s1481_s20 + $0x8] ss:$12 sps:$4 sm:$0xff]  }
  0x14   : > { %346 = vrot.lane.b32.xlu0 %v1492_v2, %s1432_s21 }
  0x15   : > { %338 = vrot.lane.b32.xlu1 %v1498_v3, %s1432_s21  ;;  %471 = vmatpush1.bf16.msra.mxu1 %v1502_v4 }
  0x16   : > { %472 = vmatprep.subr.bf16.mxu1 %v1511_v6 }
  0x18   : > { %340 = vrot.lane.b32.xlu0 %v1508_v5, %s1432_s21 }
  0x19   : > { %336 = vrot.lane.b32.xlu1 %v1502_v4, %s1432_s21  ;;  %473 = vmatpush1.bf16.msra.mxu1 %v1518_v7 }
  0x1a   : > { %474 = vmatprep.subr.bf16.mxu1 %v1523_v8 }
  0x1c   : > { %332 = vrot.lane.b32.xlu0 %v1511_v6, %s1432_s21 }
  0x1d   : > { %334 = vrot.lane.b32.xlu1 %v1528_v9, %s1432_s21  ;;  %475 = vmatpush1.bf16.msra.mxu1 %v1533_v10 }
  0x20   : > { %330 = vrot.lane.b32.xlu0 %v1518_v7, %s1432_s21  ;;  %1342 = vmatmul.mubr.msk.bf16.vlgmr.msra.gmra.mxu1 %vm365_vm0, %v1416_v13 }
  0x21   : > { %326 = vrot.lane.b32.xlu1 %v1523_v8, %s1432_s21  ;;  %697 = vmatprep.mubr.bf16.mxu1 %v1433_v12 }
  0x24   : > { %328 = vrot.lane.b32.xlu0 %v1543_v11, %s1432_s21 }
  0x25   : > { %324 = vrot.lane.b32.xlu1 %v1533_v10, %s1432_s21 }
  0x28   : > { %531 = vrot.lane.b32.xlu0 %v1484_v0, %s1434_s22 }
  0x29   : > { %533 = vrot.lane.b32.xlu1 %v1492_v2, %s1434_s22 }
  0x2c   : > { %529 = vrot.lane.b32.xlu0 %v1487_v1, %s1434_s22 }
  0x2d   : > { %525 = vrot.lane.b32.xlu1 %v1498_v3, %s1434_s22 }
  0x30   : > { %527 = vrot.lane.b32.xlu0 %v1508_v5, %s1434_s22 }
  0x31   : > { %523 = vrot.lane.b32.xlu1 %v1502_v4, %s1434_s22 }
  0x34   : > { %519 = vrot.lane.b32.xlu0 %v1511_v6, %s1434_s22 }
  0x35   : > { %521 = vrot.lane.b32.xlu1 %v1528_v9, %s1434_s22 }
  0x38   : > { %517 = vrot.lane.b32.xlu0 %v1518_v7, %s1434_s22 }
  0x39   : > { %513 = vrot.lane.b32.xlu1 %v1523_v8, %s1434_s22 }
  0x3c   : > { %515 = vrot.lane.b32.xlu0 %v1543_v11, %s1434_s22 }
  0x3d   : > { %511 = vrot.lane.b32.xlu1 %v1533_v10, %s1434_s22 }
  0x40   : > { %641 = vrot.lane.b32.xlu0 %v1484_v0, %s1435_s25 }
  0x41   : > { %643 = vrot.lane.b32.xlu1 %v1492_v2, %s1435_s25 }
  0x44   : > { %639 = vrot.lane.b32.xlu0 %v1487_v1, %s1435_s25 }
  0x45   : > { %733 = vrot.lane.b32.xlu1 %v1484_v0, %s1436_s26 }
  0x48   : > { %735 = vrot.lane.b32.xlu0 %v1492_v2, %s1436_s26 }
  0x49   : > { %731 = vrot.lane.b32.xlu1 %v1487_v1, %s1436_s26 }
  0x4c   : > { %635 = vrot.lane.b32.xlu0 %v1498_v3, %s1435_s25 }
  0x4d   : > { %637 = vrot.lane.b32.xlu1 %v1508_v5, %s1435_s25 }
  0x50   : > { %633 = vrot.lane.b32.xlu0 %v1502_v4, %s1435_s25 }
  0x51   : > { %727 = vrot.lane.b32.xlu1 %v1498_v3, %s1436_s26 }
  0x54   : > { %729 = vrot.lane.b32.xlu0 %v1508_v5, %s1436_s26 }
  0x55   : > { %725 = vrot.lane.b32.xlu1 %v1502_v4, %s1436_s26 }
  0x58   : > { %629 = vrot.lane.b32.xlu0 %v1511_v6, %s1435_s25 }
  0x59   : > { %631 = vrot.lane.b32.xlu1 %v1528_v9, %s1435_s25 }
  0x5c   : > { %627 = vrot.lane.b32.xlu0 %v1518_v7, %s1435_s25 }
  0x5d   : > { %721 = vrot.lane.b32.xlu1 %v1511_v6, %s1436_s26 }
  0x60   : > { %723 = vrot.lane.b32.xlu0 %v1528_v9, %s1436_s26 }
  0x61   : > { %719 = vrot.lane.b32.xlu1 %v1518_v7, %s1436_s26 }
  0x64   : > { %623 = vrot.lane.b32.xlu0 %v1523_v8, %s1435_s25 }
  0x65   : > { %625 = vrot.lane.b32.xlu1 %v1543_v11, %s1435_s25 }
  0x68   : > { %621 = vrot.lane.b32.xlu0 %v1533_v10, %s1435_s25 }
  0x69   : > { %715 = vrot.lane.b32.xlu1 %v1523_v8, %s1436_s26 }
  0x6c   : > { %717 = vrot.lane.b32.xlu0 %v1543_v11, %s1436_s26 }
  0x6d   : > { %713 = vrot.lane.b32.xlu1 %v1533_v10, %s1436_s26 }
  0x70   : > { %828 = vrot.lane.b32.xlu0 %v1484_v0, %s1437_s27 }
  0x71   : > { %830 = vrot.lane.b32.xlu1 %v1492_v2, %s1437_s27 }
  0x74   : > { %826 = vrot.lane.b32.xlu0 %v1487_v1, %s1437_s27 }
  0x75   : > { %934 = vrot.lane.b32.xlu1 %v1484_v0, %s1438_s28 }
  0x78   : > { %936 = vrot.lane.b32.xlu0 %v1492_v2, %s1438_s28 }
  0x79   : > { %932 = vrot.lane.b32.xlu1 %v1487_v1, %s1438_s28 }
  0x7c   : > { %822 = vrot.lane.b32.xlu0 %v1498_v3, %s1437_s27 }
  0x7d   : > { %824 = vrot.lane.b32.xlu1 %v1508_v5, %s1437_s27 }
  0x80   : > { %820 = vrot.lane.b32.xlu0 %v1502_v4, %s1437_s27 }
  0x81   : > { %928 = vrot.lane.b32.xlu1 %v1498_v3, %s1438_s28 }
  0x82   : > { %v345_v14 = vpop.permute.xlu0 %344 }
  0x83   : > { %v343_v15 = vpop.permute.xlu1 %342 }
  0x84   : > { %930 = vrot.lane.b32.xlu0 %v1508_v5, %s1438_s28  ;;  %v355_v19 = vsel %vm348_vm1, %v343_v15, %v345_v14 }
  0x85   : > { %926 = vrot.lane.b32.xlu1 %v1502_v4, %s1438_s28 }
  0x86   : > { %v347_v16 = vpop.permute.xlu0 %346 }
  0x87   : > { %v339_v17 = vpop.permute.xlu1 %338  ;;  %v356_v18 = vsel %vm348_vm1, %v345_v14, %v347_v16 }
  0x88   : > { %377 = vmatprep.subr.bf16.mxu0 %v356_v18  ;;  %816 = vrot.lane.b32.xlu0 %v1511_v6, %s1437_s27 }
  0x89   : > { %818 = vrot.lane.b32.xlu1 %v1528_v9, %s1437_s27  ;;  %378 = vmatpush1.bf16.msra.mxu0 %v355_v19  ;;  %v1200_v19 = vld [vmem:[%s1815_s2] sm:$0xff] }
  0x8a   : > { %v341_v20 = vpop.permute.xlu0 %340 }
  0x8b   : > { %v337_v21 = vpop.permute.xlu1 %336  ;;  %v354_v22 = vsel %vm348_vm1, %v339_v17, %v341_v20 }
  0x8c   : > { %379 = vmatprep.subr.bf16.mxu0 %v354_v22  ;;  %814 = vrot.lane.b32.xlu0 %v1518_v7, %s1437_s27  ;;  %v353_v23 = vsel %vm348_vm1, %v337_v21, %v339_v17 }
  0x8d   : > { %922 = vrot.lane.b32.xlu1 %v1511_v6, %s1438_s28  ;;  %380 = vmatpush1.bf16.msra.mxu0 %v353_v23  ;;  %v1216_v23 = vld [vmem:[%s1816_s3] sm:$0xff] }
  0x8e   : > { %v333_v24 = vpop.permute.xlu0 %332 }
  0x8f   : > { %v335_v25 = vpop.permute.xlu1 %334 }
  0x90   : > { %v352_v26 = vsel %vm348_vm1, %v333_v24, %v335_v25  ;;  %924 = vrot.lane.b32.xlu0 %v1528_v9, %s1438_s28 }
  0x91   : > { %381 = vmatprep.subr.bf16.mxu0 %v352_v26  ;;  %920 = vrot.lane.b32.xlu1 %v1518_v7, %s1438_s28 }
  0x92   : > { %v331_v27 = vpop.permute.xlu0 %330 }
  0x93   : > { %v327_v28 = vpop.permute.xlu1 %326  ;;  %v351_v29 = vsel %vm348_vm1, %v331_v27, %v333_v24 }
  0x94   : > { %382 = vmatpush1.bf16.msra.mxu0 %v351_v29  ;;  %810 = vrot.lane.b32.xlu0 %v1523_v8, %s1437_s27 }
  0x95   : > { %812 = vrot.lane.b32.xlu1 %v1543_v11, %s1437_s27 }
  0x96   : > { %v329_v30 = vpop.permute.xlu0 %328 }
  0x97   : > { %v325_v31 = vpop.permute.xlu1 %324  ;;  %v350_v32 = vsel %vm348_vm1, %v327_v28, %v329_v30 }
  0x98   : > { %383 = vmatprep.subr.bf16.mxu0 %v350_v32  ;;  %808 = vrot.lane.b32.xlu0 %v1533_v10, %s1437_s27  ;;  %v349_v33 = vsel %vm348_vm1, %v325_v31, %v327_v28 }
  0x99   : > { %916 = vrot.lane.b32.xlu1 %v1523_v8, %s1438_s28  ;;  %384 = vmatpush1.bf16.msra.mxu0 %v349_v33  ;;  %v1418_v33 = vld [vmem:[%s1814_s1 + $0x20] sm:$0xff]  }
  0x9a   : > { %v532_v35 = vpop.permute.xlu0 %531 }
  0x9b   : > { %v534_v36 = vpop.permute.xlu1 %533 }
  0x9c   : > { %918 = vrot.lane.b32.xlu0 %v1543_v11, %s1438_s28  ;;  %v543_v37 = vsel %vm535_vm2, %v532_v35, %v534_v36  ;;  %1332 = vmatmul.mubr.msk.bf16.vlgmr.msra.gmra.mxu0 %vm365_vm0, %v1415_v34 }
  0x9d   : > { %914 = vrot.lane.b32.xlu1 %v1533_v10, %s1438_s28  ;;  %563 = vmatprep.subr.bf16.mxu0 %v543_v37 }
  0x9e   : > { %v530_v38 = vpop.permute.xlu0 %529  ;;  %587 = vmatprep.mubr.bf16.mxu0 %v1433_v12 }
  0x9f   : > { %v542_v39 = vsel %vm535_vm2, %v530_v38, %v532_v35  ;;  %v526_v40 = vpop.permute.xlu1 %525  ;;  %v1419_v38 = vld [vmem:[%s1814_s1 + $0x8] sm:$0xff]  }
  0xa0   : > { %1026 = vrot.lane.b32.xlu0 %v1484_v0, %s1439_s5  ;;  %564 = vmatpush1.bf16.msra.mxu0 %v542_v39 }
  0xa1   : > { %1028 = vrot.lane.b32.xlu1 %v1492_v2, %s1439_s5 }
  0xa2   : > { %v528_v41 = vpop.permute.xlu0 %527 }
  0xa3   : > { %v524_v42 = vpop.permute.xlu1 %523  ;;  %v541_v43 = vsel %vm535_vm2, %v526_v40, %v528_v41 }
  0xa4   : > { %v540_v44 = vsel %vm535_vm2, %v524_v42, %v526_v40  ;;  %1024 = vrot.lane.b32.xlu0 %v1487_v1, %s1439_s5  ;;  %565 = vmatprep.subr.bf16.mxu0 %v541_v43 }
  0xa5   : > { %1121 = vrot.lane.b32.xlu1 %v1484_v0, %s1440_s6  ;;  %566 = vmatpush1.bf16.msra.mxu0 %v540_v44 }
  0xa6   : > { %v520_v45 = vpop.permute.xlu0 %519 }
  0xa7   : > { %v522_v46 = vpop.permute.xlu1 %521 }
  0xa8   : > { %1123 = vrot.lane.b32.xlu0 %v1492_v2, %s1440_s6  ;;  %v539_v47 = vsel %vm535_vm2, %v520_v45, %v522_v46 }
  0xa9   : > { %1119 = vrot.lane.b32.xlu1 %v1487_v1, %s1440_s6  ;;  %567 = vmatprep.subr.bf16.mxu0 %v539_v47 }
  0xaa   : > { %v518_v48 = vpop.permute.xlu0 %517 }
  0xab   : > { %v538_v49 = vsel %vm535_vm2, %v518_v48, %v520_v45  ;;  %v514_v50 = vpop.permute.xlu1 %513 }
  0xac   : > { %1020 = vrot.lane.b32.xlu0 %v1498_v3, %s1439_s5  ;;  %568 = vmatpush1.bf16.msra.mxu0 %v538_v49 }
  0xad   : > { %1022 = vrot.lane.b32.xlu1 %v1508_v5, %s1439_s5 }
  0xae   : > { %v516_v51 = vpop.permute.xlu0 %515 }
  0xaf   : > { %v512_v52 = vpop.permute.xlu1 %511  ;;  %v537_v53 = vsel %vm535_vm2, %v514_v50, %v516_v51 }
  0xb0   : > { %v536_v54 = vsel %vm535_vm2, %v512_v52, %v514_v50  ;;  %1018 = vrot.lane.b32.xlu0 %v1502_v4, %s1439_s5  ;;  %569 = vmatprep.subr.bf16.mxu0 %v537_v53 }
  0xb1   : > { %1115 = vrot.lane.b32.xlu1 %v1498_v3, %s1440_s6  ;;  %570 = vmatpush1.bf16.msra.mxu0 %v536_v54 }
  0xb2   : > { %v642_v56 = vpop.permute.xlu0 %641 }
  0xb3   : > { %v644_v57 = vpop.permute.xlu1 %643 }
  0xb4   : > { %1117 = vrot.lane.b32.xlu0 %v1508_v5, %s1440_s6  ;;  %v653_v58 = vsel %vm645_vm3, %v642_v56, %v644_v57  ;;  %1346 = vmatmul.mubr.msk.bf16.vlgmr.msra.gmra.mxu0 %vm365_vm0, %v1417_v55 }
  0xb5   : > { %1113 = vrot.lane.b32.xlu1 %v1502_v4, %s1440_s6  ;;  %673 = vmatprep.subr.bf16.mxu1 %v653_v58 }
  0xb6   : > { %v640_v59 = vpop.permute.xlu0 %639  ;;  %789 = vmatprep.mubr.bf16.mxu0 %v1433_v12 }
  0xb7   : > { %v652_v60 = vsel %vm645_vm3, %v640_v59, %v642_v56  ;;  %v734_v61 = vpop.permute.xlu1 %733 }
  0xb8   : > { %1014 = vrot.lane.b32.xlu0 %v1511_v6, %s1439_s5  ;;  %674 = vmatpush1.bf16.msra.mxu1 %v652_v60 }
  0xb9   : > { %1016 = vrot.lane.b32.xlu1 %v1528_v9, %s1439_s5 }
  0xba   : > { %v736_v62 = vpop.permute.xlu0 %735 }
  0xbb   : > { %v732_v63 = vpop.permute.xlu1 %731  ;;  %v745_v0 = vsel %vm737_vm4, %v734_v61, %v736_v62 }
  0xbc   : > { %v744_v1 = vsel %vm737_vm4, %v732_v63, %v734_v61  ;;  %1012 = vrot.lane.b32.xlu0 %v1518_v7, %s1439_s5  ;;  %765 = vmatprep.subr.bf16.mxu0 %v745_v0 }
  0xbd   : > { %1109 = vrot.lane.b32.xlu1 %v1511_v6, %s1440_s6  ;;  %766 = vmatpush1.bf16.msra.mxu0 %v744_v1 }
  0xbe   : > { %v636_v2 = vpop.permute.xlu0 %635 }
  0xbf   : > { %v638_v3 = vpop.permute.xlu1 %637 }
  0xc0   : > { %1111 = vrot.lane.b32.xlu0 %v1528_v9, %s1440_s6  ;;  %v651_v4 = vsel %vm645_vm3, %v636_v2, %v638_v3 }
  0xc1   : > { %1107 = vrot.lane.b32.xlu1 %v1518_v7, %s1440_s6  ;;  %675 = vmatprep.subr.bf16.mxu1 %v651_v4 }
  0xc2   : > { %v634_v5 = vpop.permute.xlu0 %633 }
  0xc3   : > { %v650_v13 = vsel %vm645_vm3, %v634_v5, %v636_v2  ;;  %v728_v14 = vpop.permute.xlu1 %727 }
  0xc4   : > { %1008 = vrot.lane.b32.xlu0 %v1523_v8, %s1439_s5  ;;  %676 = vmatpush1.bf16.msra.mxu1 %v650_v13 }
  0xc5   : > { %1010 = vrot.lane.b32.xlu1 %v1543_v11, %s1439_s5 }
  0xc6   : > { %v730_v6 = vpop.permute.xlu0 %729 }
  0xc7   : > { %v726_v15 = vpop.permute.xlu1 %725  ;;  %v743_v9 = vsel %vm737_vm4, %v728_v14, %v730_v6 }
  0xc8   : > { %v742_v16 = vsel %vm737_vm4, %v726_v15, %v728_v14  ;;  %1006 = vrot.lane.b32.xlu0 %v1533_v10, %s1439_s5  ;;  %767 = vmatprep.subr.bf16.mxu0 %v743_v9  ;;  %s1375_s5 = sshll.u32 %s1819_s16, 4 }
  0xc9   : > { %1103 = vrot.lane.b32.xlu1 %v1523_v8, %s1440_s6  ;;  %768 = vmatpush1.bf16.msra.mxu0 %v742_v16  ;;  %v1201_v8 = vld [vmem:[%s1815_s2 + $0x8] sm:$0xff]  ;;  %v1420_v16 = vld [vmem:[%s1814_s1 + $0x38] sm:$0xff]   ;;  %s197_s8 = scalar_lea.vmem %s1817_s4, %s1375_s5 }
  0xca   : > { %v630_v7 = vpop.permute.xlu0 %629 }
  0xcb   : > { %v632_v17 = vpop.permute.xlu1 %631 }
  0xcc   : > { %1105 = vrot.lane.b32.xlu0 %v1543_v11, %s1440_s6  ;;  %v649_v18 = vsel %vm645_vm3, %v630_v7, %v632_v17 }
  0xcd   : > { %1101 = vrot.lane.b32.xlu1 %v1533_v10, %s1440_s6  ;;  %677 = vmatprep.subr.bf16.mxu1 %v649_v18  ;;  %v1217_v10 = vld [vmem:[%s1816_s3 + $0x8] sm:$0xff] }
  0xce   : > { %v628_v20 = vpop.permute.xlu0 %627 }
  0xcf   : > { %v648_v21 = vsel %vm645_vm3, %v628_v20, %v630_v7  ;;  %v722_v22 = vpop.permute.xlu1 %721  ;;  %v1421_v20 = vld [vmem:[%s1814_s1 + $0x28] sm:$0xff]  }
  0xd0   : > { %678 = vmatpush1.bf16.msra.mxu1 %v648_v21  ;;  %1204 = vperm.xlu0 %1397, %v1200_v19  }
  0xd1   : > { %1209 = vperm.xlu1 %1398, %v1201_v8  }
  0xd2   : > { %v724_v11 = vpop.permute.xlu0 %723 }
  0xd3   : > { %v720_v24 = vpop.permute.xlu1 %719  ;;  %v741_v25 = vsel %vm737_vm4, %v722_v22, %v724_v11 }
  0xd4   : > { %v740_v26 = vsel %vm737_vm4, %v720_v24, %v722_v22  ;;  %769 = vmatprep.subr.bf16.mxu0 %v741_v25  ;;  %1225 = vperm.xlu0 %1397, %v1217_v10  }
  0xd5   : > { %770 = vmatpush1.bf16.msra.mxu0 %v740_v26  ;;  %1220 = vperm.xlu1 %1398, %v1216_v23  }
  0xd6   : > { %v624_v27 = vpop.permute.xlu0 %623 }
  0xd7   : > { %v626_v28 = vpop.permute.xlu1 %625 }
  0xd8   : > { %v647_v29 = vsel %vm645_vm3, %v624_v27, %v626_v28 }
  0xd9   : > { %679 = vmatprep.subr.bf16.mxu1 %v647_v29 }
  0xda   : > { %v622_v30 = vpop.permute.xlu0 %621 }
  0xdb   : > { %v646_v31 = vsel %vm645_vm3, %v622_v30, %v624_v27  ;;  %v716_v32 = vpop.permute.xlu1 %715 }
  0xdc   : > { %680 = vmatpush1.bf16.msra.mxu1 %v646_v31 }
  0xde   : > { %v718_v34 = vpop.permute.xlu0 %717 }
  0xdf   : > { %v714_v35 = vpop.permute.xlu1 %713  ;;  %v739_v36 = vsel %vm737_vm4, %v716_v32, %v718_v34  ;;  %1352 = vmatmul.mubr.msk.bf16.vlgmr.msra.gmra.mxu1 %vm365_vm0, %v1418_v33 }
  0xe0   : > { %v738_v37 = vsel %vm737_vm4, %v714_v35, %v716_v32  ;;  %771 = vmatprep.subr.bf16.mxu0 %v739_v36  ;;  %884 = vmatprep.mubr.bf16.mxu1 %v1433_v12 }
  0xe1   : > { %772 = vmatpush1.bf16.msra.mxu0 %v738_v37 }
  0xe2   : > { %v829_v39 = vpop.permute.xlu0 %828 }
  0xe3   : > { %v831_v40 = vpop.permute.xlu1 %830 }
  0xe4   : > { %v840_v41 = vsel %vm832_vm5, %v829_v39, %v831_v40  ;;  %1354 = vmatmul.mubr.msk.bf16.vlgmr.msra.gmra.mxu0 %vm365_vm0, %v1419_v38 }
  0xe5   : > { %860 = vmatprep.subr.bf16.mxu1 %v840_v41  ;;  %990 = vmatprep.mubr.bf16.mxu0 %v1433_v12 }
  0xe6   : > { %v827_v42 = vpop.permute.xlu0 %826 }
  0xe7   : > { %v839_v43 = vsel %vm832_vm5, %v827_v42, %v829_v39  ;;  %v935_v44 = vpop.permute.xlu1 %934 }
  0xe8   : > { %861 = vmatpush1.bf16.msra.mxu1 %v839_v43 }
  0xea   : > { %v937_v45 = vpop.permute.xlu0 %936 }
  0xeb   : > { %v933_v46 = vpop.permute.xlu1 %932  ;;  %v946_v47 = vsel %vm938_vm6, %v935_v44, %v937_v45 }
  0xec   : > { %v945_v48 = vsel %vm938_vm6, %v933_v46, %v935_v44  ;;  %966 = vmatprep.subr.bf16.mxu0 %v946_v47 }
  0xed   : > { %967 = vmatpush1.bf16.msra.mxu0 %v945_v48 }
  0xee   : > { %v823_v49 = vpop.permute.xlu0 %822 }
  0xef   : > { %v825_v50 = vpop.permute.xlu1 %824 }
  0xf0   : > { %v838_v51 = vsel %vm832_vm5, %v823_v49, %v825_v50 }
  0xf1   : > { %862 = vmatprep.subr.bf16.mxu1 %v838_v51 }
  0xf2   : > { %v821_v52 = vpop.permute.xlu0 %820 }
  0xf3   : > { %v837_v53 = vsel %vm832_vm5, %v821_v52, %v823_v49  ;;  %v929_v54 = vpop.permute.xlu1 %928 }
  0xf4   : > { %863 = vmatpush1.bf16.msra.mxu1 %v837_v53  ;;  %v1422_v53 = vld [vmem:[%s1814_s1 + $0x10] sm:$0xff]  }
  0xf6   : > { %v931_v55 = vpop.permute.xlu0 %930 }
  0xf7   : > { %v927_v56 = vpop.permute.xlu1 %926  ;;  %v944_v57 = vsel %vm938_vm6, %v929_v54, %v931_v55 }
  0xf8   : > { %v943_v58 = vsel %vm938_vm6, %v927_v56, %v929_v54  ;;  %968 = vmatprep.subr.bf16.mxu0 %v944_v57 }
  0xf9   : > { %969 = vmatpush1.bf16.msra.mxu0 %v943_v58  ;;  %v1423_v58 = vld [vmem:[%s1814_s1 + $0x40] sm:$0xff]  }
  0xfa   : > { %v817_v59 = vpop.permute.xlu0 %816 }
  0xfb   : > { %v819_v60 = vpop.permute.xlu1 %818 }
  0xfc   : > { %v836_v61 = vsel %vm832_vm5, %v817_v59, %v819_v60 }
  0xfd   : > { %864 = vmatprep.subr.bf16.mxu1 %v836_v61  ;;  %v494_v61 = vpop.f32.mrf.mxu1 }
  0xfe   : > { %v815_v62 = vpop.permute.xlu0 %814 }
  0xff   : > { %v835_v63 = vsel %vm832_vm5, %v815_v62, %v817_v59  ;;  %v923_v0 = vpop.permute.xlu1 %922 }
 0x100   : > { %865 = vmatpush1.bf16.msra.mxu1 %v835_v63  ;;  %v496_v63 = vpop.f32.mrf.mxu1 }
 0x102   : > { %v925_v1 = vpop.permute.xlu0 %924 }
 0x103   : > { %v921_v2 = vpop.permute.xlu1 %920  ;;  %v942_v3 = vsel %vm938_vm6, %v923_v0, %v925_v1  ;;  %v498_v1 = vpop.f32.mrf.mxu1 }
 0x104   : > { %v941_v4 = vsel %vm938_vm6, %v921_v2, %v923_v0  ;;  %970 = vmatprep.subr.bf16.mxu0 %v942_v3 }
 0x105   : > { %971 = vmatpush1.bf16.msra.mxu0 %v941_v4  ;;  %v500_v3 = vpop.f32.mrf.mxu1 }
 0x106   : > { %v811_v5 = vpop.permute.xlu0 %810 }
 0x107   : > { %v813_v13 = vpop.permute.xlu1 %812 }
 0x108   : > { %v834_v14 = vsel %vm832_vm5, %v811_v5, %v813_v13 }
 0x109   : > { %866 = vmatprep.subr.bf16.mxu1 %v834_v14 }
 0x10a   : > { %v809_v6 = vpop.permute.xlu0 %808 }
 0x10b   : > { %v833_v15 = vsel %vm832_vm5, %v809_v6, %v811_v5  ;;  %v917_v9 = vpop.permute.xlu1 %916 }
 0x10c   : > { %867 = vmatpush1.bf16.msra.mxu1 %v833_v15 }
 0x10e   : > { %v919_v7 = vpop.permute.xlu0 %918 }
 0x10f   : > { %v915_v17 = vpop.permute.xlu1 %914  ;;  %1358 = vmatmul.mubr.msk.bf16.vlgmr.msra.gmra.mxu1 %vm365_vm0, %v1420_v16  ;;  %v940_v18 = vsel %vm938_vm6, %v917_v9, %v919_v7 }
 0x110   : > { %v939_v19 = vsel %vm938_vm6, %v915_v17, %v917_v9  ;;  %972 = vmatprep.subr.bf16.mxu0 %v940_v18  ;;  %1082 = vmatprep.mubr.bf16.mxu1 %v1433_v12  ;;  %v199_v17 = vlaneseq }
 0x111   : > { %973 = vmatpush1.bf16.msra.mxu0 %v939_v19 }
 0x112   : > { %v1027_v8 = vpop.permute.xlu0 %1026 }
 0x113   : > { %v1029_v21 = vpop.permute.xlu1 %1028 }
 0x114   : > { %v1038_v22 = vsel %vm1030_vm7, %v1027_v8, %v1029_v21  ;;  %1364 = vmatmul.mubr.msk.bf16.vlgmr.msra.gmra.mxu0 %vm365_vm0, %v1421_v20  ;;  %v200_v20 = vand.u32 127, %v199_v17 }
 0x115   : > { %1058 = vmatprep.subr.bf16.mxu1 %v1038_v22  ;;  %1177 = vmatprep.mubr.bf16.mxu0 %v1433_v12 }
 0x116   : > { %v1025_v10 = vpop.permute.xlu0 %1024 }
 0x117   : > { %v1037_v11 = vsel %vm1030_vm7, %v1025_v10, %v1027_v8  ;;  %v1122_v23 = vpop.permute.xlu1 %1121  ;;  %v201_v10 = vadd.s32 128, %v200_v20 }
 0x118   : > { %1059 = vmatpush1.bf16.msra.mxu1 %v1037_v11 }
 0x11a   : > { %v1124_v24 = vpop.permute.xlu0 %1123 }
 0x11b   : > { %v1120_v25 = vpop.permute.xlu1 %1119  ;;  %v1133_v26 = vsel %vm1125_vm8, %v1122_v23, %v1124_v24  ;;  %v206_v24 = vand.u32 15, %v200_v20 }
 0x11c   : > { %v1132_v27 = vsel %vm1125_vm8, %v1120_v25, %v1122_v23  ;;  %1153 = vmatprep.subr.bf16.mxu0 %v1133_v26  ;;  %v213_v25 = vand.u32 15, %v201_v10 }
 0x11d   : > { %1154 = vmatpush1.bf16.msra.mxu0 %v1132_v27  ;;  %vm226_vm9 = vcmp.ne.s32.totalorder %v206_v24, 0  ;;  %vm232_vm11 = vcmp.ne.s32.totalorder %v206_v24, 15 }
 0x11e   : > { %v1021_v28 = vpop.permute.xlu0 %1020  ;;  %vm227_vm10 = vcmp.ne.s32.totalorder %v213_v25, 0  ;;  %vm233_vm12 = vcmp.ne.s32.totalorder %v213_v25, 15 }
 0x11f   : > { %v1023_v29 = vpop.permute.xlu1 %1022 }
 0x120   : > { %v1036_v30 = vsel %vm1030_vm7, %v1021_v28, %v1023_v29 }
 0x121   : > { %1060 = vmatprep.subr.bf16.mxu1 %v1036_v30 }
 0x122   : > { %v1019_v12 = vpop.permute.xlu0 %1018 }
 0x123   : > { %v1035_v31 = vsel %vm1030_vm7, %v1019_v12, %v1021_v28  ;;  %v1116_v32 = vpop.permute.xlu1 %1115 }
 0x124   : > { %1061 = vmatpush1.bf16.msra.mxu1 %v1035_v31 }
 0x126   : > { %v1118_v33 = vpop.permute.xlu0 %1117 }
 0x127   : > { %v1114_v34 = vpop.permute.xlu1 %1113  ;;  %v1131_v35 = vsel %vm1125_vm8, %v1116_v32, %v1118_v33 }
 0x128   : > { %v1130_v36 = vsel %vm1125_vm8, %v1114_v34, %v1116_v32  ;;  %1155 = vmatprep.subr.bf16.mxu0 %v1131_v35  ;;  %v1441_v35 = vmov 0.0  }
 0x129   : > { %1156 = vmatpush1.bf16.msra.mxu0 %v1130_v36  ;;  %v1313_v36 = vsel %vm226_vm9, 1.0, %v1441_v35 }
 0x12a   : > { %v1015_v37 = vpop.permute.xlu0 %1014 }
 0x12b   : > { %v1017_v38 = vpop.permute.xlu1 %1016 }
 0x12c   : > { %v1034_v39 = vsel %vm1030_vm7, %v1015_v37, %v1017_v38 }
 0x12d   : > { %1062 = vmatprep.subr.bf16.mxu1 %v1034_v39 }
 0x12e   : > { %v1013_v40 = vpop.permute.xlu0 %1012 }
 0x12f   : > { %v1033_v41 = vsel %vm1030_vm7, %v1013_v40, %v1015_v37  ;;  %v1110_v42 = vpop.permute.xlu1 %1109 }
 0x130   : > { %1063 = vmatpush1.bf16.msra.mxu1 %v1033_v41  ;;  %v1314_v41 = vsel %vm227_vm10, 1.0, %v1441_v35 }
 0x132   : > { %v1112_v43 = vpop.permute.xlu0 %1111 }
 0x133   : > { %v1108_v44 = vpop.permute.xlu1 %1107  ;;  %v1129_v45 = vsel %vm1125_vm8, %v1110_v42, %v1112_v43 }
 0x134   : > { %v1128_v46 = vsel %vm1125_vm8, %v1108_v44, %v1110_v42  ;;  %1157 = vmatprep.subr.bf16.mxu0 %v1129_v45 }
 0x135   : > { %1158 = vmatpush1.bf16.msra.mxu0 %v1128_v46 }
 0x136   : > { %v1009_v47 = vpop.permute.xlu0 %1008 }
 0x137   : > { %v1011_v48 = vpop.permute.xlu1 %1010 }
 0x138   : > { %v1032_v49 = vsel %vm1030_vm7, %v1009_v47, %v1011_v48  ;;  %v1315_v48 = vsel %vm232_vm11, 1.0, %v1441_v35 }
 0x139   : > { %1064 = vmatprep.subr.bf16.mxu1 %v1032_v49 }
 0x13a   : > { %v1007_v50 = vpop.permute.xlu0 %1006 }
 0x13b   : > { %v1031_v51 = vsel %vm1030_vm7, %v1007_v50, %v1009_v47  ;;  %v1104_v52 = vpop.permute.xlu1 %1103 }
 0x13c   : > { %1065 = vmatpush1.bf16.msra.mxu1 %v1031_v51 }
 0x13e   : > { %v1106_v54 = vpop.permute.xlu0 %1105 }
 0x13f   : > { %v1102_v55 = vpop.permute.xlu1 %1101  ;;  %1366 = vmatmul.mubr.msk.bf16.vlgmr.msra.gmra.mxu1 %vm365_vm0, %v1422_v53  ;;  %v1127_v56 = vsel %vm1125_vm8, %v1104_v52, %v1106_v54 }
 0x140   : > { %v1126_v57 = vsel %vm1125_vm8, %v1102_v55, %v1104_v52  ;;  %1159 = vmatprep.subr.bf16.mxu0 %v1127_v56 }
 0x141   : > { %1160 = vmatpush1.bf16.msra.mxu0 %v1126_v57 }
 0x144   : > { %1370 = vmatmul.mubr.msk.bf16.vlgmr.msra.gmra.mxu0 %vm365_vm0, %v1423_v58  ;;  %v1316_v58 = vsel %vm233_vm12, 1.0, %v1441_v35 }
 0x14c   : > { %v1210_v50 = vpop.permute.xlu1 %1209 }
 0x15c   : > { %v403_v59 = vpop.f32.mrf.mxu0 }
 0x15d   : > { %v495_v26 = vadd.f32 %v494_v61, %v403_v59 }
 0x15e   : > { %v405_v60 = vpop.f32.mrf.mxu0 }
 0x15f   : > { %v497_v28 = vadd.f32 %v496_v63, %v405_v60 }
 0x160   : > { %v407_v62 = vpop.f32.mrf.mxu0 }
 0x161   : > { %v499_v31 = vadd.f32 %v498_v1, %v407_v62 }
 0x162   : > { %v409_v0 = vpop.f32.mrf.mxu0 }
 0x163   : > { %v501_v38 = vadd.f32 %v500_v3, %v409_v0 }
 0x174   : > { %v589_v2 = vpop.f32.mrf.mxu0 }
 0x175   : > { %v598_v33 = vadd.f32 %v589_v2, %v495_v26 }
 0x176   : > { %v591_v4 = vpop.f32.mrf.mxu0 }
 0x177   : > { %v599_v37 = vadd.f32 %v591_v4, %v497_v28  ;;  %v602_v51 = vmul.f32 %v1313_v36, %v598_v33  ;;  %v1205_v4 = vpop.permute.xlu0 %1204 }
 0x178   : > { %v593_v13 = vpop.f32.mrf.mxu0 }
 0x179   : > { %v600_v45 = vadd.f32 %v593_v13, %v499_v31  ;;  %v603_v54 = vmul.f32 %v1314_v41, %v599_v37 }
 0x17a   : > { %v595_v6 = vpop.f32.mrf.mxu0 }
 0x17b   : > { %v601_v55 = vadd.f32 %v595_v6, %v501_v38  ;;  %v604_v0 = vmul.f32 %v1313_v36, %v600_v45  ;;  %v1226_v26 = vpop.permute.xlu0 %1225 }
 0x19f   : > { %v699_v5 = vpop.f32.mrf.mxu1 }
 0x1a1   : > { %v701_v14 = vpop.f32.mrf.mxu1 }
 0x1a3   : > { %v703_v9 = vpop.f32.mrf.mxu1 }
 0x1a4   : > { %v791_v15 = vpop.f32.mrf.mxu0 }
 0x1a5   : > { %v705_v7 = vpop.f32.mrf.mxu1  ;;  %v792_v30 = vadd.f32 %v791_v15, %v699_v5 }
 0x1a6   : > { %v793_v16 = vpop.f32.mrf.mxu0 }
 0x1a7   : > { %v794_v32 = vadd.f32 %v793_v16, %v701_v14 }
 0x1a8   : > { %v795_v18 = vpop.f32.mrf.mxu0 }
 0x1a9   : > { %v796_v39 = vadd.f32 %v795_v18, %v703_v9  ;;  %v605_v9 = vmul.f32 %v1314_v41, %v601_v55 }
 0x1aa   : > { %v797_v8 = vpop.f32.mrf.mxu0 }
 0x1ab   : > { %v798_v47 = vadd.f32 %v797_v8, %v705_v7  ;;  %v1221_v7 = vpop.permute.xlu1 %1220 }
 0x1cf   : > { %v886_v19 = vpop.f32.mrf.mxu1 }
 0x1d0   : > { %v895_v42 = vadd.f32 %v886_v19, %v792_v30 }
 0x1d1   : > { %v888_v21 = vpop.f32.mrf.mxu1 }
 0x1d2   : > { %v896_v46 = vadd.f32 %v888_v21, %v794_v32  ;;  %v899_v60 = vadd.f32 %v895_v42, %v602_v51 }
 0x1d3   : > { %v890_v11 = vpop.f32.mrf.mxu1 }
 0x1d4   : > { %v992_v22 = vpop.f32.mrf.mxu0  ;;  %v897_v56 = vadd.f32 %v890_v11, %v796_v39  ;;  %v900_v1 = vadd.f32 %v896_v46, %v603_v54 }
 0x1d5   : > { %v892_v27 = vpop.f32.mrf.mxu1 }
 0x1d6   : > { %v994_v23 = vpop.f32.mrf.mxu0  ;;  %v898_v2 = vadd.f32 %v892_v27, %v798_v47  ;;  %v901_v6 = vadd.f32 %v897_v56, %v604_v0 }
 0x1d8   : > { %v996_v29 = vpop.f32.mrf.mxu0  ;;  %v902_v8 = vadd.f32 %v898_v2, %v605_v9 }
 0x1da   : > { %v998_v40 = vpop.f32.mrf.mxu0 }
 0x1ff   : > { %v1084_v12 = vpop.f32.mrf.mxu1 }
 0x200   : > { %v1085_v43 = vadd.f32 %v1084_v12, %v992_v22 }
 0x201   : > { %v1086_v34 = vpop.f32.mrf.mxu1 }
 0x202   : > { %v1087_v52 = vadd.f32 %v1086_v34, %v994_v23 }
 0x203   : > { %v1088_v44 = vpop.f32.mrf.mxu1 }
 0x204   : > { %v1179_v49 = vpop.f32.mrf.mxu0  ;;  %v1089_v61 = vadd.f32 %v1088_v44, %v996_v29 }
 0x205   : > { %v1188_v53 = vadd.f32 %v1179_v49, %v1085_v43  ;;  %v1090_v57 = vpop.f32.mrf.mxu1 }
 0x206   : > { %v1181_v59 = vpop.f32.mrf.mxu0  ;;  %v1091_v5 = vadd.f32 %v1090_v57, %v998_v40 }
 0x207   : > { %v1192_v62 = vmul.f32 %v1315_v48, %v1188_v53  ;;  %v1189_v63 = vadd.f32 %v1181_v59, %v1087_v52 }
 0x208   : > { %v1183_v3 = vpop.f32.mrf.mxu0 }
 0x209   : > { %v1193_v13 = vmul.f32 %v1316_v58, %v1189_v63  ;;  %v1190_v14 = vadd.f32 %v1183_v3, %v1089_v61  ;;  %v1196_v15 = vadd.f32 %v1192_v62, %v899_v60 }
 0x20a   : > { %v1185_v16 = vpop.f32.mrf.mxu0 }
 0x20b   : > { %v1194_v17 = vmul.f32 %v1315_v48, %v1190_v14  ;;  %v1197_v18 = vadd.f32 %v1193_v13, %v900_v1  ;;  %v1212_v19 = vmul.f32 %v1205_v4, %v1196_v15  ;;  %v1191_v20 = vadd.f32 %v1185_v16, %v1091_v5 }
 0x20d   : > { %v1198_v21 = vadd.f32 %v1194_v17, %v901_v6  ;;  %v1213_v22 = vmul.f32 %v1205_v4, %v1197_v18  ;;  %v1195_v10 = vmul.f32 %v1316_v58, %v1191_v20  ;;  %v1228_v11 = vadd.f32 %v1221_v7, %v1212_v19 }
 0x20f   : > { %v1214_v23 = vmul.f32 %v1210_v50, %v1198_v21  ;;  %v1229_v24 = vadd.f32 %v1221_v7, %v1213_v22  ;;  %v1199_v25 = vadd.f32 %v1195_v10, %v902_v8  ;;  %v1232_v27 = vmax.f32 %v1228_v11, 0.0 }
 0x211   : > { %v1233_v28 = vmax.f32 %v1229_v24, 0.0  ;;  %v1215_v29 = vmul.f32 %v1210_v50, %v1199_v25  ;;  %v1230_v30 = vadd.f32 %v1226_v26, %v1214_v23 }
 0x213   : > { %v1376_v12 = vpack.c.bf16 %v1233_v28, %v1232_v27  ;;  %v1231_v31 = vadd.f32 %v1226_v26, %v1215_v29  ;;  %v1234_v32 = vmax.f32 %v1230_v30, 0.0 }
 0x215   : > { %1248 = vst [vmem:[%s197_s8] sm:$0xff] %v1376_v12  ;;  %v1235_v33 = vmax.f32 %v1231_v31, 0.0 }
 0x217   : > { %v1377_v34 = vpack.c.bf16 %v1235_v33, %v1234_v32 }
 0x219   : > { %1249 = vst [vmem:[%s197_s8 + $0x8] sm:$0xff] %v1377_v34 }
 0x21a PF: > { %s14_s15 = sadd.s32 1, %s1430_s15  }
 0x21b   : > { %p11_p4 = scmp.ge.s32.totalorder %s14_s15, 4  }
 0x21d   :  { %13 = sbr.rel (!%p11_p4) target bundleno = 1 (0x1), region = 74 }

// kernel: danet_head_forward.4
= control target key start
LH: loop header
LB: loop body
LE: loop exit
PB: predicated region body
PF: predicated region fallthrough
CT: control target
= control target key end

     0   :  { %s1968_s26 = smov 0   ;;  %s1970_s27 = smov 0   ;;  %s2665_s0 = inlined_call_operand.vmem [shape: bf16[2,16,256], index: 0, kind: input, shape index: {}, may-alias: {0,1}]   ;;  %s2666_s1 = inlined_call_operand.vmem [shape: bf16[2,16,256], index: 1, kind: input, shape index: {}, may-alias: {0,1}]   ;;  %s2667_s2 = inlined_call_operand.vmem [shape: bf16[2,16], index: 2, kind: input, shape index: {}]   ;;  %s2668_s3 = inlined_call_operand.vmem [shape: f32[2,1], index: 3, kind: input, shape index: {}]   ;;  %s2669_s4 = inlined_call_operand.vmem [shape: bf16[18,16], index: 4, kind: input, shape index: {}]   ;;  %s2670_s5 = inlined_call_operand.vmem [shape: f32[18,1], index: 5, kind: input, shape index: {}]   ;;  %s2671_s6 = inlined_call_operand.<no memory space> [shape: f32[1,1], index: 6, kind: input, shape index: {}]   ;;  %s2672_s7 = inlined_call_operand.vmem [shape: bf16[2,16,256], index: 7, kind: output, shape index: {}]  }
   0x1   :  { %v12_v0 = vstv %s2671_s6  ;;  %s1972_s28 = smov 0  }
   0x2   :  { %13 = vst [vmem:[#allocation6] sm:$0x1] %v12_v0 }
   0x3 LB: > { %s38_s6 = sadd.s32 1, %s1915_s27  ;;  %p1665_p0 = scmp.ge.s32.totalorder %s1919_s28, 1  ;;  %s1919_s28 = sphi %s1972_s28, %s19_s28   ;;  %s1915_s27 = sphi %s1970_s27, %s2768_s27   ;;  %s1911_s26 = sphi %s1968_s26, %s2767_s26  }
   0x4   : > { %p40_p1 = scmp.ge.s32.totalorder %s38_s6, 2  ;;  %p284_p2 = scmp.lt.s32.totalorder %s1919_s28, 3 }
   0x6   : > { %s2770_s6 = smov (%p40_p1, %s38_s6), 0  ;;  %p285_p3 = pnand %p1665_p0, %p284_p2 }
   0x8   : > { %288 = sbr.rel (%p285_p3) target bundleno = 1028 (0x404), region = 48 }
   0xd   : > { %p334_p4 = scmp.lt.s32.totalorder %s1911_s26, 1  ;;  %v1921_v1 = vmov 0   ;;  %v461_v2 = vld [vmem:[%s2670_s5 + $0x10] sm:$0x3]  ;;  %v371_v3 = vld [vmem:[%s2668_s3] sm:$0x3] }
   0xe   : > { %423 = vmatprep.mubr.bf16.mxu1 %v1921_v1  ;;  %1755 = vset.pattern.permute.xlu0 %v1921_v1  ;;  %v459_v9 = vld [vmem:[%s2670_s5] sm:$0xff]  ;;  %vm387_vm0 = vcmask 130048   ;;  %v460_v12 = vld [vmem:[%s2670_s5 + $0x8] sm:$0xff]  ;;  %v1922_v16 = vmov 0.0   ;;  %vm724_vm1 = vcmask 1041408   ;;  %vm627_vm2 = vcmask 15360  }
   0xf   : > { %s2772_s26 = smov (!%p334_p4, %s1911_s26), 1  ;;  %474 = vperm.xlu0 %1755, %v461_v2   ;;  %v368_v10 = vld [vmem:[%s2667_s2] sm:$0x1]  ;;  %v1717_v13 = vld [vmem:[#allocation6] ss:$0 sm:$0xff]  ;;  %793 = vmatprep.mubr.f32.mxu0 %v1922_v16 }
  0x10   : > { %s1989_s8 = sshll.u32 %s2772_s26, 4  ;;  %v1761_v14 = vld [vmem:[%s2669_s4] sm:$0xff]   ;;  %v1762_v15 = vld [vmem:[%s2669_s4 + $0x8] ss:$0 sps:$4 sm:$0x11]  }
  0x11   : > { %s1998_s13 = scalar_lea.vmem %s2665_s0, %s1989_s8  ;;  %s351_s16 = scalar_lea.vmem %s2666_s1, %s1989_s8 }
  0x12   : > { %v369_v4 = vld [vmem:[%s1998_s13] sm:$0xff]  ;;  %v370_v5 = vld [vmem:[%s1998_s13 + $0x8] sm:$0xff]  ;;  %s361_s9 = scalar_lea.vmem %s2672_s7, %s1989_s8 }
  0x13   : > { %v1673_v6 = vcombine.high %v369_v4, %v370_v5  ;;  %v1672_v7 = vcombine.low %v369_v4, %v370_v5  ;;  %374 = vperm.xlu0 %1755, %v371_v3   ;;  %v1760_v8 = vld [vmem:[%s351_s16 + $0x4] ss:$8 sps:$4 sm:$0xff]   ;;  %v1758_v11 = vld [vmem:[%s351_s16] ss:$8 sps:$4 sm:$0xff]  }
  0x15   : > { %405 = vmatprep.subr.bf16.mxu1 %v1673_v6 }
  0x16   : > { %406 = vmatpush1.bf16.msra.mxu1 %v1672_v7 }
  0x17   : > { %516 = vmatprep.subr.bf16.mxu1 %v1760_v8  ;;  %464 = vperm.xlu0 %1755, %v459_v9  }
  0x19   : > { %1674 = vmatmul.mubr.msk.bf16.vlgmr.msra.gmra.mxu1 %vm387_vm0, %v368_v10 }
  0x1a   : > { %517 = vmatpush1.bf16.msra.mxu1 %v1758_v11  ;;  %534 = vmatprep.mubr.bf16.mxu1 %v1921_v1 }
  0x1b   : > { %469 = vperm.xlu0 %1755, %v460_v12  }
  0x1f   : > { %1522 = vperm.xlu0 %1755, %v1717_v13  }
  0x21   : > { %1680 = vmatmul.mubr.msk.bf16.vlgmr.msra.gmra.mxu1 %vm387_vm0, %v1761_v14  ;;  %v2673_v14 = vlaneseq }
  0x22   : > { %544 = vmatprep.mubr.bf16.mxu1 %v1921_v1 }
  0x23   : > { %vm2109_vm3 = vcmp.lt.s32.totalorder %v2673_v14, 256 }
  0x24   : > { %449 = vst.msk [vmem:[#allocation4] sm:$0x3] %vm2109_vm3, %v1922_v16 }
  0x29   : > { %1681 = vmatmul.mubr.msk.bf16.gmra.mxu1 %vm387_vm0, %v1762_v15 }
  0x8a   : > { %v475_v17 = vpop.permute.xlu0 %474 }
  0x8e   : > { %v375_v19 = vpop.permute.xlu0 %374 }
  0x92   : > { %v2024_v27 = vpop.permute.xlu0 %464 }
  0x93   : > { %2704 = vst [vmem:[#allocation8_spill] sm:$0xff] %v2024_v27 }
  0xd9   : > { %v425_v18 = vpop.f32.mrf.mxu1 }
  0xda   : > { %v426_v21 = vadd.f32 %v425_v18, %v375_v19  ;;  %v1923_v18 = vmov -inf  }
  0xdb   : > { %v427_v20 = vpop.f32.mrf.mxu1  ;;  %448 = vst.msk [vmem:[#allocation3] sm:$0x3] %vm2109_vm3, %v1923_v18 }
  0xdc   : > { %v428_v22 = vadd.f32 %v427_v20, %v375_v19 }
  0xdd   : > { %v429_v23 = vpop.f32.mrf.mxu1 }
  0xde   : > { %v434_v24 = vcombine.low %v426_v21, %v428_v22 }
  0xdf   : > { %v430_v25 = vpop.f32.mrf.mxu1 }
  0xe0   : > { %1675 = vst.sshfl [vmem:[#allocation2] sm:$0x33 pattern:$0x76325410] %v434_v24 }
  0xe1   : > { %v2022_v26 = vpop.f32.mrf.mxu1 }
  0xe2   : > { %2703 = vst [vmem:[#allocation7_spill] sm:$0xff] %v2022_v26 }
  0xe3   : > { %v538_v28 = vpop.f32.mrf.mxu1 }
  0xe4   : > { %v539_v29 = vadd.f32 %v538_v28, %v2024_v27 }
  0xe5   : > { %v2027_v30 = vpop.f32.mrf.mxu1 }
  0xe6   : > { %2705 = vst [vmem:[#allocation9_spill] sm:$0xff] %v2027_v30  ;;  %1469 = vmatprep.mubr.f32.mxu1 %v539_v29 }
  0xe7   : > { %v2029_v31 = vpop.f32.mrf.mxu1  ;;  %v1682_v32 = vld.sshfl [vmem:[#allocation2] sm:$0x33 pattern:$0x76325410] }
  0xe8   : > { %2706 = vst [vmem:[#allocation10_spill] sm:$0xff] %v2029_v31  ;;  %v626_v33 = vcombine.high %v1682_v32, %v1682_v32 }
  0xe9   : > { %v546_v34 = vpop.f32.mrf.mxu1 }
  0xea   : > { %1683 = vmatprep.subr.msk.mxu0 %vm724_vm1, %v626_v33  ;;  %v547_v35 = vadd.f32 %v546_v34, %v475_v17 }
  0xeb   : > { %v548_v36 = vpop.f32.mrf.mxu1  ;;  %1684 = vmatpush1.msk.msra.mxu0 %vm724_vm1, %v1682_v32 }
  0xec   : > { %554 = vxpose.xlu1.b32.start.end [1/1] (short) %v547_v35, 128  ;;  %v549_v39 = vadd.f32 %v548_v36, %v475_v17 }
  0xed   : > { %v550_v37 = vpop.f32.mrf.mxu1  ;;  %v2764_v17 = vld [vmem:[#allocation9_spill] sm:$0xff] }
  0xef   : > { %v551_v38 = vpop.f32.mrf.mxu1 }
 0x129   : > { %586 = vxpose.xlu1.b32.start.end [1/1] (short) %v549_v39, 128 }
 0x168   : > { %v570_v40 = vpop.trf.xlu1 }
 0x169   : > { %1685 = vmatmul.mubr.msk.f32.vlgmr.msra.gmra.mxu0 %vm627_vm2, %v570_v40 }
 0x16a   : > { %799 = vmatprep.mubr.f32.mxu0 %v1922_v16 }
 0x16c   : > { %v571_v41 = vpop.trf.xlu1 }
 0x16d   : > { %1686 = vmatmul.mubr.msk.f32.gmra.mxu0 %vm627_vm2, %v571_v41 }
 0x16e   : > { %805 = vmatprep.mubr.f32.mxu0 %v1922_v16 }
 0x170   : > { %v572_v42 = vpop.trf.xlu1 }
 0x171   : > { %1687 = vmatmul.mubr.msk.f32.gmra.mxu0 %vm627_vm2, %v572_v42 }
 0x172   : > { %811 = vmatprep.mubr.f32.mxu0 %v1922_v16 }
 0x174   : > { %v573_v43 = vpop.trf.xlu1 }
 0x175   : > { %1688 = vmatmul.mubr.msk.f32.gmra.mxu0 %vm627_vm2, %v573_v43 }
 0x176   : > { %817 = vmatprep.mubr.f32.mxu0 %v1922_v16 }
 0x178   : > { %v574_v44 = vpop.trf.xlu1 }
 0x179   : > { %1689 = vmatmul.mubr.msk.f32.gmra.mxu0 %vm627_vm2, %v574_v44 }
 0x17a   : > { %823 = vmatprep.mubr.f32.mxu0 %v1922_v16 }
 0x17c   : > { %v575_v45 = vpop.trf.xlu1 }
 0x17d   : > { %1690 = vmatmul.mubr.msk.f32.gmra.mxu0 %vm627_vm2, %v575_v45 }
 0x17e   : > { %829 = vmatprep.mubr.f32.mxu0 %v1922_v16 }
 0x180   : > { %v576_v46 = vpop.trf.xlu1 }
 0x181   : > { %1691 = vmatmul.mubr.msk.f32.gmra.mxu0 %vm627_vm2, %v576_v46 }
 0x182   : > { %835 = vmatprep.mubr.f32.mxu0 %v1922_v16 }
 0x184   : > { %v577_v47 = vpop.trf.xlu1 }
 0x185   : > { %1692 = vmatmul.mubr.msk.f32.gmra.mxu0 %vm627_vm2, %v577_v47 }
 0x186   : > { %841 = vmatprep.mubr.f32.mxu0 %v1922_v16 }
 0x188   : > { %v578_v48 = vpop.trf.xlu1 }
 0x189   : > { %1693 = vmatmul.mubr.msk.f32.gmra.mxu0 %vm627_vm2, %v578_v48 }
 0x18a   : > { %847 = vmatprep.mubr.f32.mxu0 %v1922_v16 }
 0x18c   : > { %v579_v49 = vpop.trf.xlu1 }
 0x18d   : > { %1694 = vmatmul.mubr.msk.f32.gmra.mxu0 %vm627_vm2, %v579_v49 }
 0x18e   : > { %853 = vmatprep.mubr.f32.mxu0 %v1922_v16 }
 0x190   : > { %v580_v50 = vpop.trf.xlu1 }
 0x191   : > { %1695 = vmatmul.mubr.msk.f32.gmra.mxu0 %vm627_vm2, %v580_v50 }
 0x192   : > { %859 = vmatprep.mubr.f32.mxu0 %v1922_v16 }
 0x194   : > { %v581_v51 = vpop.trf.xlu1 }
 0x195   : > { %1696 = vmatmul.mubr.msk.f32.gmra.mxu0 %vm627_vm2, %v581_v51 }
 0x196   : > { %865 = vmatprep.mubr.f32.mxu0 %v1922_v16 }
 0x198   : > { %v582_v52 = vpop.trf.xlu1 }
 0x199   : > { %1697 = vmatmul.mubr.msk.f32.gmra.mxu0 %vm627_vm2, %v582_v52 }
 0x19a   : > { %871 = vmatprep.mubr.f32.mxu0 %v1922_v16 }
 0x19c   : > { %v583_v53 = vpop.trf.xlu1 }
 0x19d   : > { %1698 = vmatmul.mubr.msk.f32.gmra.mxu0 %vm627_vm2, %v583_v53 }
 0x19e   : > { %877 = vmatprep.mubr.f32.mxu0 %v1922_v16 }
 0x1a0   : > { %v584_v54 = vpop.trf.xlu1 }
 0x1a1   : > { %1699 = vmatmul.mubr.msk.f32.gmra.mxu0 %vm627_vm2, %v584_v54 }
 0x1a2   : > { %883 = vmatprep.mubr.f32.mxu0 %v1922_v16 }
 0x1a4   : > { %v585_v55 = vpop.trf.xlu1 }
 0x1a5   : > { %1700 = vmatmul.mubr.msk.f32.gmra.mxu0 %vm627_vm2, %v585_v55 }
 0x1a6   : > { %889 = vmatprep.mubr.f32.mxu0 %v1922_v16 }
 0x1a8   : > { %v602_v56 = vpop.trf.xlu1 }
 0x1a9   : > { %1701 = vmatmul.mubr.msk.f32.gmra.mxu0 %vm627_vm2, %v602_v56 }
 0x1aa   : > { %895 = vmatprep.mubr.f32.mxu0 %v1922_v16 }
 0x1ac   : > { %v603_v57 = vpop.trf.xlu1 }
 0x1ad   : > { %1702 = vmatmul.mubr.msk.f32.gmra.mxu0 %vm627_vm2, %v603_v57 }
 0x1ae   : > { %901 = vmatprep.mubr.f32.mxu0 %v1922_v16 }
 0x1b0   : > { %v604_v58 = vpop.trf.xlu1 }
 0x1b1   : > { %1703 = vmatmul.mubr.msk.f32.gmra.mxu0 %vm627_vm2, %v604_v58 }
 0x1b2   : > { %907 = vmatprep.mubr.f32.mxu0 %v1922_v16 }
 0x1b4   : > { %v605_v59 = vpop.trf.xlu1 }
 0x1b5   : > { %1704 = vmatmul.mubr.msk.f32.gmra.mxu0 %vm627_vm2, %v605_v59 }
 0x1b6   : > { %913 = vmatprep.mubr.f32.mxu0 %v1922_v16 }
 0x1b8   : > { %v606_v60 = vpop.trf.xlu1 }
 0x1b9   : > { %1705 = vmatmul.mubr.msk.f32.gmra.mxu0 %vm627_vm2, %v606_v60 }
 0x1ba   : > { %919 = vmatprep.mubr.f32.mxu0 %v1922_v16 }
 0x1bc   : > { %v607_v61 = vpop.trf.xlu1 }
 0x1bd   : > { %1706 = vmatmul.mubr.msk.f32.gmra.mxu0 %vm627_vm2, %v607_v61 }
 0x1be   : > { %925 = vmatprep.mubr.f32.mxu0 %v1922_v16 }
 0x1c0   : > { %v608_v62 = vpop.trf.xlu1 }
 0x1c1   : > { %1707 = vmatmul.mubr.msk.f32.gmra.mxu0 %vm627_vm2, %v608_v62 }
 0x1c2   : > { %931 = vmatprep.mubr.f32.mxu0 %v1922_v16 }
 0x1c4   : > { %v609_v63 = vpop.trf.xlu1 }
 0x1c5   : > { %1708 = vmatmul.mubr.msk.f32.gmra.mxu0 %vm627_vm2, %v609_v63 }
 0x1c6   : > { %937 = vmatprep.mubr.f32.mxu0 %v1922_v16 }
 0x1c8   : > { %v610_v0 = vpop.trf.xlu1 }
 0x1c9   : > { %1709 = vmatmul.mubr.msk.f32.gmra.mxu0 %vm627_vm2, %v610_v0 }
 0x1ca   : > { %943 = vmatprep.mubr.f32.mxu0 %v1922_v16 }
 0x1cc   : > { %v611_v1 = vpop.trf.xlu1 }
 0x1cd   : > { %1710 = vmatmul.mubr.msk.f32.gmra.mxu0 %vm627_vm2, %v611_v1 }
 0x1ce   : > { %949 = vmatprep.mubr.f32.mxu0 %v1922_v16 }
 0x1d0   : > { %v612_v2 = vpop.trf.xlu1 }
 0x1d1   : > { %1711 = vmatmul.mubr.msk.f32.gmra.mxu0 %vm627_vm2, %v612_v2 }
 0x1d2   : > { %955 = vmatprep.mubr.f32.mxu0 %v1922_v16 }
 0x1d4   : > { %v613_v3 = vpop.trf.xlu1 }
 0x1d5   : > { %1712 = vmatmul.mubr.msk.f32.gmra.mxu0 %vm627_vm2, %v613_v3 }
 0x1d6   : > { %961 = vmatprep.mubr.f32.mxu0 %v1922_v16 }
 0x1d8   : > { %v614_v4 = vpop.trf.xlu1 }
 0x1d9   : > { %1713 = vmatmul.mubr.msk.f32.gmra.mxu0 %vm627_vm2, %v614_v4 }
 0x1da   : > { %967 = vmatprep.mubr.f32.mxu0 %v1922_v16 }
 0x1dc   : > { %v615_v5 = vpop.trf.xlu1 }
 0x1dd   : > { %1714 = vmatmul.mubr.msk.f32.gmra.mxu0 %vm627_vm2, %v615_v5 }
 0x1de   : > { %973 = vmatprep.mubr.f32.mxu0 %v1922_v16 }
 0x1e0   : > { %v616_v6 = vpop.trf.xlu1 }
 0x1e1   : > { %1715 = vmatmul.mubr.msk.f32.gmra.mxu0 %vm627_vm2, %v616_v6 }
 0x1e2   : > { %979 = vmatprep.mubr.f32.mxu0 %v1922_v16 }
 0x1e4   : > { %v617_v7 = vpop.trf.xlu1 }
 0x1e5   : > { %1716 = vmatmul.mubr.msk.f32.gmra.mxu0 %vm627_vm2, %v617_v7 }
 0x229   : > { %v2094_v8 = vpop.f32.mrf.mxu0 }
 0x22b   : > { %v2096_v9 = vpop.f32.mrf.mxu0 }
 0x22d   : > { %v2098_v10 = vpop.f32.mrf.mxu0 }
 0x22f   : > { %v2100_v11 = vpop.f32.mrf.mxu0 }
 0x231   : > { %v2102_v12 = vpop.f32.mrf.mxu0 }
 0x232   : > { %v987_v0 = vmax.f32 %v2094_v8, %v2102_v12 }
 0x233   : > { %v2104_v13 = vpop.f32.mrf.mxu0 }
 0x234   : > { %v1024_v3 = vmax.f32 %v2096_v9, %v2104_v13 }
 0x235   : > { %v2106_v15 = vpop.f32.mrf.mxu0 }
 0x236   : > { %v988_v1 = vmax.f32 %v2098_v10, %v2106_v15 }
 0x237   : > { %v2118_v19 = vpop.f32.mrf.mxu0 }
 0x238   : > { %2709 = vst [vmem:[#allocation11_spill] sm:$0xff] %v2118_v19  ;;  %v1025_v4 = vmax.f32 %v2100_v11, %v2118_v19 }
 0x239   : > { %v2120_v20 = vpop.f32.mrf.mxu0 }
 0x23a   : > { %v989_v5 = vmax.f32 %v987_v0, %v2120_v20 }
 0x23b   : > { %v2122_v21 = vpop.f32.mrf.mxu0 }
 0x23c   : > { %v1026_v18 = vmax.f32 %v1024_v3, %v2122_v21 }
 0x23d   : > { %v2124_v22 = vpop.f32.mrf.mxu0 }
 0x23e   : > { %2710 = vst [vmem:[#allocation12_spill] sm:$0xff] %v2124_v22  ;;  %v990_v6 = vmax.f32 %v988_v1, %v2124_v22 }
 0x23f   : > { %v2126_v23 = vpop.f32.mrf.mxu0 }
 0x240   : > { %v1027_v14 = vmax.f32 %v1025_v4, %v2126_v23 }
 0x241   : > { %v2128_v24 = vpop.f32.mrf.mxu0 }
 0x242   : > { %v991_v30 = vmax.f32 %v989_v5, %v2128_v24 }
 0x243   : > { %v2130_v25 = vpop.f32.mrf.mxu0 }
 0x244   : > { %v1028_v27 = vmax.f32 %v1026_v18, %v2130_v25 }
 0x245   : > { %v2132_v28 = vpop.f32.mrf.mxu0 }
 0x246   : > { %2711 = vst [vmem:[#allocation13_spill] sm:$0xff] %v2132_v28  ;;  %v992_v31 = vmax.f32 %v990_v6, %v2132_v28 }
 0x247   : > { %v2134_v29 = vpop.f32.mrf.mxu0 }
 0x248   : > { %v1029_v19 = vmax.f32 %v1027_v14, %v2134_v29 }
 0x249   : > { %v2136_v32 = vpop.f32.mrf.mxu0 }
 0x24a   : > { %v993_v0 = vmax.f32 %v991_v30, %v2136_v32 }
 0x24b   : > { %v2138_v16 = vpop.f32.mrf.mxu0 }
 0x24c   : > { %v1030_v3 = vmax.f32 %v1028_v27, %v2138_v16 }
 0x24d   : > { %v2140_v33 = vpop.f32.mrf.mxu0 }
 0x24e   : > { %2712 = vst [vmem:[#allocation14_spill] sm:$0xff] %v2140_v33  ;;  %v994_v1 = vmax.f32 %v992_v31, %v2140_v33 }
 0x24f   : > { %v2142_v34 = vpop.f32.mrf.mxu0 }
 0x250   : > { %v1031_v4 = vmax.f32 %v1029_v19, %v2142_v34 }
 0x251   : > { %v2144_v35 = vpop.f32.mrf.mxu0 }
 0x252   : > { %v995_v5 = vmax.f32 %v993_v0, %v2144_v35 }
 0x253   : > { %v2146_v36 = vpop.f32.mrf.mxu0 }
 0x254   : > { %v1032_v18 = vmax.f32 %v1030_v3, %v2146_v36 }
 0x255   : > { %v2148_v37 = vpop.f32.mrf.mxu0 }
 0x256   : > { %2713 = vst [vmem:[#allocation15_spill] sm:$0xff] %v2148_v37  ;;  %v996_v6 = vmax.f32 %v994_v1, %v2148_v37 }
 0x257   : > { %v2150_v38 = vpop.f32.mrf.mxu0 }
 0x258   : > { %v1033_v14 = vmax.f32 %v1031_v4, %v2150_v38 }
 0x259   : > { %v2152_v39 = vpop.f32.mrf.mxu0 }
 0x25a   : > { %v997_v30 = vmax.f32 %v995_v5, %v2152_v39 }
 0x25b   : > { %v2154_v40 = vpop.f32.mrf.mxu0 }
 0x25c   : > { %v1034_v27 = vmax.f32 %v1032_v18, %v2154_v40 }
 0x25d   : > { %v2156_v41 = vpop.f32.mrf.mxu0 }
 0x25e   : > { %2714 = vst [vmem:[#allocation16_spill] sm:$0xff] %v2156_v41  ;;  %v998_v31 = vmax.f32 %v996_v6, %v2156_v41 }
 0x25f   : > { %v2158_v42 = vpop.f32.mrf.mxu0 }
 0x260   : > { %v1035_v19 = vmax.f32 %v1033_v14, %v2158_v42 }
 0x261   : > { %v2160_v43 = vpop.f32.mrf.mxu0 }
 0x262   : > { %v999_v0 = vmax.f32 %v997_v30, %v2160_v43 }
 0x263   : > { %v2162_v44 = vpop.f32.mrf.mxu0 }
 0x264   : > { %v1036_v3 = vmax.f32 %v1034_v27, %v2162_v44 }
 0x265   : > { %v2164_v45 = vpop.f32.mrf.mxu0 }
 0x266   : > { %2715 = vst [vmem:[#allocation17_spill] sm:$0xff] %v2164_v45  ;;  %v1000_v1 = vmax.f32 %v998_v31, %v2164_v45 }
 0x267   : > { %v2166_v46 = vpop.f32.mrf.mxu0 }
 0x268   : > { %v1037_v4 = vmax.f32 %v1035_v19, %v2166_v46 }
 0x269   : > { %v2168_v47 = vpop.f32.mrf.mxu0 }
 0x26a   : > { %v1001_v5 = vmax.f32 %v999_v0, %v2168_v47 }
 0x26b   : > { %v2170_v48 = vpop.f32.mrf.mxu0 }
 0x26c   : > { %v1038_v18 = vmax.f32 %v1036_v3, %v2170_v48 }
 0x26d   : > { %v2172_v49 = vpop.f32.mrf.mxu0 }
 0x26e   : > { %2716 = vst [vmem:[#allocation18_spill] sm:$0xff] %v2172_v49  ;;  %v1002_v6 = vmax.f32 %v1000_v1, %v2172_v49 }
 0x26f   : > { %v2174_v50 = vpop.f32.mrf.mxu0 }
 0x270   : > { %v1039_v14 = vmax.f32 %v1037_v4, %v2174_v50 }
 0x271   : > { %v2176_v51 = vpop.f32.mrf.mxu0 }
 0x272   : > { %v1003_v30 = vmax.f32 %v1001_v5, %v2176_v51 }
 0x273   : > { %v2178_v52 = vpop.f32.mrf.mxu0 }
 0x274   : > { %v1040_v27 = vmax.f32 %v1038_v18, %v2178_v52 }
 0x275   : > { %v2180_v53 = vpop.f32.mrf.mxu0 }
 0x276   : > { %2717 = vst [vmem:[#allocation19_spill] sm:$0xff] %v2180_v53  ;;  %v1004_v31 = vmax.f32 %v1002_v6, %v2180_v53 }
 0x277   : > { %v2182_v54 = vpop.f32.mrf.mxu0 }
 0x278   : > { %v1041_v19 = vmax.f32 %v1039_v14, %v2182_v54 }
 0x279   : > { %v2184_v55 = vpop.f32.mrf.mxu0 }
 0x27a   : > { %v1005_v0 = vmax.f32 %v1003_v30, %v2184_v55 }
 0x27b   : > { %v2186_v56 = vpop.f32.mrf.mxu0 }
 0x27c   : > { %v1042_v3 = vmax.f32 %v1040_v27, %v2186_v56 }
 0x27d   : > { %v2188_v57 = vpop.f32.mrf.mxu0 }
 0x27e   : > { %2718 = vst [vmem:[#allocation20_spill] sm:$0xff] %v2188_v57  ;;  %v1006_v1 = vmax.f32 %v1004_v31, %v2188_v57 }
 0x27f   : > { %v2190_v58 = vpop.f32.mrf.mxu0 }
 0x280   : > { %v1043_v4 = vmax.f32 %v1041_v19, %v2190_v58 }
 0x281   : > { %v2192_v59 = vpop.f32.mrf.mxu0 }
 0x282   : > { %v1007_v5 = vmax.f32 %v1005_v0, %v2192_v59 }
 0x283   : > { %v2194_v60 = vpop.f32.mrf.mxu0 }
 0x284   : > { %v1044_v18 = vmax.f32 %v1042_v3, %v2194_v60 }
 0x285   : > { %v2196_v61 = vpop.f32.mrf.mxu0 }
 0x286   : > { %2719 = vst [vmem:[#allocation21_spill] sm:$0xff] %v2196_v61  ;;  %v1008_v6 = vmax.f32 %v1006_v1, %v2196_v61 }
 0x287   : > { %v2198_v62 = vpop.f32.mrf.mxu0 }
 0x288   : > { %v1045_v14 = vmax.f32 %v1043_v4, %v2198_v62 }
 0x289   : > { %v2200_v63 = vpop.f32.mrf.mxu0 }
 0x28a   : > { %v1009_v30 = vmax.f32 %v1007_v5, %v2200_v63 }
 0x28b   : > { %v2206_v2 = vpop.f32.mrf.mxu0 }
 0x28c   : > { %2720 = vst [vmem:[#allocation22_spill] sm:$0xff] %v2206_v2  ;;  %v1046_v27 = vmax.f32 %v1044_v18, %v2206_v2 }
 0x28d   : > { %v2214_v7 = vpop.f32.mrf.mxu0 }
 0x28e   : > { %2721 = vst [vmem:[#allocation23_spill] sm:$0xff] %v2214_v7  ;;  %v1010_v31 = vmax.f32 %v1008_v6, %v2214_v7 }
 0x28f   : > { %v2220_v26 = vpop.f32.mrf.mxu0 }
 0x290   : > { %2722 = vst [vmem:[#allocation24_spill] sm:$0xff] %v2220_v26  ;;  %v1047_v19 = vmax.f32 %v1045_v14, %v2220_v26 }
 0x291   : > { %v2226_v22 = vpop.f32.mrf.mxu0 }
 0x292   : > { %2723 = vst [vmem:[#allocation25_spill] sm:$0xff] %v2226_v22  ;;  %v1011_v0 = vmax.f32 %v1009_v30, %v2226_v22 }
 0x293   : > { %v2232_v28 = vpop.f32.mrf.mxu0 }
 0x294   : > { %2724 = vst [vmem:[#allocation26_spill] sm:$0xff] %v2232_v28  ;;  %v1048_v3 = vmax.f32 %v1046_v27, %v2232_v28 }
 0x295   : > { %v2238_v33 = vpop.f32.mrf.mxu0 }
 0x296   : > { %2725 = vst [vmem:[#allocation27_spill] sm:$0xff] %v2238_v33  ;;  %v1012_v1 = vmax.f32 %v1010_v31, %v2238_v33 }
 0x297   : > { %v2244_v37 = vpop.f32.mrf.mxu0 }
 0x298   : > { %2726 = vst [vmem:[#allocation28_spill] sm:$0xff] %v2244_v37  ;;  %v1049_v4 = vmax.f32 %v1047_v19, %v2244_v37 }
 0x299   : > { %v2250_v41 = vpop.f32.mrf.mxu0 }
 0x29a   : > { %2727 = vst [vmem:[#allocation29_spill] sm:$0xff] %v2250_v41  ;;  %v1013_v5 = vmax.f32 %v1011_v0, %v2250_v41 }
 0x29b   : > { %v2256_v45 = vpop.f32.mrf.mxu0 }
 0x29c   : > { %2728 = vst [vmem:[#allocation30_spill] sm:$0xff] %v2256_v45  ;;  %v1050_v18 = vmax.f32 %v1048_v3, %v2256_v45  ;;  %v1924_v3 = vmov 1966171168  }
 0x29d   : > { %v2262_v49 = vpop.f32.mrf.mxu0  ;;  %v1065_v45 = vunpack.c.l.s4 %v1924_v3 }
 0x29e   : > { %2729 = vst [vmem:[#allocation31_spill] sm:$0xff] %v2262_v49  ;;  %v1014_v6 = vmax.f32 %v1012_v1, %v2262_v49 }
 0x29f   : > { %v2268_v53 = vpop.f32.mrf.mxu0 }
 0x2a0   : > { %2730 = vst [vmem:[#allocation32_spill] sm:$0xff] %v2268_v53  ;;  %v1051_v14 = vmax.f32 %v1049_v4, %v2268_v53 }
 0x2a1   : > { %v2274_v57 = vpop.f32.mrf.mxu0 }
 0x2a2   : > { %2731 = vst [vmem:[#allocation33_spill] sm:$0xff] %v2274_v57  ;;  %v1015_v30 = vmax.f32 %v1013_v5, %v2274_v57 }
 0x2a3   : > { %v2280_v61 = vpop.f32.mrf.mxu0 }
 0x2a4   : > { %v1052_v27 = vmax.f32 %v1050_v18, %v2280_v61 }
 0x2a5   : > { %v2286_v7 = vpop.f32.mrf.mxu0 }
 0x2a6   : > { %2732 = vst [vmem:[#allocation34_spill] sm:$0xff] %v2286_v7  ;;  %v1016_v31 = vmax.f32 %v1014_v6, %v2286_v7  ;;  %v1066_v6 = vunpack.c.0.s8 %v1065_v45  ;;  %v2733_v7 = vlaneseq }
 0x2a7   : > { %v2292_v33 = vpop.f32.mrf.mxu0 }
 0x2a8   : > { %v1017_v28 = vmax.f32 %v1015_v30, %v1016_v31  ;;  %v1053_v19 = vmax.f32 %v1051_v14, %v2292_v33  ;;  %v1068_v26 = vshrl.u32 %v2733_v7, 7 }
 0x2aa   : > { %v1018_v0 = vrot.slane %v1017_v28, 4  ;;  %v1054_v41 = vmax.f32 %v1052_v27, %v1053_v19  ;;  %v2297_v31 = vsub.s32 %v1066_v6, %v1068_v26  ;;  %v2300_v27 = vld [vmem:[#allocation3] sm:$0x3]  ;;  %v2311_v45 = vsub.s32 0, %v1068_v26 }
 0x2ac   : > { %v1019_v1 = vmax.f32 %v1017_v28, %v1018_v0  ;;  %v1055_v49 = vrot.slane %v1054_v41, 4  ;;  %2734 = vst [vmem:[#allocation35_spill] sm:$0xff] %v2311_v45 }
 0x2ae   : > { %v1020_v37 = vrot.slane %v1019_v1, 2  ;;  %v1056_v22 = vmax.f32 %v1054_v41, %v1055_v49  ;;  %v2313_v49 = vsub.s32 1, %v1068_v26 }
 0x2b0   : > { %v1021_v4 = vmax.f32 %v1019_v1, %v1020_v37  ;;  %v1057_v53 = vrot.slane %v1056_v22, 2  ;;  %2735 = vst [vmem:[#allocation36_spill] sm:$0xff] %v2313_v49 }
 0x2b2   : > { %v1022_v5 = vrot.slane %v1021_v4, 1  ;;  %v1058_v57 = vmax.f32 %v1056_v22, %v1057_v53 }
 0x2b4   : > { %v1059_v2 = vrot.slane %v1058_v57, 1  ;;  %v1023_v18 = vmax.f32 %v1021_v4, %v1022_v5 }
 0x2b6   : > { %v1060_v30 = vmax.f32 %v1058_v57, %v1059_v2 }
 0x2b8   : > { %v1063_v14 = vcombine.low %v1023_v18, %v1060_v30  ;;  %v2737_v30 = vld [vmem:[#allocation12_spill] sm:$0xff] }
 0x2ba   : > { %v1070_v28 = vrot.slane %v1063_v14, %v2297_v31 }
 0x2bc   : > { %v1077_v41 = vrot.slane %v1070_v28, %v2297_v31 }
 0x2be   : > { %v2304_v37 = vmax.f32 %v2300_v27, %v1077_v41 }
 0x2c0   : > { %1490 = vst.msk [vmem:[#allocation3] sm:$0x3] %vm2109_vm3, %v2304_v37  ;;  %v2317_v53 = vrot.slane %v2304_v37, %v2311_v45  ;;  %v2321_v57 = vrot.slane %v2304_v37, %v2313_v49 }
 0x2c2   : > { %v1094_v2 = vsub.f32 %v2094_v8, %v2317_v53  ;;  %v1095_v7 = vsub.f32 %v2096_v9, %v2321_v57  ;;  %v1096_v19 = vsub.f32 %v2098_v10, %v2317_v53  ;;  %v1097_v26 = vsub.f32 %v2100_v11, %v2321_v57  ;;  %v2736_v9 = vld [vmem:[#allocation11_spill] sm:$0xff] }
 0x2c3   : > { %v1098_v0 = vsub.f32 %v2102_v12, %v2317_v53  ;;  %v1099_v1 = vsub.f32 %v2104_v13, %v2321_v57  ;;  %v1100_v8 = vsub.f32 %v2106_v15, %v2317_v53  ;;  %v1101_v6 = vsub.f32 %v2736_v9, %v2321_v57 }
 0x2c4   : > { %v1158_v3 = vmul.f32 1.442695, %v1094_v2  ;;  %v1160_v4 = vmul.f32 1.442695, %v1095_v7  ;;  %v1162_v5 = vmul.f32 1.442695, %v1096_v19  ;;  %v1102_v10 = vsub.f32 %v2120_v20, %v2317_v53 }
 0x2c5   : > { %v1164_v18 = vmul.f32 1.442695, %v1097_v26  ;;  %v1166_v11 = vmul.f32 1.442695, %v1098_v0  ;;  %v1103_v12 = vsub.f32 %v2122_v21, %v2321_v57  ;;  %v1168_v13 = vmul.f32 1.442695, %v1099_v1 }
 0x2c6   : > { %1763 = vpow2.f32 %v1158_v3  ;;  %v1104_v14 = vsub.f32 %v2737_v30, %v2317_v53  ;;  %v1170_v15 = vmul.f32 1.442695, %v1100_v8  ;;  %v1105_v28 = vsub.f32 %v2126_v23, %v2321_v57  ;;  %v2738_v19 = vld [vmem:[#allocation13_spill] sm:$0xff]  ;;  %v2739_v8 = vld [vmem:[#allocation14_spill] sm:$0xff] }
 0x2c7   : > { %1765 = vpow2.f32 %v1160_v4  ;;  %v1172_v41 = vmul.f32 1.442695, %v1101_v6  ;;  %v1106_v20 = vsub.f32 %v2128_v24, %v2317_v53  ;;  %v1174_v2 = vmul.f32 1.442695, %v1102_v10 }
 0x2c8   : > { %1767 = vpow2.f32 %v1162_v5  ;;  %v1107_v21 = vsub.f32 %v2130_v25, %v2321_v57  ;;  %v1176_v7 = vmul.f32 1.442695, %v1103_v12  ;;  %v1108_v26 = vsub.f32 %v2738_v19, %v2317_v53 }
 0x2c9   : > { %1769 = vpow2.f32 %v1164_v18  ;;  %v1178_v0 = vmul.f32 1.442695, %v1104_v14  ;;  %v1109_v23 = vsub.f32 %v2134_v29, %v2321_v57  ;;  %v1180_v1 = vmul.f32 1.442695, %v1105_v28 }
 0x2ca   : > { %1771 = vpow2.f32 %v1166_v11  ;;  %v1110_v24 = vsub.f32 %v2136_v32, %v2317_v53  ;;  %v1182_v3 = vmul.f32 1.442695, %v1106_v20  ;;  %v1111_v25 = vsub.f32 %v2138_v16, %v2321_v57 }
 0x2cb   : > { %1773 = vpow2.f32 %v1168_v13  ;;  %v1184_v4 = vmul.f32 1.442695, %v1107_v21  ;;  %v1112_v5 = vsub.f32 %v2739_v8, %v2317_v53  ;;  %v1186_v9 = vmul.f32 1.442695, %v1108_v26  ;;  %v2740_v13 = vld [vmem:[#allocation15_spill] sm:$0xff] }
 0x2cc   : > { %1775 = vpow2.f32 %v1170_v15  ;;  %v1113_v29 = vsub.f32 %v2142_v34, %v2321_v57  ;;  %v1188_v6 = vmul.f32 1.442695, %v1109_v23  ;;  %v1114_v32 = vsub.f32 %v2144_v35, %v2317_v53 }
 0x2cd   : > { %1777 = vpow2.f32 %v1172_v41  ;;  %v1190_v18 = vmul.f32 1.442695, %v1110_v24  ;;  %v1115_v16 = vsub.f32 %v2146_v36, %v2321_v57  ;;  %v1192_v11 = vmul.f32 1.442695, %v1111_v25 }
 0x2ce   : > { %1779 = vpow2.f32 %v1174_v2  ;;  %v1116_v30 = vsub.f32 %v2740_v13, %v2317_v53  ;;  %v1194_v34 = vmul.f32 1.442695, %v1112_v5  ;;  %v1117_v35 = vsub.f32 %v2150_v38, %v2321_v57  ;;  %v2741_v38 = vld [vmem:[#allocation16_spill] sm:$0xff]  ;;  %v2742_v5 = vld [vmem:[#allocation17_spill] sm:$0xff] }
 0x2cf   : > { %1781 = vpow2.f32 %v1176_v7  ;;  %v1196_v15 = vmul.f32 1.442695, %v1113_v29  ;;  %v1118_v36 = vsub.f32 %v2152_v39, %v2317_v53  ;;  %v1198_v41 = vmul.f32 1.442695, %v1114_v32 }
 0x2d0   : > { %1783 = vpow2.f32 %v1178_v0  ;;  %v1119_v2 = vsub.f32 %v2154_v40, %v2321_v57  ;;  %v1200_v21 = vmul.f32 1.442695, %v1115_v16  ;;  %v1120_v19 = vsub.f32 %v2741_v38, %v2317_v53  ;;  %v2743_v38 = vld [vmem:[#allocation18_spill] sm:$0xff] }
 0x2d1   : > { %1785 = vpow2.f32 %v1180_v1  ;;  %v1202_v26 = vmul.f32 1.442695, %v1116_v30  ;;  %v1121_v23 = vsub.f32 %v2158_v42, %v2321_v57  ;;  %v1204_v1 = vmul.f32 1.442695, %v1117_v35 }
 0x2d2   : > { %1787 = vpow2.f32 %v1182_v3  ;;  %v1122_v3 = vsub.f32 %v2160_v43, %v2317_v53  ;;  %v1206_v25 = vmul.f32 1.442695, %v1118_v36  ;;  %v1208_v42 = vmul.f32 1.442695, %v1119_v2 }
 0x2d3   : > { %v2365_v10 = vpop.eup %1763  ;;  %1789 = vpow2.f32 %v1184_v4  ;;  %v1125_v32 = vsub.f32 %v2166_v46, %v2321_v57  ;;  %v1210_v43 = vmul.f32 1.442695, %v1120_v19  ;;  %v1212_v13 = vmul.f32 1.442695, %v1121_v23 }
 0x2d4   : > { %v2369_v12 = vpop.eup %1765  ;;  %1791 = vpow2.f32 %v1186_v9  ;;  %v1124_v9 = vsub.f32 %v2742_v5, %v2317_v53  ;;  %v1126_v35 = vsub.f32 %v2168_v47, %v2317_v53  ;;  %v1214_v46 = vmul.f32 1.442695, %v1122_v3 }
 0x2d5   : > { %v2373_v14 = vpop.eup %1767  ;;  %1793 = vpow2.f32 %v1188_v6  ;;  %v1128_v19 = vsub.f32 %v2743_v38, %v2317_v53  ;;  %v1220_v47 = vmul.f32 1.442695, %v1125_v32  ;;  %v1129_v23 = vsub.f32 %v2174_v50, %v2321_v57  ;;  %v2744_v32 = vld [vmem:[#allocation19_spill] sm:$0xff] }
 0x2d6   : > { %v2377_v28 = vpop.eup %1769  ;;  %1795 = vpow2.f32 %v1190_v18  ;;  %v1288_v0 = vadd.f32 %v2373_v14, %v2365_v10  ;;  %v1130_v3 = vsub.f32 %v2176_v51, %v2317_v53 }
 0x2d7   : > { %v2381_v20 = vpop.eup %1771  ;;  %1797 = vpow2.f32 %v1192_v11  ;;  %v1325_v40 = vadd.f32 %v2377_v28, %v2369_v12  ;;  %v1123_v11 = vsub.f32 %v2162_v44, %v2321_v57  ;;  %v1218_v44 = vmul.f32 1.442695, %v1124_v9 }
 0x2d8   : > { %v2385_v7 = vpop.eup %1773  ;;  %1799 = vpow2.f32 %v1194_v34  ;;  %v1289_v4 = vadd.f32 %v2381_v20, %v1288_v0  ;;  %v1131_v9 = vsub.f32 %v2178_v52, %v2321_v57  ;;  %v1226_v51 = vmul.f32 1.442695, %v1128_v19 }
 0x2d9   : > { %v2391_v39 = vpop.eup %1775  ;;  %1801 = vpow2.f32 %v1196_v15  ;;  %v1326_v29 = vadd.f32 %v2385_v7, %v1325_v40  ;;  %v1228_v52 = vmul.f32 1.442695, %v1129_v23 }
 0x2da   : > { %v2397_v24 = vpop.eup %1777  ;;  %1803 = vpow2.f32 %v1198_v41  ;;  %v1290_v18 = vadd.f32 %v2391_v39, %v1289_v4  ;;  %v1127_v41 = vsub.f32 %v2170_v48, %v2321_v57  ;;  %v1216_v48 = vmul.f32 1.442695, %v1123_v11 }
 0x2db   : > { %v2402_v8 = vpop.eup %1779  ;;  %1805 = vpow2.f32 %v1200_v21  ;;  %v1327_v30 = vadd.f32 %v2397_v24, %v1326_v29 }
 0x2dc   : > { %v2407_v6 = vpop.eup %1781  ;;  %1807 = vpow2.f32 %v1202_v26  ;;  %v1291_v15 = vadd.f32 %v2402_v8, %v1290_v18  ;;  %v1224_v50 = vmul.f32 1.442695, %v1127_v41 }
 0x2dd   : > { %v2412_v16 = vpop.eup %1783  ;;  %1809 = vpow2.f32 %v1204_v1  ;;  %v1328_v2 = vadd.f32 %v2407_v6, %v1327_v30 }
 0x2de   : > { %v2417_v34 = vpop.eup %1785  ;;  %1811 = vpow2.f32 %v1206_v25  ;;  %v1292_v26 = vadd.f32 %v2412_v16, %v1291_v15  ;;  %v1222_v25 = vmul.f32 1.442695, %v1126_v35  ;;  %v1230_v15 = vmul.f32 1.442695, %v1130_v3 }
 0x2df   : > { %v2422_v36 = vpop.eup %1787  ;;  %1813 = vpow2.f32 %v1208_v42  ;;  %v1329_v1 = vadd.f32 %v2417_v34, %v1328_v2  ;;  %v1135_v2 = vsub.f32 %v2186_v56, %v2321_v57 }
 0x2e0   : > { %v2427_v21 = vpop.eup %1789  ;;  %1815 = vpow2.f32 %v1210_v43  ;;  %v1293_v4 = vadd.f32 %v2422_v36, %v1292_v26  ;;  %v1132_v43 = vsub.f32 %v2744_v32, %v2317_v53  ;;  %v1139_v32 = vsub.f32 %v2194_v60, %v2321_v57 }
 0x2e1   : > { %v2432_v0 = vpop.eup %1791  ;;  %1817 = vpow2.f32 %v1212_v13  ;;  %v1330_v42 = vadd.f32 %v2427_v21, %v1329_v1  ;;  %v1133_v13 = vsub.f32 %v2182_v54, %v2321_v57  ;;  %v1232_v54 = vmul.f32 1.442695, %v1131_v9 }
 0x2e2   : > { %v2437_v40 = vpop.eup %1793  ;;  %1819 = vpow2.f32 %v1214_v46  ;;  %v1294_v18 = vadd.f32 %v2432_v0, %v1293_v4  ;;  %v1134_v46 = vsub.f32 %v2184_v55, %v2317_v53  ;;  %v1234_v55 = vmul.f32 1.442695, %v1132_v43 }
 0x2e3   : > { %v2442_v5 = vpop.eup %1795  ;;  %1821 = vpow2.f32 %v1218_v44  ;;  %v1331_v30 = vadd.f32 %v2437_v40, %v1330_v42  ;;  %v1137_v1 = vsub.f32 %v2190_v58, %v2321_v57  ;;  %v1236_v56 = vmul.f32 1.442695, %v1133_v13 }
 0x2e4   : > { %v2447_v29 = vpop.eup %1797  ;;  %1823 = vpow2.f32 %v1220_v47  ;;  %v1295_v41 = vadd.f32 %v2442_v5, %v1294_v18  ;;  %v2745_v47 = vld [vmem:[#allocation20_spill] sm:$0xff]  ;;  %v1138_v4 = vsub.f32 %v2192_v59, %v2317_v53  ;;  %v1238_v9 = vmul.f32 1.442695, %v1134_v46  ;;  %v2746_v18 = vld [vmem:[#allocation21_spill] sm:$0xff] }
 0x2e5   : > { %v2452_v11 = vpop.eup %1799  ;;  %1825 = vpow2.f32 %v1216_v48  ;;  %v1332_v38 = vadd.f32 %v2447_v29, %v1331_v30  ;;  %v1136_v26 = vsub.f32 %v2745_v47, %v2317_v53  ;;  %v1240_v58 = vmul.f32 1.442695, %v1135_v2 }
 0x2e6   : > { %v2457_v35 = vpop.eup %1801  ;;  %1827 = vpow2.f32 %v1222_v25  ;;  %v1296_v23 = vadd.f32 %v2452_v11, %v1295_v41  ;;  %v1140_v13 = vsub.f32 %v2746_v18, %v2317_v53  ;;  %v1141_v46 = vsub.f32 %v2198_v62, %v2321_v57 }
 0x2e7   : > { %v2462_v44 = vpop.eup %1803  ;;  %1829 = vpow2.f32 %v1224_v50  ;;  %v1333_v3 = vadd.f32 %v2457_v35, %v1332_v38  ;;  %v1242_v59 = vmul.f32 1.442695, %v1136_v26  ;;  %v1142_v2 = vsub.f32 %v2200_v63, %v2317_v53  ;;  %v2747_v26 = vld [vmem:[#allocation22_spill] sm:$0xff] }
 0x2e8   : > { %v2467_v19 = vpop.eup %1805  ;;  %1831 = vpow2.f32 %v1226_v51  ;;  %v1297_v50 = vadd.f32 %v2462_v44, %v1296_v23  ;;  %v1248_v23 = vmul.f32 1.442695, %v1139_v32  ;;  %v1252_v18 = vmul.f32 1.442695, %v1141_v46  ;;  %v2752_v46 = vld [vmem:[#allocation27_spill] sm:$0xff] }
 0x2e9   : > { %v2472_v48 = vpop.eup %1807  ;;  %1833 = vpow2.f32 %v1228_v52  ;;  %v1334_v43 = vadd.f32 %v2467_v19, %v1333_v3 }
 0x2ea   : > { %v2477_v25 = vpop.eup %1809  ;;  %1835 = vpow2.f32 %v1230_v15  ;;  %v1298_v52 = vadd.f32 %v2472_v48, %v1297_v50  ;;  %v1244_v15 = vmul.f32 1.442695, %v1137_v1  ;;  %v2748_v1 = vld [vmem:[#allocation23_spill] sm:$0xff]  ;;  %v1250_v50 = vmul.f32 1.442695, %v1140_v13  ;;  %v2751_v13 = vld [vmem:[#allocation26_spill] sm:$0xff] }
 0x2eb   : > { %v2482_v42 = vpop.eup %1811  ;;  %1837 = vpow2.f32 %v1232_v54  ;;  %v1335_v60 = vadd.f32 %v2477_v25, %v1334_v43  ;;  %v1246_v54 = vmul.f32 1.442695, %v1138_v4  ;;  %v1144_v3 = vsub.f32 %v2748_v1, %v2317_v53  ;;  %v2749_v4 = vld [vmem:[#allocation24_spill] sm:$0xff] }
 0x2ec   : > { %v2487_v51 = vpop.eup %1813  ;;  %1839 = vpow2.f32 %v1234_v55  ;;  %v1299_v38 = vadd.f32 %v2482_v42, %v1298_v52  ;;  %v1143_v55 = vsub.f32 %v2747_v26, %v2321_v57 }
 0x2ed   : > { %v1816_v30 = vpop.eup %1815  ;;  %1841 = vpow2.f32 %v1236_v56  ;;  %v1336_v62 = vadd.f32 %v2487_v51, %v1335_v60  ;;  %v1254_v60 = vmul.f32 1.442695, %v1142_v2 }
 0x2ee   : > { %v1818_v41 = vpop.eup %1817  ;;  %1843 = vpow2.f32 %v1238_v9  ;;  %v1300_v43 = vadd.f32 %v1816_v30, %v1299_v38  ;;  %v1145_v9 = vsub.f32 %v2749_v4, %v2321_v57  ;;  %v1256_v38 = vmul.f32 1.442695, %v1143_v55 }
 0x2ef   : > { %v1820_v47 = vpop.eup %1819  ;;  %1845 = vpow2.f32 %v1240_v58  ;;  %v1337_v52 = vadd.f32 %v1818_v41, %v1336_v62  ;;  %v2750_v58 = vld [vmem:[#allocation25_spill] sm:$0xff]  ;;  %v1148_v62 = vsub.f32 %v2752_v46, %v2317_v53  ;;  %v1258_v4 = vmul.f32 1.442695, %v1144_v3 }
 0x2f0   : > { %v1822_v56 = vpop.eup %1821  ;;  %1847 = vpow2.f32 %v1242_v59  ;;  %v1146_v32 = vsub.f32 %v2750_v58, %v2317_v53  ;;  %v1301_v26 = vadd.f32 %v1820_v47, %v1300_v43  ;;  %v1147_v59 = vsub.f32 %v2751_v13, %v2321_v57  ;;  %v2753_v43 = vld [vmem:[#allocation28_spill] sm:$0xff] }
 0x2f1   : > { %v1824_v63 = vpop.eup %1823  ;;  %1849 = vpow2.f32 %v1244_v15  ;;  %v1149_v58 = vsub.f32 %v2753_v43, %v2321_v57  ;;  %v1260_v13 = vmul.f32 1.442695, %v1145_v9  ;;  %v2756_v9 = vld [vmem:[#allocation31_spill] sm:$0xff] }
 0x2f2   : > { %v1826_v22 = vpop.eup %1825  ;;  %1851 = vpow2.f32 %v1246_v54  ;;  %1405 = vmatprep.subr.mxu1 %v1824_v63  ;;  %v1302_v54 = vadd.f32 %v1822_v56, %v1301_v26  ;;  %v1262_v46 = vmul.f32 1.442695, %v1146_v32  ;;  %v1152_v26 = vsub.f32 %v2756_v9, %v2317_v53 }
 0x2f3   : > { %v2507_v49 = vpop.eup %1827  ;;  %1853 = vpow2.f32 %v1248_v23  ;;  %v1338_v1 = vadd.f32 %v1826_v22, %v1337_v52  ;;  %1406 = vmatpush1.msra.mxu1 %v1822_v56  ;;  %v2754_v52 = vld [vmem:[#allocation29_spill] sm:$0xff]  ;;  %v2755_v56 = vld [vmem:[#allocation30_spill] sm:$0xff]  ;;  %v1266_v32 = vmul.f32 1.442695, %v1148_v62 }
 0x2f4   : > { %v2511_v15 = vpop.eup %1829  ;;  %1855 = vpow2.f32 %v1250_v50  ;;  %1407 = vmatprep.subr.mxu1 %v1826_v22  ;;  %v1150_v45 = vsub.f32 %v2754_v52, %v2317_v53  ;;  %v1303_v3 = vadd.f32 %v2507_v49, %v1302_v54  ;;  %v1151_v50 = vsub.f32 %v2755_v56, %v2321_v57 }
 0x2f5   : > { %v2515_v2 = vpop.eup %1831  ;;  %1857 = vpow2.f32 %v1252_v18  ;;  %v1339_v23 = vadd.f32 %v1824_v63, %v1338_v1  ;;  %1408 = vmatpush1.msra.mxu1 %v1820_v47  ;;  %v1264_v18 = vmul.f32 1.442695, %v1147_v59  ;;  %v2757_v1 = vld [vmem:[#allocation32_spill] sm:$0xff]  ;;  %v1268_v59 = vmul.f32 1.442695, %v1149_v58 }
 0x2f6   : > { %v2519_v55 = vpop.eup %1833  ;;  %1859 = vpow2.f32 %v1254_v60  ;;  %1409 = vmatprep.subr.mxu1 %v1818_v41  ;;  %v1304_v60 = vadd.f32 %v2515_v2, %v1303_v3  ;;  %v1270_v43 = vmul.f32 1.442695, %v1150_v45  ;;  %v1155_v58 = vsub.f32 %v2280_v61, %v2321_v57  ;;  %v2759_v61 = vld [vmem:[#allocation34_spill] sm:$0xff] }
 0x2f7   : > { %v2524_v22 = vpop.eup %1835  ;;  %1861 = vpow2.f32 %v1256_v38  ;;  %v1340_v63 = vadd.f32 %v2511_v15, %v1339_v23  ;;  %1410 = vmatpush1.msra.mxu1 %v1816_v30  ;;  %v1153_v38 = vsub.f32 %v2757_v1, %v2321_v57  ;;  %v1157_v45 = vsub.f32 %v2292_v33, %v2321_v57 }
 0x2f8   : > { %v2529_v47 = vpop.eup %1837  ;;  %1863 = vpow2.f32 %v1258_v4  ;;  %1411 = vmatprep.subr.mxu1 %v2487_v51  ;;  %v2758_v4 = vld [vmem:[#allocation33_spill] sm:$0xff]  ;;  %v1305_v51 = vadd.f32 %v2524_v22, %v1304_v60  ;;  %v1156_v56 = vsub.f32 %v2759_v61, %v2317_v53 }
 0x2f9   : > { %v2535_v41 = vpop.eup %1839  ;;  %1865 = vpow2.f32 %v1260_v13  ;;  %v1341_v30 = vadd.f32 %v2519_v55, %v1340_v63  ;;  %1412 = vmatpush1.msra.mxu1 %v2482_v42  ;;  %v1154_v62 = vsub.f32 %v2758_v4, %v2317_v53  ;;  %v1272_v13 = vmul.f32 1.442695, %v1151_v50 }
 0x2fa   : > { %v2541_v54 = vpop.eup %1841  ;;  %1867 = vpow2.f32 %v1262_v46  ;;  %1413 = vmatprep.subr.mxu1 %v2477_v25  ;;  %v1274_v46 = vmul.f32 1.442695, %v1152_v26  ;;  %v1306_v25 = vadd.f32 %v2535_v41, %v1305_v51  ;;  %v1276_v50 = vmul.f32 1.442695, %v1153_v38 }
 0x2fb   : > { %v2547_v23 = vpop.eup %1843  ;;  %1869 = vpow2.f32 %v1264_v18  ;;  %v1342_v42 = vadd.f32 %v2529_v47, %v1341_v30  ;;  %1414 = vmatpush1.msra.mxu1 %v2472_v48  ;;  %v1278_v33 = vmul.f32 1.442695, %v1154_v62  ;;  %v1280_v63 = vmul.f32 1.442695, %v1155_v58 }
 0x2fc   : > { %v2553_v52 = vpop.eup %1845  ;;  %1871 = vpow2.f32 %v1266_v32  ;;  %1415 = vmatprep.subr.mxu1 %v2467_v19  ;;  %v1307_v57 = vadd.f32 %v2547_v23, %v1306_v25 }
 0x2fd   : > { %v2559_v3 = vpop.eup %1847  ;;  %1873 = vpow2.f32 %v1268_v59  ;;  %v1343_v48 = vadd.f32 %v2541_v54, %v1342_v42  ;;  %1416 = vmatpush1.msra.mxu1 %v2462_v44  ;;  %v1284_v44 = vmul.f32 1.442695, %v1157_v45 }
 0x2fe   : > { %v2565_v18 = vpop.eup %1849  ;;  %1875 = vpow2.f32 %v1270_v43  ;;  %1417 = vmatprep.subr.mxu1 %v2457_v35  ;;  %v1308_v26 = vadd.f32 %v2559_v3, %v1307_v57  ;;  %v1282_v35 = vmul.f32 1.442695, %v1156_v56 }
 0x2ff   : > { %v2569_v19 = vpop.eup %1851  ;;  %1877 = vpow2.f32 %v1272_v13  ;;  %v1344_v53 = vadd.f32 %v2553_v52, %v1343_v48  ;;  %1418 = vmatpush1.msra.mxu1 %v2452_v11 }
 0x300   : > { %v2573_v9 = vpop.eup %1853  ;;  %1879 = vpow2.f32 %v1274_v46  ;;  %1419 = vmatprep.subr.mxu1 %v2447_v29  ;;  %v1309_v11 = vadd.f32 %v2569_v19, %v1308_v26 }
 0x301   : > { %v2577_v32 = vpop.eup %1855  ;;  %1881 = vpow2.f32 %v1276_v50  ;;  %v1345_v60 = vadd.f32 %v2565_v18, %v1344_v53  ;;  %1420 = vmatpush1.msra.mxu1 %v2442_v5 }
 0x302   : > { %v2581_v1 = vpop.eup %1857  ;;  %1883 = vpow2.f32 %v1278_v33  ;;  %1421 = vmatprep.subr.mxu1 %v2437_v40  ;;  %v1310_v30 = vadd.f32 %v2577_v32, %v1309_v11 }
 0x303   : > { %v2585_v38 = vpop.eup %1859  ;;  %1885 = vpow2.f32 %v1280_v63  ;;  %v1346_v29 = vadd.f32 %v2573_v9, %v1345_v60  ;;  %1422 = vmatpush1.msra.mxu1 %v2432_v0 }
 0x304   : > { %v2589_v59 = vpop.eup %1861  ;;  %1887 = vpow2.f32 %v1284_v44  ;;  %1423 = vmatprep.subr.mxu1 %v2427_v21  ;;  %v1311_v62 = vadd.f32 %v2585_v38, %v1310_v30 }
 0x305   : > { %v2593_v5 = vpop.eup %1863  ;;  %1889 = vpow2.f32 %v1282_v35  ;;  %v1347_v4 = vadd.f32 %v2581_v1, %v1346_v29  ;;  %1424 = vmatpush1.msra.mxu1 %v2422_v36 }
 0x306   : > { %v2597_v40 = vpop.eup %1865  ;;  %1425 = vmatprep.subr.mxu1 %v2417_v34  ;;  %v1312_v21 = vadd.f32 %v2593_v5, %v1311_v62 }
 0x307   : > { %v1868_v0 = vpop.eup %1867  ;;  %v1348_v43 = vadd.f32 %v2589_v59, %v1347_v4  ;;  %1426 = vmatpush1.msra.mxu1 %v2412_v16 }
 0x308   : > { %v1870_v51 = vpop.eup %1869  ;;  %1427 = vmatprep.subr.mxu1 %v2407_v6  ;;  %v1313_v42 = vadd.f32 %v1868_v0, %v1312_v21 }
 0x309   : > { %v1872_v58 = vpop.eup %1871  ;;  %v1349_v13 = vadd.f32 %v2597_v40, %v1348_v43  ;;  %1428 = vmatpush1.msra.mxu1 %v2402_v8 }
 0x30a   : > { %v1874_v36 = vpop.eup %1873  ;;  %1429 = vmatprep.subr.mxu1 %v2397_v24  ;;  %v1314_v16 = vadd.f32 %v1872_v58, %v1313_v42 }
 0x30b   : > { %v1876_v34 = vpop.eup %1875  ;;  %v1350_v45 = vadd.f32 %v1870_v51, %v1349_v13  ;;  %1430 = vmatpush1.msra.mxu1 %v2391_v39 }
 0x30c   : > { %v1878_v46 = vpop.eup %1877  ;;  %1431 = vmatprep.subr.mxu1 %v2385_v7  ;;  %v1315_v56 = vadd.f32 %v1876_v34, %v1314_v16 }
 0x30d   : > { %v1880_v25 = vpop.eup %1879  ;;  %v1351_v61 = vadd.f32 %v1874_v36, %v1350_v45  ;;  %1432 = vmatpush1.msra.mxu1 %v2381_v20  ;;  %v2760_v20 = vsub.f32 %v2300_v27, %v2304_v37 }
 0x30e   : > { %v1882_v6 = vpop.eup %1881  ;;  %1433 = vmatprep.subr.mxu1 %v2377_v28  ;;  %v1316_v48 = vadd.f32 %v1880_v25, %v1315_v56 }
 0x30f   : > { %v1884_v8 = vpop.eup %1883  ;;  %v1352_v50 = vadd.f32 %v1878_v46, %v1351_v61  ;;  %1434 = vmatpush1.msra.mxu1 %v2373_v14  ;;  %v1081_v63 = vmul.f32 1.442695, %v2760_v20 }
 0x310   : > { %v1886_v24 = vpop.eup %1885  ;;  %1435 = vmatprep.subr.mxu1 %v2369_v12  ;;  %v1317_v57 = vadd.f32 %v1884_v8, %v1316_v48  ;;  %v1896_v48 = vld [vmem:[%s1998_s13 + $0x8] sm:$0xff] }
 0x311   : > { %v1888_v39 = vpop.eup %1887  ;;  %v1353_v33 = vadd.f32 %v1882_v6, %v1352_v50  ;;  %1436 = vmatpush1.msra.mxu1 %v2365_v10  ;;  %1891 = vpow2.f32 %v1081_v63 }
 0x312   : > { %v1890_v7 = vpop.eup %1889  ;;  %1437 = vmatprep.subr.mxu1 %v1888_v39 }
 0x313   : > { %v1354_v28 = vadd.f32 %v1886_v24, %v1353_v33  ;;  %1438 = vmatpush2.msra.mxu1 %v1890_v7  ;;  %v1318_v53 = vadd.f32 %v1890_v7, %v1317_v57  ;;  %v1534_v33 = vunpack.c.h.bf16 %v1896_v48 }
 0x314   : > { %1439 = vmatprep.subr.mxu1 %v1886_v24 }
 0x315   : > { %v1355_v14 = vadd.f32 %v1888_v39, %v1354_v28  ;;  %1440 = vmatpush2.msra.mxu1 %v1884_v8  ;;  %v1319_v44 = vrot.slane %v1318_v53, 4  ;;  %v1533_v39 = vunpack.c.l.bf16 %v1896_v48 }
 0x316   : > { %1441 = vmatprep.subr.mxu1 %v1882_v6 }
 0x317   : > { %v1356_v12 = vrot.slane %v1355_v14, 4  ;;  %1442 = vmatpush2.msra.mxu1 %v1880_v25  ;;  %v1320_v26 = vadd.f32 %v1319_v44, %v1318_v53 }
 0x318   : > { %1443 = vmatprep.subr.mxu1 %v1878_v46 }
 0x319   : > { %v1357_v10 = vadd.f32 %v1356_v12, %v1355_v14  ;;  %1444 = vmatpush2.msra.mxu1 %v1876_v34  ;;  %v1321_v35 = vrot.slane %v1320_v26, 2  ;;  %v1895_v34 = vld [vmem:[%s1998_s13] sm:$0xff] }
 0x31a   : > { %1445 = vmatprep.subr.mxu1 %v1874_v36  ;;  %v1531_v45 = vunpack.c.l.bf16 %v1895_v34  ;;  %v1532_v61 = vunpack.c.h.bf16 %v1895_v34 }
 0x31b   : > { %v1358_v60 = vrot.slane %v1357_v10, 2  ;;  %1446 = vmatpush2.msra.mxu1 %v1872_v58  ;;  %v1322_v27 = vadd.f32 %v1321_v35, %v1320_v26 }
 0x31c   : > { %1447 = vmatprep.subr.mxu1 %v1870_v51  ;;  %v1286_v51 = vld [vmem:[#allocation4] sm:$0x3] }
 0x31d   : > { %v1359_v37 = vadd.f32 %v1358_v60, %v1357_v10  ;;  %1448 = vmatpush2.msra.mxu1 %v1868_v0  ;;  %v1323_v11 = vrot.slane %v1322_v27, 1 }
 0x31e   : > { %1449 = vmatprep.subr.mxu1 %v2597_v40  ;;  %v1892_v43 = vpop.eup %1891 }
 0x31f   : > { %v1360_v29 = vrot.slane %v1359_v37, 1  ;;  %1450 = vmatpush2.msra.mxu1 %v2593_v5  ;;  %v1324_v30 = vadd.f32 %v1323_v11, %v1322_v27  ;;  %v1287_v5 = vmul.f32 %v1892_v43, %v1286_v51 }
 0x320   : > { %1451 = vmatprep.subr.mxu1 %v2589_v59 }
 0x321   : > { %v1361_v4 = vadd.f32 %v1360_v29, %v1359_v37  ;;  %1452 = vmatpush2.msra.mxu1 %v2585_v38 }
 0x322   : > { %1453 = vmatprep.subr.mxu1 %v2581_v1 }
 0x323   : > { %v1364_v62 = vcombine.low %v1324_v30, %v1361_v4  ;;  %1454 = vmatpush2.msra.mxu1 %v2577_v32 }
 0x324   : > { %1455 = vmatprep.subr.mxu1 %v2573_v9 }
 0x325   : > { %v1371_v40 = vrot.slane %v1364_v62, %v2297_v31  ;;  %1456 = vmatpush2.msra.mxu1 %v2569_v19 }
 0x326   : > { %1457 = vmatprep.subr.mxu1 %v2565_v18  ;;  %v470_v18 = vpop.permute.xlu0 %469 }
 0x327   : > { %v1378_v59 = vrot.slane %v1371_v40, %v2297_v31  ;;  %1458 = vmatpush2.msra.mxu1 %v2559_v3  ;;  %v2761_v31 = vld [vmem:[#allocation8_spill] sm:$0xff] }
 0x328   : > { %1459 = vmatprep.subr.mxu1 %v2553_v52  ;;  %v2762_v52 = vld [vmem:[#allocation7_spill] sm:$0xff] }
 0x329   : > { %v1380_v1 = vadd.f32 %v1378_v59, %v1287_v5  ;;  %1460 = vmatpush2.msra.mxu1 %v2547_v23  ;;  %v537_v3 = vadd.f32 %v2762_v52, %v2761_v31 }
 0x32a   : > { %1461 = vmatprep.subr.mxu1 %v2541_v54  ;;  %v2763_v54 = vld [vmem:[#allocation10_spill] sm:$0xff]  ;;  %v1523_v42 = vpop.permute.xlu0 %1522 }
 0x32b   : > { %1385 = vst.msk [vmem:[#allocation4] sm:$0x3] %vm2109_vm3, %v1380_v1  ;;  %1462 = vmatpush2.msra.mxu1 %v2535_v41  ;;  %v543_v23 = vadd.f32 %v2763_v54, %v470_v18  ;;  %v2766_v41 = vld [vmem:[#allocation36_spill] sm:$0xff] }
 0x32c   : > { %1463 = vmatprep.subr.mxu1 %v2529_v47  ;;  %v541_v47 = vadd.f32 %v2764_v17, %v470_v18  ;;  %v1398_v19 = vrot.slane %v1892_v43, %v2766_v41 }
 0x32d   : > { %1464 = vmatpush2.msra.mxu1 %v2524_v22 }
 0x32e   : > { %1465 = vmatprep.subr.mxu1 %v2519_v55  ;;  %v2765_v55 = vld [vmem:[#allocation35_spill] sm:$0xff]  ;;  %v1402_v21 = vmul.f32 0.0, %v1398_v19 }
 0x32f   : > { %1466 = vmatpush2.msra.mxu1 %v2515_v2  ;;  %v1394_v2 = vrot.slane %v1892_v43, %v2765_v55 }
 0x330   : > { %1467 = vmatprep.subr.mxu1 %v2511_v15 }
 0x331   : > { %1468 = vmatpush2.msra.mxu1 %v2507_v49  ;;  %v1401_v32 = vmul.f32 0.0, %v1394_v2 }
 0x332   : > { %1470 = vmatmul.mubr.f32.vlgmr.msra.gmra.mxu1 %v537_v3  ;;  %v1494_v22 = vld [vmem:[#allocation4] sm:$0x3] }
 0x333   : > { %1475 = vmatprep.mubr.f32.mxu1 %v543_v23  ;;  %1893 = vrcp.f32 %v1494_v22 }
 0x336   : > { %1476 = vmatmul.mubr.f32.gmra.mxu1 %v541_v47 }
 0x340   : > { %v1894_v9 = vpop.eup %1893 }
 0x341   : > { %v1504_v0 = vrot.slane %v1894_v9, %v2765_v55  ;;  %v1508_v36 = vrot.slane %v1894_v9, %v2766_v41 }
 0x3f2   : > { %v1471_v38 = vpop.f32.mrf.mxu1 }
 0x3f3   : > { %v1482_v15 = vadd.f32 %v1471_v38, %v1401_v32 }
 0x3f4   : > { %v1473_v49 = vpop.f32.mrf.mxu1 }
 0x3f5   : > { %v1511_v58 = vmul.f32 %v1504_v0, %v1482_v15  ;;  %v1483_v13 = vadd.f32 %v1473_v49, %v1402_v21 }
 0x3f6   : > { %v1477_v46 = vpop.f32.mrf.mxu1 }
 0x3f7   : > { %v1525_v16 = vmul.f32 %v1523_v42, %v1511_v58  ;;  %v1512_v25 = vmul.f32 %v1508_v36, %v1483_v13  ;;  %v1484_v6 = vadd.f32 %v1477_v46, %v1401_v32 }
 0x3f8   : > { %v1479_v56 = vpop.f32.mrf.mxu1 }
 0x3f9   : > { %v1526_v8 = vmul.f32 %v1523_v42, %v1512_v25  ;;  %v1513_v50 = vmul.f32 %v1504_v0, %v1484_v6  ;;  %v1485_v24 = vadd.f32 %v1479_v56, %v1402_v21  ;;  %v1535_v7 = vadd.f32 %v1531_v45, %v1525_v16 }
 0x3fb   : > { %v1536_v57 = vadd.f32 %v1532_v61, %v1526_v8  ;;  %v1527_v20 = vmul.f32 %v1523_v42, %v1513_v50  ;;  %v1514_v63 = vmul.f32 %v1508_v36, %v1485_v24 }
 0x3fd   : > { %v1725_v28 = vpack.c.bf16 %v1536_v57, %v1535_v7  ;;  %v1528_v53 = vmul.f32 %v1523_v42, %v1514_v63  ;;  %v1537_v14 = vadd.f32 %v1533_v39, %v1527_v20 }
 0x3ff   : > { %1551 = vst [vmem:[%s361_s9] sm:$0xff] %v1725_v28  ;;  %v1538_v44 = vadd.f32 %v1534_v33, %v1528_v53 }
 0x401   : > { %v1726_v12 = vpack.c.bf16 %v1538_v44, %v1537_v14 }
 0x403   : > { %1552 = vst [vmem:[%s361_s9 + $0x8] sm:$0xff] %v1726_v12 }
 0x404 PF: > { %s19_s28 = sadd.s32 1, %s1919_s28   ;;  %s2767_s26 = smov %s1915_s27 }
 0x405   : > { %p16_p5 = scmp.ge.s32.totalorder %s19_s28, 4   ;;  %s2768_s27 = smov %s2770_s6 }
 0x407   :  { %18 = sbr.rel (!%p16_p5) target bundleno = 3 (0x3), region = 89 }

// kernel: danet_head_forward.5
= control target key start
LH: loop header
LB: loop body
LE: loop exit
PB: predicated region body
PF: predicated region fallthrough
CT: control target
= control target key end

     0   :  { %s1243_s21 = smov 0   ;;  %s1335_s0 = inlined_call_operand.vmem [shape: bf16[2,16,384], index: 0, kind: input, shape index: {}]   ;;  %s1336_s1 = inlined_call_operand.vmem [shape: bf16[9,16,16], index: 1, kind: input, shape index: {}]   ;;  %s1337_s2 = inlined_call_operand.vmem [shape: f32[16,1], index: 2, kind: input, shape index: {}]   ;;  %s1338_s3 = inlined_call_operand.vmem [shape: f32[16,1], index: 3, kind: input, shape index: {}]   ;;  %s1339_s4 = inlined_call_operand.vmem [shape: f32[8,16], index: 4, kind: input, shape index: {}]   ;;  %s1340_s5 = inlined_call_operand.vmem [shape: f32[8,1], index: 5, kind: input, shape index: {}]   ;;  %s1341_s6 = inlined_call_operand.vmem [shape: f32[2,8,256], index: 6, kind: output, shape index: {}]  }
   0x1 LB: > { %s1101_s22 = sadd.s32 4294967295, %s1196_s21   ;;  %p1105_p0 = scmp.ge.s32.totalorder %s1196_s21, 1  ;;  %s1196_s21 = sphi %s1243_s21, %s16_s21  }
   0x2   : > { %p212_p1 = scmp.lt.s32.totalorder %s1196_s21, 3 }
   0x4   : > { %p213_p2 = pnand %p1105_p0, %p212_p1 }
   0x5   : > { %p242_p3 = scmp.lt.s32.totalorder (!%p213_p2), %s1101_s22, 1  ;;  %s1199_s27 = smov (!%p213_p2), 112  }
   0x6   : > { %216 = sbr.rel (%p213_p2) target bundleno = 593 (0x251), region = 44  ;;  %s1200_s30 = smov (!%p213_p2), 96  }
   0x7   : > { %s1201_s7 = smov (!%p213_p2), 111   ;;  %s1202_s8 = smov (!%p213_p2), 127  }
   0x8   : > { %s1203_s9 = smov (!%p213_p2), 95   ;;  %s1204_s10 = smov (!%p213_p2), 110  }
   0x9   : > { %s1205_s11 = smov (!%p213_p2), 126   ;;  %s1206_s12 = smov (!%p213_p2), 94  }
   0xb   : > { %s1343_s22 = smov (!%p242_p3, %s1101_s22), 1  ;;  %v1198_v0 = vmov 0   ;;  %v1182_v4 = vld [vmem:[%s1336_s1] sm:$0xff]   ;;  %vm332_vm0 = vcmask 130048   ;;  %v928_v5 = vld [vmem:[%s1337_s2 + $0x8] sm:$0xff]  ;;  %vm327_vm1 = vcmask 916480  }
   0xc   : > { %s1156_s23 = smul.u32 24, %s1343_s22  ;;  %368 = vmatprep.mubr.bf16.mxu0 %v1198_v0  ;;  %429 = vmatprep.mubr.bf16.mxu1 %v1198_v0  ;;  %v927_v6 = vld [vmem:[%s1337_s2] sm:$0xff]  ;;  %v944_v8 = vld [vmem:[%s1338_s3 + $0x8] sm:$0xff]  ;;  %vm454_vm2 = vcmask 785408   ;;  %v1181_v16 = vld [vmem:[%s1336_s1 + $0x18] sm:$0xff]   ;;  %vm534_vm3 = vcmask 908288  }
   0xd   : > { %1176 = vset.pattern.permute.xlu1 %v1198_v0  ;;  %1175 = vset.pattern.permute.xlu0 %v1198_v0  ;;  %v943_v7 = vld [vmem:[%s1338_s3] sm:$0xff]  ;;  %v1183_v24 = vld [vmem:[%s1336_s1 + $0x30] sm:$0xff]   ;;  %vm596_vm4 = vcmask 1039360   ;;  %v1185_v33 = vld [vmem:[%s1336_s1 + $0x8] sm:$0xff]   ;;  %vm661_vm5 = vcmask 777216   ;;  %vm737_vm6 = vcmask 900096  }
   0xe   : > { %s246_s26 = scalar_lea.vmem %s1335_s0, %s1156_s23  ;;  %v964_v9 = vld [vmem:[%s1340_s5] sm:$0xff]  ;;  %v1186_v40 = vld [vmem:[%s1336_s1 + $0x38] sm:$0xff]   ;;  %v1187_v45 = vld [vmem:[%s1336_s1 + $0x28] sm:$0xff]   ;;  %vm799_vm7 = vcmask 1031168   ;;  %vm864_vm8 = vcmask 769024   ;;  %v1207_v58 = vmov 0.0  }
   0xf   : > { %v1177_v1 = vld [vmem:[%s246_s26 + $0x4] ss:$12 sps:$4 sm:$0xff]   ;;  %v1179_v2 = vld [vmem:[%s246_s26] ss:$12 sps:$4 sm:$0xff]   ;;  %v1180_v3 = vld [vmem:[%s246_s26 + $0x8] ss:$12 sps:$4 sm:$0xff]  }
  0x10   : > { %323 = vrot.lane.b32.xlu0 %v1177_v1, %s1199_s27  ;;  %411 = vmatprep.subr.bf16.mxu1 %v1177_v1  ;;  %v1184_v28 = vld [vmem:[%s1336_s1 + $0x20] sm:$0xff]   ;;  %v1188_v52 = vld [vmem:[%s1336_s1 + $0x10] sm:$0xff]   ;;  %s1155_s19 = sshll.u32 %s1343_s22, 4 }
  0x11   : > { %321 = vrot.lane.b32.xlu1 %v1179_v2, %s1199_s27  ;;  %412 = vmatpush1.bf16.msra.mxu1 %v1179_v2  ;;  %v1189_v57 = vld [vmem:[%s1336_s1 + $0x40] sm:$0xff]   ;;  %s251_s24 = scalar_lea.vmem %s1341_s6, %s1155_s19 }
  0x14   : > { %325 = vrot.lane.b32.xlu0 %v1180_v3, %s1199_s27  ;;  %1123 = vmatmul.mubr.msk.bf16.vlgmr.msra.gmra.mxu1 %vm332_vm0, %v1182_v4 }
  0x15   : > { %450 = vrot.lane.b32.xlu1 %v1177_v1, %s1200_s30  ;;  %574 = vmatprep.mubr.bf16.mxu1 %v1198_v0 }
  0x18   : > { %452 = vrot.lane.b32.xlu0 %v1180_v3, %s1200_s30 }
  0x19   : > { %448 = vrot.lane.b32.xlu1 %v1179_v2, %s1200_s30 }
  0x1c   : > { %530 = vrot.lane.b32.xlu0 %v1177_v1, %s1201_s7 }
  0x1d   : > { %532 = vrot.lane.b32.xlu1 %v1180_v3, %s1201_s7 }
  0x20   : > { %528 = vrot.lane.b32.xlu0 %v1179_v2, %s1201_s7 }
  0x21   : > { %592 = vrot.lane.b32.xlu1 %v1177_v1, %s1202_s8 }
  0x24   : > { %594 = vrot.lane.b32.xlu0 %v1180_v3, %s1202_s8 }
  0x25   : > { %590 = vrot.lane.b32.xlu1 %v1179_v2, %s1202_s8 }
  0x28   : > { %657 = vrot.lane.b32.xlu0 %v1177_v1, %s1203_s9 }
  0x29   : > { %659 = vrot.lane.b32.xlu1 %v1180_v3, %s1203_s9 }
  0x2c   : > { %655 = vrot.lane.b32.xlu0 %v1179_v2, %s1203_s9 }
  0x2d   : > { %733 = vrot.lane.b32.xlu1 %v1177_v1, %s1204_s10 }
  0x30   : > { %735 = vrot.lane.b32.xlu0 %v1180_v3, %s1204_s10 }
  0x31   : > { %731 = vrot.lane.b32.xlu1 %v1179_v2, %s1204_s10 }
  0x34   : > { %795 = vrot.lane.b32.xlu0 %v1177_v1, %s1205_s11 }
  0x35   : > { %797 = vrot.lane.b32.xlu1 %v1180_v3, %s1205_s11 }
  0x38   : > { %793 = vrot.lane.b32.xlu0 %v1179_v2, %s1205_s11 }
  0x39   : > { %860 = vrot.lane.b32.xlu1 %v1177_v1, %s1206_s12 }
  0x3c   : > { %862 = vrot.lane.b32.xlu0 %v1180_v3, %s1206_s12 }
  0x3d   : > { %858 = vrot.lane.b32.xlu1 %v1179_v2, %s1206_s12 }
  0x40   : > { %936 = vperm.xlu0 %1175, %v928_v5  }
  0x41   : > { %931 = vperm.xlu1 %1176, %v927_v6  }
  0x44   : > { %947 = vperm.xlu0 %1175, %v943_v7  }
  0x45   : > { %952 = vperm.xlu1 %1176, %v944_v8  }
  0x49   : > { %967 = vperm.xlu1 %1176, %v964_v9  }
  0x82   : > { %v324_v10 = vpop.permute.xlu0 %323 }
  0x83   : > { %v322_v11 = vpop.permute.xlu1 %321 }
  0x84   : > { %v328_v15 = vsel %vm327_vm1, %v322_v11, %v324_v10 }
  0x86   : > { %v326_v12 = vpop.permute.xlu0 %325 }
  0x87   : > { %v451_v13 = vpop.permute.xlu1 %450  ;;  %v329_v14 = vsel %vm327_vm1, %v324_v10, %v326_v12 }
  0x88   : > { %350 = vmatprep.subr.bf16.mxu0 %v329_v14 }
  0x89   : > { %351 = vmatpush1.bf16.msra.mxu0 %v328_v15 }
  0x8a   : > { %v453_v17 = vpop.permute.xlu0 %452 }
  0x8b   : > { %v449_v18 = vpop.permute.xlu1 %448  ;;  %v456_v19 = vsel %vm454_vm2, %v451_v13, %v453_v17 }
  0x8c   : > { %v455_v20 = vsel %vm454_vm2, %v449_v18, %v451_v13  ;;  %1119 = vmatmul.mubr.msk.bf16.vlgmr.msra.gmra.mxu0 %vm332_vm0, %v1181_v16  ;;  %476 = vmatprep.subr.bf16.mxu0 %v456_v19  ;;  %v253_v13 = vlaneseq }
  0x8d   : > { %477 = vmatpush1.bf16.msra.mxu0 %v455_v20  ;;  %494 = vmatprep.mubr.bf16.mxu0 %v1198_v0 }
  0x8e   : > { %v531_v21 = vpop.permute.xlu0 %530  ;;  %v254_v16 = vand.u32 127, %v253_v13 }
  0x8f   : > { %v533_v22 = vpop.permute.xlu1 %532 }
  0x90   : > { %v536_v23 = vsel %vm534_vm3, %v531_v21, %v533_v22  ;;  %v255_v19 = vadd.s32 128, %v254_v16 }
  0x91   : > { %556 = vmatprep.subr.bf16.mxu1 %v536_v23  ;;  %v260_v23 = vand.u32 15, %v254_v16 }
  0x92   : > { %v529_v25 = vpop.permute.xlu0 %528 }
  0x93   : > { %v535_v26 = vsel %vm534_vm3, %v529_v25, %v531_v21  ;;  %v593_v27 = vpop.permute.xlu1 %592  ;;  %vm280_vm9 = vcmp.ne.s32.totalorder %v260_v23, 0  ;;  %vm286_vm11 = vcmp.ne.s32.totalorder %v260_v23, 15 }
  0x94   : > { %1127 = vmatmul.mubr.msk.bf16.vlgmr.msra.gmra.mxu0 %vm332_vm0, %v1183_v24  ;;  %557 = vmatpush1.bf16.msra.mxu1 %v535_v26  ;;  %v267_v24 = vand.u32 15, %v255_v19 }
  0x95   : > { %636 = vmatprep.mubr.bf16.mxu0 %v1198_v0 }
  0x96   : > { %v595_v29 = vpop.permute.xlu0 %594  ;;  %vm281_vm10 = vcmp.ne.s32.totalorder %v267_v24, 0  ;;  %vm287_vm12 = vcmp.ne.s32.totalorder %v267_v24, 15 }
  0x97   : > { %v591_v30 = vpop.permute.xlu1 %590  ;;  %v598_v31 = vsel %vm596_vm4, %v593_v27, %v595_v29  ;;  %1133 = vmatmul.mubr.msk.bf16.vlgmr.msra.gmra.mxu1 %vm332_vm0, %v1184_v28 }
  0x98   : > { %v597_v32 = vsel %vm596_vm4, %v591_v30, %v593_v27  ;;  %618 = vmatprep.subr.bf16.mxu0 %v598_v31  ;;  %701 = vmatprep.mubr.bf16.mxu1 %v1198_v0 }
  0x99   : > { %619 = vmatpush1.bf16.msra.mxu0 %v597_v32 }
  0x9a   : > { %v658_v34 = vpop.permute.xlu0 %657 }
  0x9b   : > { %v660_v35 = vpop.permute.xlu1 %659 }
  0x9c   : > { %1135 = vmatmul.mubr.msk.bf16.vlgmr.msra.gmra.mxu0 %vm332_vm0, %v1185_v33  ;;  %v663_v36 = vsel %vm661_vm5, %v658_v34, %v660_v35 }
  0x9d   : > { %683 = vmatprep.subr.bf16.mxu1 %v663_v36  ;;  %777 = vmatprep.mubr.bf16.mxu0 %v1198_v0  ;;  %v1109_v36 = vsel %vm280_vm9, 1.0, %v1207_v58 }
  0x9e   : > { %v656_v37 = vpop.permute.xlu0 %655 }
  0x9f   : > { %v662_v38 = vsel %vm661_vm5, %v656_v37, %v658_v34  ;;  %v734_v39 = vpop.permute.xlu1 %733  ;;  %v1110_v37 = vsel %vm281_vm10, 1.0, %v1207_v58 }
  0xa0   : > { %684 = vmatpush1.bf16.msra.mxu1 %v662_v38 }
  0xa2   : > { %v736_v41 = vpop.permute.xlu0 %735 }
  0xa3   : > { %v732_v42 = vpop.permute.xlu1 %731  ;;  %1139 = vmatmul.mubr.msk.bf16.vlgmr.msra.gmra.mxu1 %vm332_vm0, %v1186_v40  ;;  %v739_v43 = vsel %vm737_vm6, %v734_v39, %v736_v41 }
  0xa4   : > { %v738_v44 = vsel %vm737_vm6, %v732_v42, %v734_v39  ;;  %759 = vmatprep.subr.bf16.mxu0 %v739_v43  ;;  %839 = vmatprep.mubr.bf16.mxu1 %v1198_v0 }
  0xa5   : > { %760 = vmatpush1.bf16.msra.mxu0 %v738_v44 }
  0xa6   : > { %v796_v46 = vpop.permute.xlu0 %795 }
  0xa7   : > { %v798_v47 = vpop.permute.xlu1 %797 }
  0xa8   : > { %1145 = vmatmul.mubr.msk.bf16.vlgmr.msra.gmra.mxu0 %vm332_vm0, %v1187_v45  ;;  %v801_v48 = vsel %vm799_vm7, %v796_v46, %v798_v47  ;;  %v1111_v47 = vsel %vm286_vm11, 1.0, %v1207_v58 }
  0xa9   : > { %821 = vmatprep.subr.bf16.mxu1 %v801_v48  ;;  %904 = vmatprep.mubr.bf16.mxu0 %v1198_v0 }
  0xaa   : > { %v794_v49 = vpop.permute.xlu0 %793 }
  0xab   : > { %v800_v50 = vsel %vm799_vm7, %v794_v49, %v796_v46  ;;  %v861_v51 = vpop.permute.xlu1 %860 }
  0xac   : > { %822 = vmatpush1.bf16.msra.mxu1 %v800_v50 }
  0xae   : > { %v863_v53 = vpop.permute.xlu0 %862 }
  0xaf   : > { %v859_v54 = vpop.permute.xlu1 %858  ;;  %1147 = vmatmul.mubr.msk.bf16.vlgmr.msra.gmra.mxu1 %vm332_vm0, %v1188_v52  ;;  %v866_v55 = vsel %vm864_vm8, %v861_v51, %v863_v53  ;;  %v1112_v53 = vsel %vm287_vm12, 1.0, %v1207_v58 }
  0xb0   : > { %v865_v56 = vsel %vm864_vm8, %v859_v54, %v861_v51  ;;  %886 = vmatprep.subr.bf16.mxu0 %v866_v55  ;;  %1037 = vmatprep.mubr.f32.mxu1 %v1207_v58 }
  0xb1   : > { %887 = vmatpush1.bf16.msra.mxu0 %v865_v56 }
  0xb4   : > { %1151 = vmatmul.mubr.msk.bf16.vlgmr.msra.gmra.mxu0 %vm332_vm0, %v1189_v57 }
  0xd4   : > { %v431_v59 = vpop.f32.mrf.mxu1 }
  0xd6   : > { %v433_v61 = vpop.f32.mrf.mxu1 }
  0xd8   : > { %v435_v0 = vpop.f32.mrf.mxu1 }
  0xda   : > { %v437_v3 = vpop.f32.mrf.mxu1 }
 0x14c   : > { %v370_v60 = vpop.f32.mrf.mxu0 }
 0x14d   : > { %v432_v29 = vadd.f32 %v431_v59, %v370_v60 }
 0x14e   : > { %v372_v62 = vpop.f32.mrf.mxu0 }
 0x14f   : > { %v434_v26 = vadd.f32 %v433_v61, %v372_v62 }
 0x150   : > { %v374_v63 = vpop.f32.mrf.mxu0 }
 0x151   : > { %v436_v32 = vadd.f32 %v435_v0, %v374_v63 }
 0x152   : > { %v376_v1 = vpop.f32.mrf.mxu0 }
 0x153   : > { %v438_v40 = vadd.f32 %v437_v3, %v376_v1 }
 0x154   : > { %v496_v2 = vpop.f32.mrf.mxu0 }
 0x155   : > { %v505_v41 = vadd.f32 %v496_v2, %v432_v29 }
 0x156   : > { %v498_v4 = vpop.f32.mrf.mxu0 }
 0x157   : > { %v576_v5 = vpop.f32.mrf.mxu1  ;;  %v506_v33 = vadd.f32 %v498_v4, %v434_v26  ;;  %v509_v60 = vmul.f32 %v1109_v36, %v505_v41 }
 0x158   : > { %v500_v6 = vpop.f32.mrf.mxu0 }
 0x159   : > { %v578_v7 = vpop.f32.mrf.mxu1  ;;  %v507_v42 = vadd.f32 %v500_v6, %v436_v32  ;;  %v510_v49 = vmul.f32 %v1110_v37, %v506_v33  ;;  %v963_v32 = vld [vmem:[%s1339_s4] sm:$0xff] }
 0x15a   : > { %v502_v8 = vpop.f32.mrf.mxu0 }
 0x15b   : > { %v580_v9 = vpop.f32.mrf.mxu1  ;;  %v508_v50 = vadd.f32 %v502_v8, %v438_v40  ;;  %v511_v61 = vmul.f32 %v1109_v36, %v507_v42 }
 0x15c   : > { %v638_v10 = vpop.f32.mrf.mxu0 }
 0x15d   : > { %v582_v12 = vpop.f32.mrf.mxu1  ;;  %v639_v34 = vadd.f32 %v638_v10, %v576_v5  ;;  %v512_v5 = vmul.f32 %v1110_v37, %v508_v50  ;;  %v937_v10 = vpop.permute.xlu0 %936 }
 0x15e   : > { %v640_v11 = vpop.f32.mrf.mxu0 }
 0x15f   : > { %v641_v30 = vadd.f32 %v640_v11, %v578_v7 }
 0x160   : > { %v642_v14 = vpop.f32.mrf.mxu0 }
 0x161   : > { %v643_v45 = vadd.f32 %v642_v14, %v580_v9  ;;  %v932_v9 = vpop.permute.xlu1 %931  ;;  %v948_v23 = vpop.permute.xlu0 %947 }
 0x162   : > { %v644_v18 = vpop.f32.mrf.mxu0 }
 0x163   : > { %v703_v15 = vpop.f32.mrf.mxu1  ;;  %v645_v55 = vadd.f32 %v644_v18, %v582_v12 }
 0x164   : > { %v712_v51 = vadd.f32 %v703_v15, %v639_v34 }
 0x165   : > { %v705_v17 = vpop.f32.mrf.mxu1 }
 0x166   : > { %v713_v43 = vadd.f32 %v705_v17, %v641_v30  ;;  %v716_v6 = vadd.f32 %v712_v51, %v509_v60 }
 0x167   : > { %v707_v21 = vpop.f32.mrf.mxu1 }
 0x168   : > { %v779_v20 = vpop.f32.mrf.mxu0  ;;  %v714_v56 = vadd.f32 %v707_v21, %v643_v45  ;;  %v717_v62 = vadd.f32 %v713_v43, %v510_v49  ;;  %v953_v21 = vpop.permute.xlu1 %952 }
 0x169   : > { %v709_v25 = vpop.f32.mrf.mxu1 }
 0x16a   : > { %v781_v22 = vpop.f32.mrf.mxu0  ;;  %v715_v1 = vadd.f32 %v709_v25, %v645_v55  ;;  %v718_v8 = vadd.f32 %v714_v56, %v511_v61 }
 0x16c   : > { %v783_v27 = vpop.f32.mrf.mxu0  ;;  %v719_v14 = vadd.f32 %v715_v1, %v512_v5  ;;  %v968_v33 = vpop.permute.xlu1 %967 }
 0x16e   : > { %v785_v35 = vpop.f32.mrf.mxu0 }
 0x16f   : > { %v841_v28 = vpop.f32.mrf.mxu1 }
 0x170   : > { %v842_v38 = vadd.f32 %v841_v28, %v779_v20 }
 0x171   : > { %v843_v31 = vpop.f32.mrf.mxu1 }
 0x172   : > { %v844_v46 = vadd.f32 %v843_v31, %v781_v22 }
 0x173   : > { %v845_v39 = vpop.f32.mrf.mxu1 }
 0x174   : > { %v906_v44 = vpop.f32.mrf.mxu0  ;;  %v846_v57 = vadd.f32 %v845_v39, %v783_v27 }
 0x175   : > { %v915_v48 = vadd.f32 %v906_v44, %v842_v38  ;;  %v847_v52 = vpop.f32.mrf.mxu1 }
 0x176   : > { %v908_v54 = vpop.f32.mrf.mxu0  ;;  %v848_v2 = vadd.f32 %v847_v52, %v785_v35 }
 0x177   : > { %v916_v59 = vadd.f32 %v908_v54, %v844_v46  ;;  %v919_v63 = vmul.f32 %v1111_v47, %v915_v48 }
 0x178   : > { %v910_v0 = vpop.f32.mrf.mxu0 }
 0x179   : > { %v920_v3 = vmul.f32 %v1112_v53, %v916_v59  ;;  %v917_v4 = vadd.f32 %v910_v0, %v846_v57  ;;  %v923_v13 = vadd.f32 %v919_v63, %v716_v6 }
 0x17a   : > { %v912_v7 = vpop.f32.mrf.mxu0 }
 0x17b   : > { %v924_v58 = vadd.f32 %v920_v3, %v717_v62  ;;  %v921_v11 = vmul.f32 %v1111_v47, %v917_v4  ;;  %v918_v12 = vadd.f32 %v912_v7, %v848_v2  ;;  %v939_v20 = vmul.f32 %v932_v9, %v923_v13 }
 0x17d   : > { %v925_v15 = vadd.f32 %v921_v11, %v718_v8  ;;  %v922_v16 = vmul.f32 %v1112_v53, %v918_v12  ;;  %v940_v17 = vmul.f32 %v932_v9, %v924_v58  ;;  %v955_v27 = vadd.f32 %v948_v23, %v939_v20 }
 0x17f   : > { %v926_v18 = vadd.f32 %v922_v16, %v719_v14  ;;  %v941_v19 = vmul.f32 %v937_v10, %v925_v15  ;;  %v956_v26 = vadd.f32 %v948_v23, %v940_v17  ;;  %v959_v31 = vmax.f32 %v955_v27, 0.0 }
 0x181   : > { %v942_v22 = vmul.f32 %v937_v10, %v926_v18  ;;  %v957_v24 = vadd.f32 %v953_v21, %v941_v19  ;;  %v960_v30 = vmax.f32 %v956_v26, 0.0 }
 0x183   : > { %v958_v25 = vadd.f32 %v953_v21, %v942_v22  ;;  %v961_v29 = vmax.f32 %v957_v24, 0.0 }
 0x185   : > { %v962_v28 = vmax.f32 %v958_v25, 0.0 }
 0x187   : > { %1001 = vmatprep.subr.mxu1 %v962_v28 }
 0x188   : > { %1002 = vmatpush1.msra.mxu1 %v961_v29 }
 0x189   : > { %1003 = vmatprep.subr.mxu1 %v960_v30 }
 0x18a   : > { %1004 = vmatpush1.msra.mxu1 %v959_v31 }
 0x18b   : > { %1152 = vmatmul.mubr.msk.f32.vlgmr.msra.gmra.mxu1 %vm332_vm0, %v963_v32 }
 0x24b   : > { %v1039_v34 = vpop.f32.mrf.mxu1 }
 0x24c   : > { %v1040_v35 = vadd.f32 %v1039_v34, %v968_v33 }
 0x24d   : > { %v1041_v36 = vpop.f32.mrf.mxu1 }
 0x24e   : > { %1044 = vst [vmem:[%s251_s24] sm:$0xff] %v1040_v35  ;;  %v1042_v37 = vadd.f32 %v1041_v36, %v968_v33 }
 0x250   : > { %1045 = vst [vmem:[%s251_s24 + $0x8] sm:$0xff] %v1042_v37 }
 0x251 PF: > { %s16_s21 = sadd.s32 1, %s1196_s21  }
 0x252   : > { %p13_p4 = scmp.ge.s32.totalorder %s16_s21, 4  }
 0x254   :  { %15 = sbr.rel (!%p13_p4) target bundleno = 1 (0x1), region = 82 }

</bundles_post_ra>
